<compile_context>
chip_gen: v5e
topology: v5e:2x2
jax: 0.10.0
libtpu: 0.0.40
codegen_flags: <defaults>
</compile_context>

<pallas_src>
import functools

import jax
import jax.numpy as jnp
from jax.experimental import pallas as pl
from jax.experimental.pallas import tpu as pltpu


def _round_up(x, m):
    return (x + m - 1) // m * m


@functools.lru_cache(maxsize=None)
def _vmem_capacity_bytes():
    """Physical VMEM per core (128 MiB on v5e/v6e, 64 MiB on v7x)."""
    try:
        info = pltpu.get_tpu_info()
        for name in ("vmem_capacity_bytes", "vmem_size_bytes", "vmem_bytes"):
            v = getattr(info, name, None)
            if v:
                return int(v)
    except Exception:
        pass
    return 64 << 20                      # conservative fallback (v7x-sized)


@functools.lru_cache(maxsize=None)
def _counts_scatter_dtype():
    """Probe (eagerly, once) whether int8 scatter-add lowers on this backend."""
    try:
        z = jnp.zeros((8, 8), jnp.int8)
        z = z.at[jnp.array([0, 0]), jnp.array([1, 1])].add(jnp.int8(1))
        jax.block_until_ready(z)
        return jnp.int8
    except Exception:
        return jnp.float32               # fall back: scatter f32, cast to int8 after


# ----------------------------- Pallas kernels --------------------------------

def _fused_vgae_kernel(counts_ref, dinv_ref, x_ref,
                       w1_ref, b1_ref, w2_ref, b2_ref, w3_ref, b3_ref,
                       wh_ref, bh_ref, out_ref, a_ref, *, a_first):
    """Whole 5-layer encoder for graphs whose adjacency fits in VMEM.

    A_hat @ H is evaluated as dinv * (counts @ (dinv * H)); the int8 (A + I)
    counts are cast to bf16 once into a VMEM scratch, and the D^-1/2 scaling is
    applied only to narrow per-layer operands (never to the N x N matrix).
    """
    a_ref[...] = counts_ref[...].astype(jnp.float32).astype(jnp.bfloat16)
    dinv = dinv_ref[...]                                   # (n_pad, 1) float32

    def layer(h, w_ref_, b_ref_, relu, a_then_w):
        if a_then_w:                                       # (A_hat @ H) @ W  (cin <= cout)
            t = (dinv * h).astype(jnp.bfloat16)
            t = jnp.dot(a_ref[...], t, preferred_element_type=jnp.float32)
            t = (dinv * t).astype(jnp.bfloat16)
            out = jnp.dot(t, w_ref_[...], preferred_element_type=jnp.float32)
        else:                                              # A_hat @ (H @ W)  (cin > cout)
            t = jnp.dot(h, w_ref_[...], preferred_element_type=jnp.float32)
            t = (dinv * t).astype(jnp.bfloat16)
            out = dinv * jnp.dot(a_ref[...], t, preferred_element_type=jnp.float32)
        out = out + b_ref_[...]
        if relu:
            out = jnp.maximum(out, 0.0)
        return out

    h = x_ref[...].astype(jnp.bfloat16)
    h = layer(h, w1_ref, b1_ref, True, a_first[0]).astype(jnp.bfloat16)
    h = layer(h, w2_ref, b2_ref, True, a_first[1]).astype(jnp.bfloat16)
    h = layer(h, w3_ref, b3_ref, True, a_first[2]).astype(jnp.bfloat16)
    out_ref[...] = layer(h, wh_ref, bh_ref, False, a_first[3])


def _prop_kernel(counts_ref, s_ref, dinv_ref, b_ref, out_ref, acc_ref, *, relu):
    """out = act(dinv * (counts @ s) + b); contraction (K) tiled, f32 accumulator.
    `s` is already scaled by D^-1/2 (and pre-multiplied by W) on the wrapper side."""
    k = pl.program_id(1)

    @pl.when(k == 0)
    def _init():
        acc_ref[...] = jnp.zeros_like(acc_ref)

    a_blk = counts_ref[...].astype(jnp.float32).astype(jnp.bfloat16)
    acc_ref[...] += jnp.dot(a_blk, s_ref[...], preferred_element_type=jnp.float32)

    @pl.when(k == pl.num_programs(1) - 1)
    def _finalize():
        out = dinv_ref[...] * acc_ref[...] + b_ref[...]
        if relu:
            out = jnp.maximum(out, 0.0)
        out_ref[...] = out.astype(out_ref.dtype)


def _prop_post_w_kernel(counts_ref, s_ref, dinv_ref, w_ref, b_ref, out_ref, acc_ref,
                        *, relu):
    """out = act((dinv * (counts @ s)) @ W + b) - used when cin <= cout (conv1),
    so A multiplies the narrower operand and W/bias/ReLU fuse into finalize."""
    k = pl.program_id(1)

    @pl.when(k == 0)
    def _init():
        acc_ref[...] = jnp.zeros_like(acc_ref)

    a_blk = counts_ref[...].astype(jnp.float32).astype(jnp.bfloat16)
    acc_ref[...] += jnp.dot(a_blk, s_ref[...], preferred_element_type=jnp.float32)

    @pl.when(k == pl.num_programs(1) - 1)
    def _finalize():
        t = (dinv_ref[...] * acc_ref[...]).astype(jnp.bfloat16)
        out = jnp.dot(t, w_ref[...], preferred_element_type=jnp.float32) + b_ref[...]
        if relu:
            out = jnp.maximum(out, 0.0)
        out_ref[...] = out.astype(out_ref.dtype)


# ----------------------------- pallas_call wrappers ---------------------------

def _fused_call(counts, dinv, x_p, w1, b1, w2, b2, w3, b3, wh, bh):
    n_pad = counts.shape[0]
    cin, h1 = w1.shape
    h2, c3, ch = w2.shape[1], w3.shape[1], wh.shape[1]
    a_first = (cin <= h1, h1 <= h2, h2 <= c3, c3 <= ch)

    flops = 2 * n_pad * n_pad * (min(cin, h1) + min(h1, h2) + min(h2, c3) + min(c3, ch))
    flops += 2 * n_pad * (cin * h1 + h1 * h2 + h2 * c3 + c3 * ch)
    bytes_acc = (n_pad * n_pad + 4 * n_pad * (cin + 1 + ch)
                 + 2 * (cin * h1 + h1 * h2 + h2 * c3 + c3 * ch))
    need = 3 * n_pad * n_pad + (8 << 20)                  # int8 counts + bf16 A scratch
    limit = int(min(max(need, 32 << 20), 0.85 * _vmem_capacity_bytes()))

    vmem = pl.BlockSpec(memory_space=pltpu.MemorySpace.VMEM)
    return pl.pallas_call(
        functools.partial(_fused_vgae_kernel, a_first=a_first),
        out_shape=jax.ShapeDtypeStruct((n_pad, ch), jnp.float32),
        in_specs=[vmem] * 11,
        out_specs=vmem,
        scratch_shapes=[pltpu.VMEM((n_pad, n_pad), jnp.bfloat16)],
        compiler_params=pltpu.CompilerParams(vmem_limit_bytes=limit),
        cost_estimate=pl.CostEstimate(flops=int(flops), transcendentals=0,
                                      bytes_accessed=int(bytes_acc)),
    )(counts, dinv, x_p, w1, b1, w2, b2, w3, b3, wh, bh)


def _prop_tiled_call(counts, s, dinv, b, *, w=None, relu, out_dtype, row_tile, k_tile):
    """One propagation: act(dinv * (counts @ s) (@ w) + b), streamed + K-tiled."""
    n_pad = counts.shape[0]
    c_s = s.shape[1]
    cout = w.shape[1] if w is not None else c_s
    grid = (n_pad // row_tile, n_pad // k_tile)

    in_specs = [
        pl.BlockSpec((row_tile, k_tile), lambda i, k: (i, k)),   # int8 (A+I) strip (streamed)
        pl.BlockSpec((k_tile, c_s), lambda i, k: (k, 0)),        # pre-scaled narrow operand
        pl.BlockSpec((row_tile, 1), lambda i, k: (i, 0)),        # D^-1/2 for this row tile
    ]
    args = [counts, s, dinv]
    if w is not None:
        in_specs.append(pl.BlockSpec((w.shape[0], cout), lambda i, k: (0, 0)))
        args.append(w)
        kernel = functools.partial(_prop_post_w_kernel, relu=relu)
    else:
        kernel = functools.partial(_prop_kernel, relu=relu)
    in_specs.append(pl.BlockSpec((1, cout), lambda i, k: (0, 0)))
    args.append(b)

    out_bytes = jnp.dtype(out_dtype).itemsize
    flops = 2 * n_pad * n_pad * c_s + (2 * n_pad * c_s * cout if w is not None else 0)
    bytes_acc = (n_pad * n_pad + 2 * n_pad * c_s + out_bytes * n_pad * cout
                 + 4 * n_pad + 2 * c_s * cout + 4 * cout)
    need = (2 * row_tile * k_tile + 4 * k_tile * c_s + 8 * row_tile
            + 4 * row_tile * c_s + 2 * out_bytes * row_tile * cout + (8 << 20))
    limit = int(min(max(need, 32 << 20), 0.85 * _vmem_capacity_bytes()))

    return pl.pallas_call(
        kernel,
        out_shape=jax.ShapeDtypeStruct((n_pad, cout), out_dtype),
        grid_spec=pltpu.PrefetchScalarGridSpec(
            num_scalar_prefetch=0,
            grid=grid,
            in_specs=in_specs,
            out_specs=pl.BlockSpec((row_tile, cout), lambda i, k: (i, 0)),
            scratch_shapes=[pltpu.VMEM((row_tile, c_s), jnp.float32)]),
        compiler_params=pltpu.CompilerParams(
            dimension_semantics=("parallel", "arbitrary"),
            vmem_limit_bytes=limit),
        cost_estimate=pl.CostEstimate(flops=int(flops), transcendentals=0,
                                      bytes_accessed=int(bytes_acc)),
    )(*args)


# ----------------------------- JAX glue ---------------------------------------

def build_graph_operands(edge_index, num_nodes, n_pad):
    """Padded int8 (A + I) edge-count matrix (duplicates accumulate; int8 assumes
    edge multiplicity <= 127) plus the D^-1/2 vector.  A_hat is never built."""
    src, dst = edge_index[0], edge_index[1]
    sd = _counts_scatter_dtype()
    counts = jnp.zeros((n_pad, n_pad), sd)
    counts = counts.at[dst, src].add(sd(1))               # message flows src -> dst
    diag = jnp.arange(num_nodes)
    counts = counts.at[diag, diag].add(sd(1))             # self loops on real nodes only
    if counts.dtype != jnp.int8:
        counts = counts.astype(jnp.int8)
    deg = jnp.zeros((n_pad,), jnp.float32).at[dst].add(1.0)
    deg = deg + (jnp.arange(n_pad) < num_nodes).astype(jnp.float32)   # + self loop
    dinv = jnp.where(deg > 0.0, jax.lax.rsqrt(deg), 0.0)              # 0 on padded rows
    return counts, dinv.reshape(n_pad, 1)


def _pick_tile(n_pad, requested, candidates):
    if requested is not None:
        assert requested % 128 == 0 and n_pad % requested == 0, (
            "tile must be a multiple of 128 that divides the padded node count")
        return requested
    for c in candidates:
        if c <= n_pad and n_pad % c == 0:
            return c
    return n_pad


def init_params(key, input_channels, hidden1=64, hidden2=8, output_channels=2):
    """Deterministic synthetic params (glorot-ish weights, zero biases)."""
    dims = [
        (input_channels, hidden1),               # conv1
        (hidden1, hidden2),                      # conv2
        (hidden2, 2 * output_channels),          # conv3
        (2 * output_channels, output_channels),  # mu
        (2 * output_channels, output_channels),  # logvar
    ]
    params = []
    for cin, cout in dims:
        key, sub = jax.random.split(key)
        scale = (2.0 / (cin + cout)) ** 0.5
        w = scale * jax.random.normal(sub, (cin, cout), jnp.float32)
        b = jnp.zeros((1, cout), jnp.float32)    # PyG bias init is zeros; 2D for TPU layout
        params.append((w, b))
    return params


def vgraph_encoder_forward(x, edge_index, params, *, force_tiled=False,
                           row_tile=None, k_tile=None):
    """mu, logvar = VGraphEncoder(x, edge_index)."""
    n = x.shape[0]
    (w1, b1), (w2, b2), (w3, b3), (wmu, bmu), (wlv, blv) = params
    out_ch = wmu.shape[1]

    # Fuse mu / logvar heads: one propagation, lane-denser output, split at the end.
    wh = jnp.concatenate([wmu, wlv], axis=1)
    bh = jnp.concatenate([bmu, blv], axis=1)

    cap = _vmem_capacity_bytes()
    # Fused path while int8 counts + the in-kernel bf16 A copy (3 B / entry) fit
    # comfortably in VMEM: ~5.3k nodes on 128 MiB (v5e/v6e), ~3.6k on 64 MiB (v7x).
    n_pad = _round_up(n, 256)
    use_fused = (not force_tiled) and (3 * n_pad * n_pad + (4 << 20) <= int(0.70 * cap))
    if not use_fused:
        n_pad = _round_up(n, 512)                # coarser alignment -> bigger tile divisors

    counts, dinv = build_graph_operands(edge_index, n, n_pad)
    x_p = jnp.pad(x, ((0, n_pad - n), (0, 0)))
    bf = lambda a: a.astype(jnp.bfloat16)

    if use_fused:
        out = _fused_call(counts, dinv, x_p,
                          bf(w1), b1, bf(w2), b2, bf(w3), b3, bf(wh), bh)
    else:
        row_tile = _pick_tile(n_pad, row_tile, (1024, 512, 256, 128))
        k_tile = _pick_tile(n_pad, k_tile, (2048, 1024, 512, 256, 128))
        # conv1: cin <= hidden1, so A multiplies X; W1 / bias / ReLU fused into finalize.
        s = (dinv * x_p).astype(jnp.bfloat16)
        h = _prop_tiled_call(counts, s, dinv, b1, w=bf(w1), relu=True,
                             out_dtype=jnp.bfloat16, row_tile=row_tile, k_tile=k_tile)
        # conv2 / conv3 / heads: channels shrink, so the narrow H @ W (and the D^-1/2
        # scaling) is hoisted to XLA; each kernel streams A once against a width<=8 operand.
        for (w, b, relu, odt) in ((w2, b2, True, jnp.bfloat16),
                                  (w3, b3, True, jnp.bfloat16),
                                  (wh, bh, False, jnp.float32)):
            s = (dinv * jnp.dot(h.astype(jnp.float32), w,
                                preferred_element_type=jnp.float32)).astype(jnp.bfloat16)
            h = _prop_tiled_call(counts, s, dinv, b, relu=relu, out_dtype=odt,
                                 row_tile=row_tile, k_tile=k_tile)
        out = h

    out = out[:n]
    return out[:, :out_ch], out[:, out_ch:]


# ----------------------------- reference + checks -----------------------------

def _reference_normalized_adjacency(edge_index, num_nodes):
    src, dst = edge_index[0], edge_index[1]
    a = jnp.zeros((num_nodes, num_nodes), jnp.float32)
    a = a.at[dst, src].add(1.0)
    a = a + jnp.eye(num_nodes, dtype=jnp.float32)
    deg = jnp.sum(a, axis=1)
    dinv = jnp.where(deg > 0, jax.lax.rsqrt(deg), 0.0)
    return dinv[:, None] * a * dinv[None, :]


def vgraph_encoder_reference(x, edge_index, params):
    """Pure-JAX f32 reference (matches the PyTorch module)."""
    a = _reference_normalized_adjacency(edge_index, x.shape[0])
    (w1, b1), (w2, b2), (w3, b3), (wmu, bmu), (wlv, blv) = params
    h = jnp.maximum(a @ (x @ w1) + b1, 0.0)
    h = jnp.maximum(a @ (h @ w2) + b2, 0.0)
    h = jnp.maximum(a @ (h @ w3) + b3, 0.0)
    return a @ (h @ wmu) + bmu, a @ (h @ wlv) + blv


def _check_close(got, want, name):
    err = float(jnp.max(jnp.abs(got - want)))
    scale = float(jnp.max(jnp.abs(want))) + 1e-6
    assert err <= 0.05 * scale + 0.05, f"{name}: max abs err {err:.4f} (scale {scale:.4f})"


# ----------------------------- main -------------------------------------------

if __name__ == "__main__":
    key = jax.random.PRNGKey(0)
    k_x1, k_x2, k_p = jax.random.split(key, 3)

    input_channels = 4
    output_channels = 2
    params = init_params(k_p, input_channels, hidden1=64, hidden2=8,
                         output_channels=output_channels)

    fwd = jax.jit(vgraph_encoder_forward,
                  static_argnames=("force_tiled", "row_tile", "k_tile"))

    # --- test 1: small ring graph -> fused single-kernel path (A VMEM-resident) ---
    n1 = 16
    x1 = jax.random.normal(k_x1, (n1, input_channels), jnp.float32)
    idx = jnp.arange(n1)
    src = jnp.concatenate([idx, (idx + 1) % n1])
    dst = jnp.concatenate([(idx + 1) % n1, idx])
    edge_index1 = jnp.stack([src, dst], axis=0).astype(jnp.int32)

    mu1, lv1 = fwd(x1, edge_index1, params)
    jax.block_until_ready((mu1, lv1))
    assert mu1.shape == (n1, output_channels) and lv1.shape == (n1, output_channels)
    rmu1, rlv1 = vgraph_encoder_reference(x1, edge_index1, params)
    _check_close(mu1, rmu1, "mu (fused path)")
    _check_close(lv1, rlv1, "logvar (fused path)")

    # --- test 2: larger graph, forced streaming path (grid 4x4, K accumulation) ---
    n2 = 200
    x2 = jax.random.normal(k_x2, (n2, input_channels), jnp.float32)
    idx2 = jnp.arange(n2)
    src2 = jnp.concatenate([idx2, (idx2 + 1) % n2, idx2, (idx2 + 3) % n2])
    dst2 = jnp.concatenate([(idx2 + 1) % n2, idx2, (idx2 + 3) % n2, idx2])
    edge_index2 = jnp.stack([src2, dst2], axis=0).astype(jnp.int32)

    mu2, lv2 = fwd(x2, edge_index2, params, force_tiled=True, row_tile=128, k_tile=128)
    jax.block_until_ready((mu2, lv2))
    assert mu2.shape == (n2, output_channels) and lv2.shape == (n2, output_channels)
    rmu2, rlv2 = vgraph_encoder_reference(x2, edge_index2, params)
    _check_close(mu2, rmu2, "mu (tiled path)")
    _check_close(lv2, rlv2, "logvar (tiled path)")

    print("KERNEL_OK")
</pallas_src>

<mosaic_0001>
module attributes {stable_mosaic.version = 11 : i64} {
  func.func @_fused_vgae_kernel(%arg0: memref<256x256xi8, #tpu.memory_space<vmem>>, %arg1: memref<256x1xf32, #tpu.memory_space<vmem>>, %arg2: memref<256x4xf32, #tpu.memory_space<vmem>>, %arg3: memref<4x64xbf16, #tpu.memory_space<vmem>>, %arg4: memref<1x64xf32, #tpu.memory_space<vmem>>, %arg5: memref<64x8xbf16, #tpu.memory_space<vmem>>, %arg6: memref<1x8xf32, #tpu.memory_space<vmem>>, %arg7: memref<8x4xbf16, #tpu.memory_space<vmem>>, %arg8: memref<1x4xf32, #tpu.memory_space<vmem>>, %arg9: memref<4x4xbf16, #tpu.memory_space<vmem>>, %arg10: memref<1x4xf32, #tpu.memory_space<vmem>>, %arg11: memref<256x4xf32, #tpu.memory_space<vmem>>, %arg12: memref<256x256xbf16, #tpu.memory_space<vmem>>) attributes {dimension_semantics = [], scalar_prefetch = 0 : i64, scratch_operands = 1 : i64, tpu.core_type = #tpu.core_type<tc>} {
    %c0 = arith.constant 0 : index
    %c0_0 = arith.constant 0 : index
    %0 = vector.load %arg0[%c0, %c0_0] : memref<256x256xi8, #tpu.memory_space<vmem>>, vector<256x256xi8>
    %1 = arith.sitofp %0 : vector<256x256xi8> to vector<256x256xf32>
    %2 = arith.truncf %1 : vector<256x256xf32> to vector<256x256xbf16>
    %c0_1 = arith.constant 0 : index
    %c0_2 = arith.constant 0 : index
    %3 = vector.load %arg12[%c0_1, %c0_2] : memref<256x256xbf16, #tpu.memory_space<vmem>>, vector<256x256xbf16>
    tpu.vector_store %arg12[%c0_1, %c0_2], %2 {strides = array<i32>} : memref<256x256xbf16, #tpu.memory_space<vmem>>, vector<256x256xbf16>,
    %c0_3 = arith.constant 0 : index
    %c0_4 = arith.constant 0 : index
    %4 = vector.load %arg1[%c0_3, %c0_4] : memref<256x1xf32, #tpu.memory_space<vmem>>, vector<256x1xf32>
    %c0_5 = arith.constant 0 : index
    %c0_6 = arith.constant 0 : index
    %5 = vector.load %arg2[%c0_5, %c0_6] : memref<256x4xf32, #tpu.memory_space<vmem>>, vector<256x4xf32>
    %6 = arith.truncf %5 : vector<256x4xf32> to vector<256x4xbf16>
    %7 = arith.extf %6 : vector<256x4xbf16> to vector<256x4xf32>
    %8 = vector.broadcast %4 : vector<256x1xf32> to vector<256x4xf32>
    %9 = arith.mulf %8, %7 : vector<256x4xf32>
    %10 = arith.truncf %9 : vector<256x4xf32> to vector<256x4xbf16>
    %c0_7 = arith.constant 0 : index
    %c0_8 = arith.constant 0 : index
    %11 = vector.load %arg12[%c0_7, %c0_8] : memref<256x256xbf16, #tpu.memory_space<vmem>>, vector<256x256xbf16>
    %cst = arith.constant dense<0.000000e+00> : vector<256x4xf32>
    %12 = tpu.matmul %11, %10, %cst {dimension_numbers = #tpu.dot_dimension_numbers<[1], [0], [0], [1], [0, 0, 1, 1], [], []>} : vector<256x256xbf16>, vector<256x4xbf16>, vector<256x4xf32> -> vector<256x4xf32>
    %13 = vector.broadcast %4 : vector<256x1xf32> to vector<256x4xf32>
    %14 = arith.mulf %13, %12 : vector<256x4xf32>
    %15 = arith.truncf %14 : vector<256x4xf32> to vector<256x4xbf16>
    %c0_9 = arith.constant 0 : index
    %c0_10 = arith.constant 0 : index
    %16 = vector.load %arg3[%c0_9, %c0_10] : memref<4x64xbf16, #tpu.memory_space<vmem>>, vector<4x64xbf16>
    %cst_11 = arith.constant dense<0.000000e+00> : vector<256x64xf32>
    %17 = tpu.matmul %15, %16, %cst_11 {dimension_numbers = #tpu.dot_dimension_numbers<[1], [0], [0], [1], [0, 0, 1, 1], [], []>} : vector<256x4xbf16>, vector<4x64xbf16>, vector<256x64xf32> -> vector<256x64xf32>
    %c0_12 = arith.constant 0 : index
    %c0_13 = arith.constant 0 : index
    %18 = vector.load %arg4[%c0_12, %c0_13] : memref<1x64xf32, #tpu.memory_space<vmem>>, vector<1x64xf32>
    %19 = vector.broadcast %18 : vector<1x64xf32> to vector<256x64xf32>
    %20 = arith.addf %17, %19 : vector<256x64xf32>
    %cst_14 = arith.constant 0.000000e+00 : f32
    %21 = vector.broadcast %cst_14 : f32 to vector<256x64xf32>
    %22 = arith.maximumf %20, %21 : vector<256x64xf32>
    %23 = arith.truncf %22 : vector<256x64xf32> to vector<256x64xbf16>
    %c0_15 = arith.constant 0 : index
    %c0_16 = arith.constant 0 : index
    %24 = vector.load %arg5[%c0_15, %c0_16] : memref<64x8xbf16, #tpu.memory_space<vmem>>, vector<64x8xbf16>
    %cst_17 = arith.constant dense<0.000000e+00> : vector<256x8xf32>
    %25 = tpu.matmul %23, %24, %cst_17 {dimension_numbers = #tpu.dot_dimension_numbers<[1], [0], [0], [1], [0, 0, 1, 1], [], []>} : vector<256x64xbf16>, vector<64x8xbf16>, vector<256x8xf32> -> vector<256x8xf32>
    %26 = vector.broadcast %4 : vector<256x1xf32> to vector<256x8xf32>
    %27 = arith.mulf %26, %25 : vector<256x8xf32>
    %28 = arith.truncf %27 : vector<256x8xf32> to vector<256x8xbf16>
    %c0_18 = arith.constant 0 : index
    %c0_19 = arith.constant 0 : index
    %29 = vector.load %arg12[%c0_18, %c0_19] : memref<256x256xbf16, #tpu.memory_space<vmem>>, vector<256x256xbf16>
    %cst_20 = arith.constant dense<0.000000e+00> : vector<256x8xf32>
    %30 = tpu.matmul %29, %28, %cst_20 {dimension_numbers = #tpu.dot_dimension_numbers<[1], [0], [0], [1], [0, 0, 1, 1], [], []>} : vector<256x256xbf16>, vector<256x8xbf16>, vector<256x8xf32> -> vector<256x8xf32>
    %31 = vector.broadcast %4 : vector<256x1xf32> to vector<256x8xf32>
    %32 = arith.mulf %31, %30 : vector<256x8xf32>
    %c0_21 = arith.constant 0 : index
    %c0_22 = arith.constant 0 : index
    %33 = vector.load %arg6[%c0_21, %c0_22] : memref<1x8xf32, #tpu.memory_space<vmem>>, vector<1x8xf32>
    %34 = vector.broadcast %33 : vector<1x8xf32> to vector<256x8xf32>
    %35 = arith.addf %32, %34 : vector<256x8xf32>
    %cst_23 = arith.constant 0.000000e+00 : f32
    %36 = vector.broadcast %cst_23 : f32 to vector<256x8xf32>
    %37 = arith.maximumf %35, %36 : vector<256x8xf32>
    %38 = arith.truncf %37 : vector<256x8xf32> to vector<256x8xbf16>
    %c0_24 = arith.constant 0 : index
    %c0_25 = arith.constant 0 : index
    %39 = vector.load %arg7[%c0_24, %c0_25] : memref<8x4xbf16, #tpu.memory_space<vmem>>, vector<8x4xbf16>
    %cst_26 = arith.constant dense<0.000000e+00> : vector<256x4xf32>
    %40 = tpu.matmul %38, %39, %cst_26 {dimension_numbers = #tpu.dot_dimension_numbers<[1], [0], [0], [1], [0, 0, 1, 1], [], []>} : vector<256x8xbf16>, vector<8x4xbf16>, vector<256x4xf32> -> vector<256x4xf32>
    %41 = vector.broadcast %4 : vector<256x1xf32> to vector<256x4xf32>
    %42 = arith.mulf %41, %40 : vector<256x4xf32>
    %43 = arith.truncf %42 : vector<256x4xf32> to vector<256x4xbf16>
    %c0_27 = arith.constant 0 : index
    %c0_28 = arith.constant 0 : index
    %44 = vector.load %arg12[%c0_27, %c0_28] : memref<256x256xbf16, #tpu.memory_space<vmem>>, vector<256x256xbf16>
    %cst_29 = arith.constant dense<0.000000e+00> : vector<256x4xf32>
    %45 = tpu.matmul %44, %43, %cst_29 {dimension_numbers = #tpu.dot_dimension_numbers<[1], [0], [0], [1], [0, 0, 1, 1], [], []>} : vector<256x256xbf16>, vector<256x4xbf16>, vector<256x4xf32> -> vector<256x4xf32>
    %46 = vector.broadcast %4 : vector<256x1xf32> to vector<256x4xf32>
    %47 = arith.mulf %46, %45 : vector<256x4xf32>
    %c0_30 = arith.constant 0 : index
    %c0_31 = arith.constant 0 : index
    %48 = vector.load %arg8[%c0_30, %c0_31] : memref<1x4xf32, #tpu.memory_space<vmem>>, vector<1x4xf32>
    %49 = vector.broadcast %48 : vector<1x4xf32> to vector<256x4xf32>
    %50 = arith.addf %47, %49 : vector<256x4xf32>
    %cst_32 = arith.constant 0.000000e+00 : f32
    %51 = vector.broadcast %cst_32 : f32 to vector<256x4xf32>
    %52 = arith.maximumf %50, %51 : vector<256x4xf32>
    %53 = arith.truncf %52 : vector<256x4xf32> to vector<256x4xbf16>
    %54 = arith.extf %53 : vector<256x4xbf16> to vector<256x4xf32>
    %55 = vector.broadcast %4 : vector<256x1xf32> to vector<256x4xf32>
    %56 = arith.mulf %55, %54 : vector<256x4xf32>
    %57 = arith.truncf %56 : vector<256x4xf32> to vector<256x4xbf16>
    %c0_33 = arith.constant 0 : index
    %c0_34 = arith.constant 0 : index
    %58 = vector.load %arg12[%c0_33, %c0_34] : memref<256x256xbf16, #tpu.memory_space<vmem>>, vector<256x256xbf16>
    %cst_35 = arith.constant dense<0.000000e+00> : vector<256x4xf32>
    %59 = tpu.matmul %58, %57, %cst_35 {dimension_numbers = #tpu.dot_dimension_numbers<[1], [0], [0], [1], [0, 0, 1, 1], [], []>} : vector<256x256xbf16>, vector<256x4xbf16>, vector<256x4xf32> -> vector<256x4xf32>
    %60 = vector.broadcast %4 : vector<256x1xf32> to vector<256x4xf32>
    %61 = arith.mulf %60, %59 : vector<256x4xf32>
    %62 = arith.truncf %61 : vector<256x4xf32> to vector<256x4xbf16>
    %c0_36 = arith.constant 0 : index
    %c0_37 = arith.constant 0 : index
    %63 = vector.load %arg9[%c0_36, %c0_37] : memref<4x4xbf16, #tpu.memory_space<vmem>>, vector<4x4xbf16>
    %cst_38 = arith.constant dense<0.000000e+00> : vector<256x4xf32>
    %64 = tpu.matmul %62, %63, %cst_38 {dimension_numbers = #tpu.dot_dimension_numbers<[1], [0], [0], [1], [0, 0, 1, 1], [], []>} : vector<256x4xbf16>, vector<4x4xbf16>, vector<256x4xf32> -> vector<256x4xf32>
    %c0_39 = arith.constant 0 : index
    %c0_40 = arith.constant 0 : index
    %65 = vector.load %arg10[%c0_39, %c0_40] : memref<1x4xf32, #tpu.memory_space<vmem>>, vector<1x4xf32>
    %66 = vector.broadcast %65 : vector<1x4xf32> to vector<256x4xf32>
    %67 = arith.addf %64, %66 : vector<256x4xf32>
    %c0_41 = arith.constant 0 : index
    %c0_42 = arith.constant 0 : index
    %68 = vector.load %arg11[%c0_41, %c0_42] : memref<256x4xf32, #tpu.memory_space<vmem>>, vector<256x4xf32>
    tpu.vector_store %arg11[%c0_41, %c0_42], %67 {strides = array<i32>} : memref<256x4xf32, #tpu.memory_space<vmem>>, vector<256x4xf32>,
    return
  }
}

</mosaic_0001>

<bundles_post_ra>
// kernel: vgraph_encoder_forward.1
= control target key start
LH: loop header
LB: loop body
LE: loop exit
PB: predicated region body
PF: predicated region fallthrough
CT: control target
= control target key end

     0   :  { %v3075_v0 = vmov 0   ;;  %vm1071_vm0 = vcmask 1041408   ;;  %vm1022_vm1 = vcmask 31744   ;;  %vm1244_vm2 = vcmask 523264   ;;  %s4398_s1 = inlined_call_operand.vmem [shape: f32[256,1], index: 1, kind: input, shape index: {}]   ;;  %s4399_s2 = inlined_call_operand.vmem [shape: f32[256,4], index: 2, kind: input, shape index: {}]   ;;  %s4400_s0 = inlined_call_operand.vmem [shape: s8[256,256], index: 0, kind: input, shape index: {}]   ;;  %s4401_s3 = inlined_call_operand.vmem [shape: bf16[4,64], index: 3, kind: input, shape index: {}]   ;;  %s4402_s4 = inlined_call_operand.vmem [shape: f32[1,64], index: 4, kind: input, shape index: {}]   ;;  %s4403_s5 = inlined_call_operand.vmem [shape: bf16[64,8], index: 5, kind: input, shape index: {}]   ;;  %s4404_s6 = inlined_call_operand.vmem [shape: f32[1,8], index: 6, kind: input, shape index: {}]   ;;  %s4405_s7 = inlined_call_operand.vmem [shape: bf16[8,4], index: 7, kind: input, shape index: {}]   ;;  %s4406_s9 = inlined_call_operand.vmem [shape: bf16[4,4], index: 9, kind: input, shape index: {}]   ;;  %s4407_s8 = inlined_call_operand.vmem [shape: f32[1,4], index: 8, kind: input, shape index: {}]   ;;  %s4408_s10 = inlined_call_operand.vmem [shape: f32[1,4], index: 10, kind: input, shape index: {}]   ;;  %s4409_s11 = inlined_call_operand.vmem [shape: f32[256,4], index: 11, kind: output, shape index: {}]  }
   0x1   :  { %3070 = vset.pattern.permute.xlu2 %v3075_v0  ;;  %3069 = vset.pattern.permute.xlu1 %v3075_v0  ;;  %v293_v1 = vld [vmem:[%s4398_s1 + $0xf0] sm:$0xff]  ;;  %v275_v3 = vld [vmem:[%s4398_s1 + $0x60] sm:$0xff]  ;;  %v294_v4 = vld [vmem:[%s4398_s1 + $0xf8] sm:$0xff]  ;;  %vm1774_vm3 = vcmask 1043456   ;;  %vm1725_vm4 = vcmask 64512  }
   0x2   :  { %v277_v2 = vld [vmem:[%s4398_s1 + $0x70] sm:$0xff]  ;;  %3068 = vset.pattern.permute.xlu0 %v3075_v0  ;;  %543 = vperm.xlu1 %3069, %v293_v1   ;;  %v278_v5 = vld [vmem:[%s4398_s1 + $0x78] sm:$0xff]  ;;  %v276_v6 = vld [vmem:[%s4398_s1 + $0x68] sm:$0xff] }
   0x3   :  { %463 = vperm.xlu0 %3068, %v277_v2   ;;  %453 = vperm.xlu2 %3070, %v275_v3   ;;  %v292_v7 = vld [vmem:[%s4398_s1 + $0xe8] sm:$0xff]  ;;  %v291_v8 = vld [vmem:[%s4398_s1 + $0xe0] sm:$0xff]  ;;  %v273_v9 = vld [vmem:[%s4398_s1 + $0x50] sm:$0xff] }
   0x4   :  { %v289_v10 = vld [vmem:[%s4398_s1 + $0xd0] sm:$0xff]  ;;  %v274_v11 = vld [vmem:[%s4398_s1 + $0x58] sm:$0xff]  ;;  %v272_v13 = vld [vmem:[%s4398_s1 + $0x48] sm:$0xff] }
   0x5   :  { %v290_v12 = vld [vmem:[%s4398_s1 + $0xd8] sm:$0xff]  ;;  %v287_v14 = vld [vmem:[%s4398_s1 + $0xc0] sm:$0xff]  ;;  %v269_v16 = vld [vmem:[%s4398_s1 + $0x30] sm:$0xff] }
   0x6   :  { %v271_v15 = vld [vmem:[%s4398_s1 + $0x40] sm:$0xff]  ;;  %v288_v17 = vld [vmem:[%s4398_s1 + $0xc8] sm:$0xff]  ;;  %v270_v18 = vld [vmem:[%s4398_s1 + $0x38] sm:$0xff] }
   0x7   :  { %v286_v19 = vld [vmem:[%s4398_s1 + $0xb8] sm:$0xff]  ;;  %v285_v20 = vld [vmem:[%s4398_s1 + $0xb0] sm:$0xff]  ;;  %v267_v21 = vld [vmem:[%s4398_s1 + $0x20] sm:$0xff] }
   0x8   :  { %v283_v22 = vld [vmem:[%s4398_s1 + $0xa0] sm:$0xff]  ;;  %v268_v23 = vld [vmem:[%s4398_s1 + $0x28] sm:$0xff]  ;;  %v266_v25 = vld [vmem:[%s4398_s1 + $0x18] sm:$0xff] }
   0x9   :  { %v284_v24 = vld [vmem:[%s4398_s1 + $0xa8] sm:$0xff]  ;;  %v281_v26 = vld [vmem:[%s4398_s1 + $0x90] sm:$0xff]  ;;  %v263_v28 = vld [vmem:[%s4398_s1] sm:$0xff] }
   0xa   :  { %548 = vperm.xlu1 %3069, %v294_v4   ;;  %v265_v27 = vld [vmem:[%s4398_s1 + $0x10] sm:$0xff]  ;;  %v282_v29 = vld [vmem:[%s4398_s1 + $0x98] sm:$0xff]  ;;  %v264_v30 = vld [vmem:[%s4398_s1 + $0x8] sm:$0xff] }
   0xb   :  { %468 = vperm.xlu0 %3068, %v278_v5   ;;  %458 = vperm.xlu2 %3070, %v276_v6   ;;  %v280_v31 = vld [vmem:[%s4398_s1 + $0x88] sm:$0xff]  ;;  %v279_v32 = vld [vmem:[%s4398_s1 + $0x80] sm:$0xff]  ;;  %v325_v35 = vld [vmem:[%s4399_s2 + $0xf0] sm:$0xff] }
   0xc   :  { %v326_v36 = vld [vmem:[%s4399_s2 + $0xf8] sm:$0xff]  ;;  %v309_v37 = vld [vmem:[%s4399_s2 + $0x70] sm:$0xff]  ;;  %v357_v42 = vpack.c.bf16 %v325_v35, %v325_v35  ;;  %v307_v44 = vld [vmem:[%s4399_s2 + $0x60] sm:$0xff] }
   0xd   :  { %v310_v38 = vld [vmem:[%s4399_s2 + $0x78] sm:$0xff]  ;;  %v358_v43 = vpack.c.bf16 %v326_v36, %v326_v36  ;;  %v308_v45 = vld [vmem:[%s4399_s2 + $0x68] sm:$0xff]  ;;  %v341_v46 = vpack.c.bf16 %v309_v37, %v309_v37  ;;  %v339_v48 = vpack.c.bf16 %v307_v44, %v307_v44  ;;  %v323_v55 = vld [vmem:[%s4399_s2 + $0xe0] sm:$0xff] }
   0xe   :  { %v342_v47 = vpack.c.bf16 %v310_v38, %v310_v38  ;;  %v340_v49 = vpack.c.bf16 %v308_v45, %v308_v45  ;;  %v389_v50 = vunpack.c.l.bf16 %v357_v42  ;;  %v324_v54 = vld [vmem:[%s4399_s2 + $0xe8] sm:$0xff]  ;;  %v355_v2 = vpack.c.bf16 %v323_v55, %v323_v55  ;;  %v2957_v55 = vld [vmem:[%s4400_s0] sm:$0xff]  }
   0xf   :  { %v390_v51 = vunpack.c.l.bf16 %v358_v43  ;;  %v373_v52 = vunpack.c.l.bf16 %v341_v46  ;;  %v371_v57 = vunpack.c.l.bf16 %v339_v48  ;;  %v356_v62 = vpack.c.bf16 %v324_v54, %v324_v54  ;;  %v301_v46 = vld [vmem:[%s4399_s2 + $0x30] sm:$0xff] }
  0x10   :  { %v374_v53 = vunpack.c.l.bf16 %v342_v47  ;;  %v372_v58 = vunpack.c.l.bf16 %v340_v49  ;;  %v302_v47 = vld [vmem:[%s4399_s2 + $0x38] sm:$0xff] }
  0x11   :  { %v334_v54 = vpack.c.bf16 %v302_v47, %v302_v47  ;;  %v3052_v47 = vld [vmem:[%s4400_s0 + $0x8] sm:$0xff]  }
  0x12   :  { %538 = vperm.xlu1 %3069, %v292_v7   ;;  %v388_v7 = vunpack.c.l.bf16 %v356_v62  ;;  %v2960_v62 = vunpack.c.2.s8 %v2957_v55 }
  0x13   :  { %533 = vperm.xlu0 %3068, %v291_v8   ;;  %443 = vperm.xlu2 %3070, %v273_v9   ;;  %v387_v8 = vunpack.c.l.bf16 %v355_v2  ;;  %v321_v9 = vld [vmem:[%s4399_s2 + $0xd0] sm:$0xff] }
  0x1a   :  { %523 = vperm.xlu1 %3069, %v289_v10   ;;  %v322_v10 = vld [vmem:[%s4399_s2 + $0xd8] sm:$0xff] }
  0x1b   :  { %448 = vperm.xlu0 %3068, %v274_v11   ;;  %528 = vperm.xlu2 %3070, %v290_v12   ;;  %v305_v11 = vld [vmem:[%s4399_s2 + $0x50] sm:$0xff]  ;;  %v306_v12 = vld [vmem:[%s4399_s2 + $0x58] sm:$0xff] }
  0x22   :  { %438 = vperm.xlu1 %3069, %v272_v13  }
  0x23   :  { %513 = vperm.xlu2 %3070, %v287_v14   ;;  %433 = vperm.xlu0 %3068, %v271_v15  }
  0x2a   :  { %423 = vperm.xlu1 %3069, %v269_v16  }
  0x2b   :  { %518 = vperm.xlu0 %3068, %v288_v17   ;;  %428 = vperm.xlu2 %3070, %v270_v18   ;;  %v353_v17 = vpack.c.bf16 %v321_v9, %v321_v9  ;;  %v354_v18 = vpack.c.bf16 %v322_v10, %v322_v10  ;;  %v366_v10 = vunpack.c.l.bf16 %v334_v54  ;;  %v2966_v54 = vunpack.c.2.s8 %v3052_v47 }
  0x32   :  { %508 = vperm.xlu1 %3069, %v286_v19  }
  0x33   :  { %503 = vperm.xlu0 %3068, %v285_v20   ;;  %413 = vperm.xlu2 %3070, %v267_v21   ;;  %v337_v20 = vpack.c.bf16 %v305_v11, %v305_v11  ;;  %v338_v21 = vpack.c.bf16 %v306_v12, %v306_v12 }
  0x3a   :  { %493 = vperm.xlu1 %3069, %v283_v22  }
  0x3b   :  { %418 = vperm.xlu0 %3068, %v268_v23   ;;  %498 = vperm.xlu2 %3070, %v284_v24   ;;  %v385_v24 = vunpack.c.l.bf16 %v353_v17 }
  0x42   :  { %408 = vperm.xlu1 %3069, %v266_v25   ;;  %v386_v25 = vunpack.c.l.bf16 %v354_v18  ;;  %v317_v18 = vld [vmem:[%s4399_s2 + $0xb0] sm:$0xff] }
  0x43   :  { %483 = vperm.xlu2 %3070, %v281_v26   ;;  %403 = vperm.xlu0 %3068, %v265_v27   ;;  %v369_v26 = vunpack.c.l.bf16 %v337_v20  ;;  %v370_v27 = vunpack.c.l.bf16 %v338_v21 }
  0x4a   :  { %393 = vperm.xlu1 %3069, %v263_v28   ;;  %v304_v28 = vld [vmem:[%s4399_s2 + $0x48] sm:$0xff] }
  0x4b   :  { %488 = vperm.xlu0 %3068, %v282_v29   ;;  %398 = vperm.xlu2 %3070, %v264_v30   ;;  %v303_v29 = vld [vmem:[%s4399_s2 + $0x40] sm:$0xff]  ;;  %v336_v36 = vpack.c.bf16 %v304_v28, %v304_v28  ;;  %v349_v28 = vpack.c.bf16 %v317_v18, %v317_v18 }
  0x4c   :  { %v335_v42 = vpack.c.bf16 %v303_v29, %v303_v29 }
  0x4d   :  { %v368_v45 = vunpack.c.l.bf16 %v336_v36  ;;  %v315_v36 = vld [vmem:[%s4399_s2 + $0xa0] sm:$0xff] }
  0x4e   :  { %v367_v49 = vunpack.c.l.bf16 %v335_v42  ;;  %v299_v42 = vld [vmem:[%s4399_s2 + $0x20] sm:$0xff] }
  0x52   :  { %478 = vperm.xlu1 %3069, %v280_v31  }
  0x53   :  { %473 = vperm.xlu0 %3068, %v279_v32  }
  0x5d   :  { %v3232_v33 = vpop.permute.xlu2 %453 }
  0x5e   :  { %v563_v5 = vmul.f32 %v3232_v33, %v371_v57 }
  0x65   :  { %v3234_v34 = vpop.permute.xlu2 %458 }
  0x66   :  { %v564_v6 = vmul.f32 %v3234_v34, %v372_v58 }
  0x68   :  { %v589_v14 = vpack.c.bf16 %v564_v6, %v563_v5  ;;  %v137_v6 = vcvt.s32.f32 %v2960_v62  ;;  %v2967_v62 = vunpack.c.3.s8 %v3052_v47 }
  0x6d   :  { %v3248_v39 = vpop.permute.xlu2 %443 }
  0x6e   :  { %v561_v37 = vmul.f32 %v3248_v39, %v369_v26 }
  0x74   :  { %v3250_v40 = vpop.permute.xlu1 %543 }
  0x75   :  { %v3252_v41 = vpop.permute.xlu0 %463  ;;  %v581_v60 = vmul.f32 %v3250_v40, %v389_v50  ;;  %v3272_v63 = vpop.permute.xlu2 %528  ;;  %v319_v50 = vld [vmem:[%s4399_s2 + $0xc0] sm:$0xff] }
  0x76   :  { %v565_v0 = vmul.f32 %v3252_v41, %v373_v52  ;;  %v578_v35 = vmul.f32 %v3272_v63, %v386_v25 }
  0x7c   :  { %v3266_v56 = vpop.permute.xlu1 %548 }
  0x7d   :  { %4500 = vst [vmem:[#allocation3_spill] sm:$0xff] %v3266_v56  ;;  %v3268_v59 = vpop.permute.xlu0 %468  ;;  %v582_v61 = vmul.f32 %v3266_v56, %v390_v51  ;;  %v3296_v22 = vpop.permute.xlu2 %513  ;;  %v320_v51 = vld [vmem:[%s4399_s2 + $0xc8] sm:$0xff] }
  0x7e   :  { %v566_v1 = vmul.f32 %v3268_v59, %v374_v53  ;;  %4501 = vst [vmem:[#allocation4_spill] sm:$0xff] %v3296_v22  ;;  %v333_v53 = vpack.c.bf16 %v301_v46, %v301_v46  ;;  %v352_v2 = vpack.c.bf16 %v320_v51, %v320_v51  ;;  %v2964_v51 = vunpack.c.0.s8 %v3052_v47 }
  0x7f   :  { %v598_v3 = vpack.c.bf16 %v582_v61, %v581_v60  ;;  %v2958_v60 = vunpack.c.0.s8 %v2957_v55  ;;  %v2959_v61 = vunpack.c.1.s8 %v2957_v55 }
  0x80   :  { %v590_v4 = vpack.c.bf16 %v566_v1, %v565_v0  ;;  %v351_v1 = vpack.c.bf16 %v319_v50, %v319_v50  ;;  %v365_v9 = vunpack.c.l.bf16 %v333_v53  ;;  %v2965_v53 = vunpack.c.1.s8 %v3052_v47  ;;  %v3053_v47 = vld [vmem:[%s4400_s0 + $0x10] sm:$0xff]  }
  0x81   :  { %880 = vmatpush.bf16.msra.mxu1 %v598_v3  ;;  %v2961_v3 = vunpack.c.3.s8 %v2957_v55  ;;  %v136_v5 = vcvt.s32.f32 %v2959_v61 }
  0x82   :  { %791 = vmatpush.bf16.msra.mxu0 %v590_v4  ;;  %v135_v4 = vcvt.s32.f32 %v2958_v60  ;;  %v383_v12 = vunpack.c.l.bf16 %v351_v1  ;;  %v331_v60 = vpack.c.bf16 %v299_v42, %v299_v42  ;;  %v140_v1 = vcvt.s32.f32 %v2965_v53  ;;  %v314_v42 = vld [vmem:[%s4399_s2 + $0x98] sm:$0xff] }
  0x84   :  { %v3290_v13 = vpop.permute.xlu1 %538  ;;  %v199_v11 = vpack.c.bf16 %v136_v5, %v135_v4  ;;  %v575_v26 = vmul.f32 %v3296_v22, %v383_v12  ;;  %v142_v4 = vcvt.s32.f32 %v2967_v62  ;;  %v297_v12 = vld [vmem:[%s4399_s2 + $0x10] sm:$0xff]  ;;  %v2972_v62 = vunpack.c.2.s8 %v3053_v47 }
  0x85   :  { %v3292_v15 = vpop.permute.xlu0 %533  ;;  %v580_v16 = vmul.f32 %v3290_v13, %v388_v7  ;;  %v3318_v48 = vpop.permute.xlu2 %428 }
  0x86   :  { %792 = vmatpush.bf16.msra.mxu0 %v589_v14  ;;  %v579_v19 = vmul.f32 %v3292_v15, %v387_v8  ;;  %4503 = vst [vmem:[#allocation6_spill] sm:$0xff] %v3318_v48  ;;  %v138_v8 = vcvt.s32.f32 %v2961_v3  ;;  %v384_v14 = vunpack.c.l.bf16 %v352_v2  ;;  %v141_v2 = vcvt.s32.f32 %v2966_v54 }
  0x87   :  { %231 = vst [vmem:[#allocation2] sm:$0xff] %v199_v11  ;;  %v2970_v54 = vunpack.c.0.s8 %v3053_v47 }
  0x88   :  { %v597_v23 = vpack.c.bf16 %v580_v16, %v579_v19  ;;  %v318_v16 = vld [vmem:[%s4399_s2 + $0xb8] sm:$0xff]  ;;  %v200_v17 = vpack.c.bf16 %v138_v8, %v137_v6  ;;  %v363_v8 = vunpack.c.l.bf16 %v331_v60  ;;  %v202_v11 = vpack.c.bf16 %v142_v4, %v141_v2 }
  0x89   :  { %v350_v25 = vpack.c.bf16 %v318_v16, %v318_v16  ;;  %v145_v4 = vcvt.s32.f32 %v2972_v62 }
  0x8a   :  { %881 = vmatpush.bf16.msra.mxu1 %v597_v23  ;;  %232 = vst [vmem:[#allocation2 + $0x8] sm:$0xff] %v200_v17 }
  0x8b   :  { %234 = vst [vmem:[#allocation2 + $0x18] sm:$0xff] %v202_v11 }
  0x8c   :  { %v3304_v30 = vpop.permute.xlu1 %523 }
  0x8d   :  { %4502 = vst [vmem:[#allocation5_spill] sm:$0xff] %v3304_v30  ;;  %v3306_v31 = vpop.permute.xlu0 %448  ;;  %v577_v32 = vmul.f32 %v3304_v30, %v385_v24  ;;  %v3341_v19 = vpop.permute.xlu2 %413  ;;  %v558_v24 = vmul.f32 %v3318_v48, %v366_v10  ;;  %v298_v10 = vld [vmem:[%s4399_s2 + $0x18] sm:$0xff] }
  0x8e   :  { %v562_v38 = vmul.f32 %v3306_v31, %v370_v27  ;;  %4504 = vst [vmem:[#allocation7_spill] sm:$0xff] %v3341_v19 }
  0x8f   :  { %v596_v43 = vpack.c.bf16 %v578_v35, %v577_v32  ;;  %v382_v35 = vunpack.c.l.bf16 %v350_v25 }
  0x90   :  { %v588_v44 = vpack.c.bf16 %v562_v38, %v561_v37  ;;  %v316_v37 = vld [vmem:[%s4399_s2 + $0xa8] sm:$0xff]  ;;  %v381_v38 = vunpack.c.l.bf16 %v349_v28 }
  0x91   :  { %882 = vmatpush.bf16.msra.mxu1 %v596_v43  ;;  %v300_v43 = vld [vmem:[%s4399_s2 + $0x28] sm:$0xff]  ;;  %v348_v46 = vpack.c.bf16 %v316_v37, %v316_v37 }
  0x92   :  { %793 = vmatpush.bf16.msra.mxu0 %v588_v44  ;;  %v332_v61 = vpack.c.bf16 %v300_v43, %v300_v43 }
  0x93   :  { %v380_v6 = vunpack.c.l.bf16 %v348_v46 }
  0x94   :  { %v3326_v52 = vpop.permute.xlu1 %438 }
  0x95   :  { %v3331_v57 = vpop.permute.xlu0 %433  ;;  %v560_v58 = vmul.f32 %v3326_v52, %v368_v45  ;;  %v347_v45 = vpack.c.bf16 %v315_v36, %v315_v36  ;;  %v3371_v55 = vpop.permute.xlu2 %498  ;;  %v313_v36 = vld [vmem:[%s4399_s2 + $0x90] sm:$0xff] }
  0x96   :  { %v559_v0 = vmul.f32 %v3331_v57, %v367_v49  ;;  %v572_v18 = vmul.f32 %v3371_v55, %v380_v6  ;;  %v345_v46 = vpack.c.bf16 %v313_v36, %v313_v36 }
  0x97   :  { %v379_v5 = vunpack.c.l.bf16 %v347_v45 }
  0x98   :  { %v587_v7 = vpack.c.bf16 %v560_v58, %v559_v0  ;;  %v139_v0 = vcvt.s32.f32 %v2964_v51 }
  0x9a   :  { %794 = vmatpush.bf16.msra.mxu0 %v587_v7  ;;  %v201_v7 = vpack.c.bf16 %v140_v1, %v139_v0  ;;  %v2973_v0 = vunpack.c.3.s8 %v3053_v47  ;;  %v143_v1 = vcvt.s32.f32 %v2970_v54 }
  0x9c   :  { %v3343_v20 = vpop.permute.xlu1 %423  ;;  %233 = vst [vmem:[#allocation2 + $0x10] sm:$0xff] %v201_v7 }
  0x9d   :  { %4505 = vst [vmem:[#allocation8_spill] sm:$0xff] %v3343_v20  ;;  %v3345_v21 = vpop.permute.xlu0 %518  ;;  %v557_v23 = vmul.f32 %v3343_v20, %v365_v9  ;;  %v364_v9 = vunpack.c.l.bf16 %v332_v61  ;;  %v3388_v28 = vpop.permute.xlu2 %483  ;;  %v346_v61 = vpack.c.bf16 %v314_v42, %v314_v42 }
  0x9e   :  { %4506 = vst [vmem:[#allocation9_spill] sm:$0xff] %v3345_v21  ;;  %v576_v27 = vmul.f32 %v3345_v21, %v384_v14 }
  0x9f   :  { %v586_v29 = vpack.c.bf16 %v558_v24, %v557_v23  ;;  %v330_v23 = vpack.c.bf16 %v298_v10, %v298_v10  ;;  %v555_v24 = vmul.f32 %v3341_v19, %v363_v8  ;;  %v377_v10 = vunpack.c.l.bf16 %v345_v46 }
  0xa0   :  { %v595_v32 = vpack.c.bf16 %v576_v27, %v575_v26  ;;  %v329_v26 = vpack.c.bf16 %v297_v12, %v297_v12  ;;  %v378_v11 = vunpack.c.l.bf16 %v346_v61  ;;  %v312_v12 = vld [vmem:[%s4399_s2 + $0x88] sm:$0xff] }
  0xa1   :  { %795 = vmatpush.bf16.msra.mxu0 %v586_v29 }
  0xa2   :  { %883 = vmatpush.bf16.msra.mxu1 %v595_v32  ;;  %v362_v32 = vunpack.c.l.bf16 %v330_v23  ;;  %v361_v37 = vunpack.c.l.bf16 %v329_v26 }
  0xa4   :  { %v3363_v44 = vpop.permute.xlu1 %508 }
  0xa5   :  { %v3368_v49 = vpop.permute.xlu0 %503  ;;  %v574_v50 = vmul.f32 %v3363_v44, %v382_v35  ;;  %v296_v35 = vld [vmem:[%s4399_s2 + $0x8] sm:$0xff] }
  0xa6   :  { %v573_v58 = vmul.f32 %v3368_v49, %v381_v38  ;;  %v295_v38 = vld [vmem:[%s4399_s2] sm:$0xff]  ;;  %v328_v45 = vpack.c.bf16 %v296_v35, %v296_v35  ;;  %v569_v35 = vmul.f32 %v3388_v28, %v377_v10 }
  0xa7   :  { %v327_v53 = vpack.c.bf16 %v295_v38, %v295_v38 }
  0xa8   :  { %v594_v3 = vpack.c.bf16 %v574_v50, %v573_v58  ;;  %v2971_v58 = vunpack.c.1.s8 %v3053_v47  ;;  %v360_v7 = vunpack.c.l.bf16 %v328_v45 }
  0xa9   :  { %v359_v6 = vunpack.c.l.bf16 %v327_v53  ;;  %v3054_v53 = vld [vmem:[%s4400_s0 + $0x18] sm:$0xff]  }
  0xaa   :  { %884 = vmatpush.bf16.msra.mxu1 %v594_v3  ;;  %v144_v2 = vcvt.s32.f32 %v2971_v58  ;;  %v2977_v61 = vunpack.c.1.s8 %v3054_v53 }
  0xac   :  { %v3380_v14 = vpop.permute.xlu1 %493  ;;  %v203_v8 = vpack.c.bf16 %v144_v2, %v143_v1  ;;  %v2716_v1 = vld [vmem:[#allocation2 + $0x8] sm:$0xf0]  ;;  %v2978_v2 = vunpack.c.2.s8 %v3054_v53 }
  0xad   :  { %v3382_v16 = vpop.permute.xlu0 %418  ;;  %v571_v17 = vmul.f32 %v3380_v14, %v379_v5  ;;  %v146_v5 = vcvt.s32.f32 %v2973_v0  ;;  %v2920_v0 = vld [vmem:[#allocation2 + $0x4] sm:$0xf] }
  0xae   :  { %4507 = vst [vmem:[#allocation10_spill] sm:$0xff] %v3382_v16  ;;  %v556_v25 = vmul.f32 %v3382_v16, %v364_v9  ;;  %v3411_v9 = vpop.permute.xlu2 %398  ;;  %v3439_v10 = vor.u32 %v2920_v0, %v2716_v1  ;;  %v3056_v1 = vld [vmem:[%s4400_s0 + $0x28] sm:$0xff]  }
  0xaf   :  { %v593_v27 = vpack.c.bf16 %v572_v18, %v571_v17  ;;  %4510 = vst [vmem:[#allocation13_spill] sm:$0xff] %v3411_v9  ;;  %v204_v17 = vpack.c.bf16 %v146_v5, %v145_v4  ;;  %v311_v18 = vld [vmem:[%s4399_s2 + $0x80] sm:$0xff]  ;;  %v552_v26 = vmul.f32 %v3411_v9, %v360_v7  ;;  %v148_v5 = vcvt.s32.f32 %v2977_v61 }
  0xb0   :  { %v585_v29 = vpack.c.bf16 %v556_v25, %v555_v24  ;;  %235 = vst [vmem:[#allocation2 + $0x20] sm:$0xff] %v203_v8  ;;  %v149_v7 = vcvt.s32.f32 %v2978_v2  ;;  %v2988_v2 = vunpack.c.0.s8 %v3056_v1 }
  0xb1   :  { %885 = vmatpush.bf16.msra.mxu1 %v593_v27  ;;  %236 = vst [vmem:[#allocation2 + $0x28] sm:$0xff] %v204_v17  ;;  %v2714_v27 = vld [vmem:[#allocation2] sm:$0xf]  ;;  %v2722_v17 = vld [vmem:[#allocation2 + $0x10] sm:$0xf] }
  0xb2   :  { %796 = vmatpush.bf16.msra.mxu0 %v585_v29  ;;  %v2921_v29 = vld [vmem:[#allocation2 + $0x4] sm:$0xf0]  ;;  %4512 = vst [vmem:[#allocation15_spill] sm:$0xff] %v3439_v10 }
  0xb3   :  { %v3427_v45 = vor.u32 %v2921_v29, %v2714_v27 }
  0xb4   :  { %v3402_v43 = vpop.permute.xlu1 %408 }
  0xb5   :  { %4508 = vst [vmem:[#allocation11_spill] sm:$0xff] %v3402_v43  ;;  %v3407_v50 = vpop.permute.xlu0 %403  ;;  %v554_v51 = vmul.f32 %v3402_v43, %v362_v32  ;;  %v344_v32 = vpack.c.bf16 %v312_v12, %v312_v12 }
  0xb6   :  { %4509 = vst [vmem:[#allocation12_spill] sm:$0xff] %v3407_v50  ;;  %v553_v60 = vmul.f32 %v3407_v50, %v361_v37  ;;  %v343_v37 = vpack.c.bf16 %v311_v18, %v311_v18  ;;  %v2923_v18 = vld [vmem:[#allocation2 + $0x14] sm:$0xf0] }
  0xb7   :  { %v376_v46 = vunpack.c.l.bf16 %v344_v32  ;;  %v2730_v61 = vld [vmem:[#allocation2 + $0x20] sm:$0xf] }
  0xb8   :  { %v584_v3 = vpack.c.bf16 %v554_v51, %v553_v60  ;;  %v375_v47 = vunpack.c.l.bf16 %v343_v37  ;;  %v2976_v60 = vunpack.c.0.s8 %v3054_v53 }
  0xba   :  { %797 = vmatpush.bf16.msra.mxu0 %v584_v3  ;;  %v2979_v3 = vunpack.c.3.s8 %v3054_v53  ;;  %v147_v4 = vcvt.s32.f32 %v2976_v60 }
  0xbc   :  { %v3419_v23 = vpop.permute.xlu1 %393  ;;  %v150_v8 = vcvt.s32.f32 %v2979_v3  ;;  %v2989_v3 = vunpack.c.1.s8 %v3056_v1 }
  0xbd   :  { %4511 = vst [vmem:[#allocation14_spill] sm:$0xff] %v3419_v23  ;;  %v3421_v24 = vpop.permute.xlu0 %488  ;;  %v551_v25 = vmul.f32 %v3419_v23, %v359_v6 }
  0xbe   :  { %v570_v36 = vmul.f32 %v3421_v24, %v378_v11  ;;  %v205_v11 = vpack.c.bf16 %v148_v5, %v147_v4  ;;  %v206_v12 = vpack.c.bf16 %v150_v8, %v149_v7  ;;  %v2990_v4 = vunpack.c.2.s8 %v3056_v1  ;;  %v2924_v5 = vld [vmem:[#allocation2 + $0x24] sm:$0xf] }
  0xbf   :  { %v583_v38 = vpack.c.bf16 %v552_v26, %v551_v25  ;;  %v3442_v25 = vor.u32 %v2923_v18, %v2722_v17  ;;  %v3055_v26 = vld [vmem:[%s4400_s0 + $0x20] sm:$0xff]   ;;  %v2991_v7 = vunpack.c.3.s8 %v3056_v1  ;;  %v155_v8 = vcvt.s32.f32 %v2988_v2 }
  0xc0   :  { %v592_v42 = vpack.c.bf16 %v570_v36, %v569_v35  ;;  %237 = vst [vmem:[#allocation2 + $0x30] sm:$0xff] %v205_v11  ;;  %v2982_v27 = vunpack.c.0.s8 %v3055_v26  ;;  %v2983_v29 = vunpack.c.1.s8 %v3055_v26  ;;  %v2984_v32 = vunpack.c.2.s8 %v3055_v26  ;;  %v2922_v35 = vld [vmem:[#allocation2 + $0x14] sm:$0xf]  ;;  %v2724_v36 = vld [vmem:[#allocation2 + $0x18] sm:$0xf0] }
  0xc1   :  { %798 = vmatpush.bf16.msra.mxu0 %v583_v38  ;;  %238 = vst [vmem:[#allocation2 + $0x38] sm:$0xff] %v206_v12  ;;  %v2985_v37 = vunpack.c.3.s8 %v3055_v26  ;;  %v3448_v53 = vor.u32 %v2922_v35, %v2724_v36  ;;  %v156_v11 = vcvt.s32.f32 %v2989_v3  ;;  %v157_v12 = vcvt.s32.f32 %v2990_v4  ;;  %v3057_v36 = vld [vmem:[%s4400_s0 + $0x30] sm:$0xff]  }
  0xc2   :  { %886 = vmatpush.bf16.msra.mxu1 %v592_v42  ;;  %v151_v38 = vcvt.s32.f32 %v2982_v27  ;;  %v152_v42 = vcvt.s32.f32 %v2983_v29  ;;  %v158_v17 = vcvt.s32.f32 %v2991_v7 }
  0xc3   :  { %4513 = vst [vmem:[#allocation16_spill] sm:$0xff] %v3448_v53  ;;  %v209_v26 = vpack.c.bf16 %v156_v11, %v155_v8  ;;  %v3058_v8 = vld [vmem:[%s4400_s0 + $0x38] sm:$0xff]  }
  0xc4   :  { %v3429_v51 = vpop.permute.xlu1 %478  ;;  %799 = vmatmul.bf16.vlgmr.msra.gmra.mxu0 %v3427_v45  ;;  %v210_v27 = vpack.c.bf16 %v158_v17, %v157_v12  ;;  %v3000_v11 = vunpack.c.0.s8 %v3058_v8  ;;  %v3001_v12 = vunpack.c.1.s8 %v3058_v8  ;;  %v3002_v17 = vunpack.c.2.s8 %v3058_v8 }
  0xc5   :  { %v3435_v54 = vpop.permute.xlu0 %473  ;;  %v568_v58 = vmul.f32 %v3429_v51, %v376_v46  ;;  %v153_v46 = vcvt.s32.f32 %v2984_v32  ;;  %241 = vst [vmem:[#allocation2 + $0x50] sm:$0xff] %v209_v26 }
  0xc6   :  { %v567_v62 = vmul.f32 %v3435_v54, %v375_v47  ;;  %v154_v47 = vcvt.s32.f32 %v2985_v37  ;;  %242 = vst [vmem:[#allocation2 + $0x58] sm:$0xff] %v210_v27  ;;  %v2994_v37 = vunpack.c.0.s8 %v3057_v36 }
  0xc7   :  { %v2738_v29 = vld [vmem:[#allocation2 + $0x30] sm:$0xf] }
  0xc8   :  { %v591_v6 = vpack.c.bf16 %v568_v58, %v567_v62  ;;  %v207_v58 = vpack.c.bf16 %v152_v42, %v151_v38  ;;  %v208_v60 = vpack.c.bf16 %v154_v47, %v153_v46  ;;  %v2925_v62 = vld [vmem:[#allocation2 + $0x24] sm:$0xf0]  ;;  %v2927_v32 = vld [vmem:[#allocation2 + $0x34] sm:$0xf0]  ;;  %v2995_v38 = vunpack.c.1.s8 %v3057_v36  ;;  %v2926_v46 = vld [vmem:[#allocation2 + $0x34] sm:$0xf] }
  0xc9   :  { %v3451_v0 = vor.u32 %v2925_v62, %v2730_v61  ;;  %v3460_v35 = vor.u32 %v2927_v32, %v2738_v29  ;;  %v2996_v42 = vunpack.c.2.s8 %v3057_v36  ;;  %v2740_v47 = vld [vmem:[#allocation2 + $0x38] sm:$0xf0]  ;;  %v3003_v29 = vunpack.c.3.s8 %v3058_v8 }
  0xca   :  { %887 = vmatpush.bf16.msra.mxu1 %v591_v6  ;;  %239 = vst [vmem:[#allocation2 + $0x40] sm:$0xff] %v207_v58  ;;  %v2732_v6 = vld [vmem:[#allocation2 + $0x28] sm:$0xf0]  ;;  %v2997_v58 = vunpack.c.3.s8 %v3057_v36  ;;  %v160_v61 = vcvt.s32.f32 %v2995_v38  ;;  %v3466_v2 = vor.u32 %v2926_v46, %v2740_v47  ;;  %v163_v32 = vcvt.s32.f32 %v3000_v11 }
  0xcb   :  { %240 = vst [vmem:[#allocation2 + $0x48] sm:$0xff] %v208_v60  ;;  %v3457_v18 = vor.u32 %v2924_v5, %v2732_v6  ;;  %v159_v60 = vcvt.s32.f32 %v2994_v37  ;;  %v161_v62 = vcvt.s32.f32 %v2996_v42  ;;  %v164_v36 = vcvt.s32.f32 %v3001_v12 }
  0xcc   :  { %v162_v1 = vcvt.s32.f32 %v2997_v58  ;;  %4515 = vst [vmem:[#allocation18_spill] sm:$0xff] %v3466_v2  ;;  %v165_v37 = vcvt.s32.f32 %v3002_v17  ;;  %v166_v38 = vcvt.s32.f32 %v3003_v29  ;;  %v2754_v58 = vld [vmem:[#allocation2 + $0x50] sm:$0xf] }
  0xcd   :  { %888 = vmatmul.bf16.vlgmr.msra.gmra.mxu1 %v3439_v10  ;;  %4514 = vst [vmem:[#allocation17_spill] sm:$0xff] %v3457_v18  ;;  %v211_v3 = vpack.c.bf16 %v160_v61, %v159_v60  ;;  %v213_v46 = vpack.c.bf16 %v164_v36, %v163_v32  ;;  %v2931_v60 = vld [vmem:[#allocation2 + $0x54] sm:$0xf0] }
  0xce   :  { %v212_v4 = vpack.c.bf16 %v162_v1, %v161_v62  ;;  %v214_v47 = vpack.c.bf16 %v166_v38, %v165_v37  ;;  %v3478_v61 = vor.u32 %v2931_v60, %v2754_v58  ;;  %v3059_v62 = vld [vmem:[%s4400_s0 + $0x40] sm:$0xff]  }
  0xcf   :  { %243 = vst [vmem:[#allocation2 + $0x60] sm:$0xff] %v211_v3  ;;  %v3006_v1 = vunpack.c.0.s8 %v3059_v62  ;;  %v3007_v3 = vunpack.c.1.s8 %v3059_v62  ;;  %v3009_v8 = vunpack.c.3.s8 %v3059_v62 }
  0xd0   :  { %244 = vst [vmem:[#allocation2 + $0x68] sm:$0xff] %v212_v4  ;;  %v3008_v4 = vunpack.c.2.s8 %v3059_v62 }
  0xd1   :  { %v2746_v5 = vld [vmem:[#allocation2 + $0x40] sm:$0xf]  ;;  %v2928_v26 = vld [vmem:[#allocation2 + $0x44] sm:$0xf]  ;;  %245 = vst [vmem:[#allocation2 + $0x70] sm:$0xff] %v213_v46  ;;  %v167_v11 = vcvt.s32.f32 %v3006_v1  ;;  %v168_v12 = vcvt.s32.f32 %v3007_v3  ;;  %v3060_v46 = vld [vmem:[%s4400_s0 + $0x48] sm:$0xff]  }
  0xd2   :  { %v2929_v6 = vld [vmem:[#allocation2 + $0x44] sm:$0xf0]  ;;  %v2748_v27 = vld [vmem:[#allocation2 + $0x48] sm:$0xf0]  ;;  %246 = vst [vmem:[#allocation2 + $0x78] sm:$0xff] %v214_v47  ;;  %v169_v17 = vcvt.s32.f32 %v3008_v4  ;;  %v3012_v47 = vunpack.c.0.s8 %v3060_v46  ;;  %v3013_v58 = vunpack.c.1.s8 %v3060_v46  ;;  %v3014_v60 = vunpack.c.2.s8 %v3060_v46 }
  0xd3   :  { %v3469_v7 = vor.u32 %v2929_v6, %v2746_v5  ;;  %v3475_v42 = vor.u32 %v2928_v26, %v2748_v27  ;;  %v2930_v5 = vld [vmem:[#allocation2 + $0x54] sm:$0xf]  ;;  %v2756_v6 = vld [vmem:[#allocation2 + $0x58] sm:$0xf0]  ;;  %v170_v26 = vcvt.s32.f32 %v3009_v8  ;;  %v215_v29 = vpack.c.bf16 %v168_v12, %v167_v11 }
  0xd4   :  { %804 = vmatmul.bf16.gmra.mxu0 %v3442_v25  ;;  %v3484_v27 = vor.u32 %v2930_v5, %v2756_v6  ;;  %v3015_v62 = vunpack.c.3.s8 %v3060_v46  ;;  %v171_v4 = vcvt.s32.f32 %v3012_v47  ;;  %v172_v5 = vcvt.s32.f32 %v3013_v58 }
  0xd5   :  { %4516 = vst [vmem:[#allocation19_spill] sm:$0xff] %v3475_v42  ;;  %v216_v32 = vpack.c.bf16 %v170_v26, %v169_v17  ;;  %v173_v6 = vcvt.s32.f32 %v3014_v60 }
  0xd6   :  { %4517 = vst [vmem:[#allocation20_spill] sm:$0xff] %v3484_v27  ;;  %v2762_v36 = vld [vmem:[#allocation2 + $0x60] sm:$0xf]  ;;  %v2932_v1 = vld [vmem:[#allocation2 + $0x64] sm:$0xf]  ;;  %v174_v8 = vcvt.s32.f32 %v3015_v62  ;;  %v217_v12 = vpack.c.bf16 %v172_v5, %v171_v4 }
  0xd7   :  { %247 = vst [vmem:[#allocation2 + $0x80] sm:$0xff] %v215_v29  ;;  %v2933_v37 = vld [vmem:[#allocation2 + $0x64] sm:$0xf0]  ;;  %v2764_v3 = vld [vmem:[#allocation2 + $0x68] sm:$0xf0] }
  0xd8   :  { %248 = vst [vmem:[#allocation2 + $0x88] sm:$0xff] %v216_v32  ;;  %v3487_v38 = vor.u32 %v2933_v37, %v2762_v36  ;;  %v3493_v11 = vor.u32 %v2932_v1, %v2764_v3  ;;  %v218_v17 = vpack.c.bf16 %v174_v8, %v173_v6  ;;  %v2770_v26 = vld [vmem:[#allocation2 + $0x70] sm:$0xf]  ;;  %v1017_v36 = vld [vmem:[%s4401_s3] sm:$0x3] }
  0xd9   :  { %249 = vst [vmem:[#allocation2 + $0x90] sm:$0xff] %v217_v12  ;;  %v2935_v29 = vld [vmem:[#allocation2 + $0x74] sm:$0xf0]  ;;  %v3061_v37 = vld [vmem:[%s4400_s0 + $0x50] sm:$0xff]   ;;  %v1073_v46 = vsel %vm1071_vm0, %v1017_v36, 0 }
  0xda   :  { %4518 = vst [vmem:[#allocation21_spill] sm:$0xff] %v3487_v38  ;;  %v3496_v32 = vor.u32 %v2935_v29, %v2770_v26  ;;  %v3018_v47 = vunpack.c.0.s8 %v3061_v37  ;;  %v3019_v58 = vunpack.c.1.s8 %v3061_v37  ;;  %v3020_v60 = vunpack.c.2.s8 %v3061_v37  ;;  %v2934_v62 = vld [vmem:[#allocation2 + $0x74] sm:$0xf]  ;;  %v2772_v1 = vld [vmem:[#allocation2 + $0x78] sm:$0xf0]  ;;  %1082 = vmatpush.bf16.msra.mxu2 %v1073_v46 }
  0xdb   :  { %4519 = vst [vmem:[#allocation22_spill] sm:$0xff] %v3493_v11  ;;  %v3021_v3 = vunpack.c.3.s8 %v3061_v37  ;;  %v3506_v12 = vor.u32 %v2934_v62, %v2772_v1  ;;  %v3062_v37 = vld [vmem:[%s4400_s0 + $0x58] sm:$0xff]  }
  0xdc   :  { %250 = vst [vmem:[#allocation2 + $0x98] sm:$0xff] %v218_v17  ;;  %v175_v4 = vcvt.s32.f32 %v3018_v47  ;;  %v176_v5 = vcvt.s32.f32 %v3019_v58  ;;  %v177_v6 = vcvt.s32.f32 %v3020_v60  ;;  %v3024_v46 = vunpack.c.0.s8 %v3062_v37 }
  0xdd   :  { %893 = vmatmul.bf16.gmra.mxu1 %v3448_v53  ;;  %4520 = vst [vmem:[#allocation23_spill] sm:$0xff] %v3496_v32  ;;  %v178_v8 = vcvt.s32.f32 %v3021_v3  ;;  %v3025_v47 = vunpack.c.1.s8 %v3062_v37  ;;  %v3026_v58 = vunpack.c.2.s8 %v3062_v37  ;;  %v3027_v60 = vunpack.c.3.s8 %v3062_v37 }
  0xde   :  { %4521 = vst [vmem:[#allocation24_spill] sm:$0xff] %v3506_v12  ;;  %v219_v17 = vpack.c.bf16 %v176_v5, %v175_v4  ;;  %v2778_v29 = vld [vmem:[#allocation2 + $0x80] sm:$0xf]  ;;  %v2936_v62 = vld [vmem:[#allocation2 + $0x84] sm:$0xf]  ;;  %v179_v3 = vcvt.s32.f32 %v3024_v46 }
  0xdf   :  { %v220_v26 = vpack.c.bf16 %v178_v8, %v177_v6  ;;  %v2937_v36 = vld [vmem:[#allocation2 + $0x84] sm:$0xf0]  ;;  %v2780_v1 = vld [vmem:[#allocation2 + $0x88] sm:$0xf0]  ;;  %v180_v4 = vcvt.s32.f32 %v3025_v47  ;;  %v181_v5 = vcvt.s32.f32 %v3026_v58  ;;  %v182_v6 = vcvt.s32.f32 %v3027_v60  ;;  %v3063_v60 = vld [vmem:[%s4400_s0 + $0x60] sm:$0xff]  }
  0xe0   :  { %251 = vst [vmem:[#allocation2 + $0xa0] sm:$0xff] %v219_v17  ;;  %v3515_v17 = vor.u32 %v2936_v62, %v2780_v1  ;;  %v3030_v1 = vunpack.c.0.s8 %v3063_v60 }
  0xe1   :  { %252 = vst [vmem:[#allocation2 + $0xa8] sm:$0xff] %v220_v26  ;;  %v221_v26 = vpack.c.bf16 %v180_v4, %v179_v3  ;;  %v3031_v3 = vunpack.c.1.s8 %v3063_v60  ;;  %v3032_v4 = vunpack.c.2.s8 %v3063_v60 }
  0xe2   :  { %4523 = vst [vmem:[#allocation26_spill] sm:$0xff] %v3515_v17 }
  0xe3   :  { %253 = vst [vmem:[#allocation2 + $0xb0] sm:$0xff] %v221_v26  ;;  %v185_v26 = vcvt.s32.f32 %v3032_v4 }
  0xe4   :  { %809 = vmatmul.bf16.gmra.mxu0 %v3451_v0 }
  0xe8   :  { %v2941_v53 = vld [vmem:[#allocation2 + $0xa4] sm:$0xf0] }
  0xed   :  { %898 = vmatmul.bf16.gmra.mxu1 %v3457_v18 }
  0xf4   :  { %814 = vmatmul.bf16.gmra.mxu0 %v3460_v35 }
  0xfd   :  { %903 = vmatmul.bf16.gmra.mxu1 %v3466_v2 }
 0x104   :  { %819 = vmatmul.bf16.gmra.mxu0 %v3469_v7 }
 0x10d   :  { %908 = vmatmul.bf16.gmra.mxu1 %v3475_v42  ;;  %v2939_v42 = vld [vmem:[#allocation2 + $0x94] sm:$0xf0] }
 0x114   :  { %824 = vmatmul.bf16.gmra.mxu0 %v3478_v61 }
 0x11d   :  { %913 = vmatmul.bf16.gmra.mxu1 %v3484_v27 }
 0x124   :  { %829 = vmatmul.bf16.gmra.mxu0 %v3487_v38 }
 0x12d   :  { %918 = vmatmul.bf16.gmra.mxu1 %v3493_v11  ;;  %v3509_v11 = vor.u32 %v2937_v36, %v2778_v29  ;;  %v222_v29 = vpack.c.bf16 %v182_v6, %v181_v5  ;;  %v183_v6 = vcvt.s32.f32 %v3030_v1 }
 0x12f   :  { %4522 = vst [vmem:[#allocation25_spill] sm:$0xff] %v3509_v11 }
 0x130   :  { %254 = vst [vmem:[#allocation2 + $0xb8] sm:$0xff] %v222_v29 }
 0x134   :  { %834 = vmatmul.bf16.gmra.mxu0 %v3496_v32 }
 0x13d   :  { %923 = vmatmul.bf16.gmra.mxu1 %v3506_v12  ;;  %v2786_v12 = vld [vmem:[#allocation2 + $0x90] sm:$0xf] }
 0x13e   :  { %v3518_v37 = vor.u32 %v2939_v42, %v2786_v12  ;;  %v2788_v42 = vld [vmem:[#allocation2 + $0x98] sm:$0xf0]  ;;  %v3033_v12 = vunpack.c.3.s8 %v3063_v60 }
 0x140   :  { %4524 = vst [vmem:[#allocation27_spill] sm:$0xff] %v3518_v37 }
 0x141   :  { %v800_v27 = vpop.f32.mrf.mxu0 }
 0x144   :  { %839 = vmatmul.bf16.gmra.mxu0 %v3509_v11 }
 0x149   :  { %v802_v8 = vpop.f32.mrf.mxu0 }
 0x14a   :  { %v889_v36 = vpop.f32.mrf.mxu1 }
 0x14b   :  { %v890_v2 = vadd.f32 %v889_v36, %v800_v27  ;;  %v2938_v27 = vld [vmem:[#allocation2 + $0x94] sm:$0xf] }
 0x14c   :  { %v3527_v36 = vor.u32 %v2938_v27, %v2788_v42  ;;  %v3064_v27 = vld [vmem:[%s4400_s0 + $0x68] sm:$0xff]  }
 0x14d   :  { %928 = vmatmul.bf16.gmra.mxu1 %v3515_v17  ;;  %v969_v58 = vmul.f32 %v890_v2, %v3419_v23  ;;  %v186_v2 = vcvt.s32.f32 %v3033_v12  ;;  %v3036_v12 = vunpack.c.0.s8 %v3064_v27 }
 0x14e   :  { %4525 = vst [vmem:[#allocation28_spill] sm:$0xff] %v3527_v36 }
 0x151   :  { %v805_v18 = vpop.f32.mrf.mxu0 }
 0x152   :  { %v891_v46 = vpop.f32.mrf.mxu1 }
 0x153   :  { %v892_v47 = vadd.f32 %v891_v46, %v802_v8  ;;  %v184_v8 = vcvt.s32.f32 %v3031_v3 }
 0x154   :  { %844 = vmatmul.bf16.gmra.mxu0 %v3518_v37  ;;  %v2794_v37 = vld [vmem:[#allocation2 + $0xa0] sm:$0xf] }
 0x155   :  { %v970_v62 = vmul.f32 %v892_v47, %v3411_v9  ;;  %v223_v46 = vpack.c.bf16 %v184_v8, %v183_v6  ;;  %v224_v47 = vpack.c.bf16 %v186_v2, %v185_v26  ;;  %v3038_v6 = vunpack.c.2.s8 %v3064_v27  ;;  %v2940_v8 = vld [vmem:[#allocation2 + $0xa4] sm:$0xf] }
 0x157   :  { %v1001_v5 = vpack.c.bf16 %v970_v62, %v969_v58  ;;  %255 = vst [vmem:[#allocation2 + $0xc0] sm:$0xff] %v223_v46  ;;  %v3530_v58 = vor.u32 %v2941_v53, %v2794_v37  ;;  %v3039_v53 = vunpack.c.3.s8 %v3064_v27  ;;  %v187_v37 = vcvt.s32.f32 %v3036_v12 }
 0x158   :  { %256 = vst [vmem:[#allocation2 + $0xc8] sm:$0xff] %v224_v47  ;;  %v189_v2 = vcvt.s32.f32 %v3038_v6 }
 0x159   :  { %2840 = vmatmul.msk.bf16.vlgmr.msra.gmra.mxu2 %vm1022_vm1, %v1001_v5  ;;  %v807_v29 = vpop.f32.mrf.mxu0  ;;  %4526 = vst [vmem:[#allocation29_spill] sm:$0xff] %v3530_v58  ;;  %v3037_v5 = vunpack.c.1.s8 %v3064_v27 }
 0x15a   :  { %v894_v17 = vpop.f32.mrf.mxu1 }
 0x15b   :  { %v895_v60 = vadd.f32 %v894_v17, %v805_v18  ;;  %v2796_v18 = vld [vmem:[#allocation2 + $0xa8] sm:$0xf0]  ;;  %v188_v26 = vcvt.s32.f32 %v3037_v5 }
 0x15c   :  { %v3539_v47 = vor.u32 %v2940_v8, %v2796_v18  ;;  %v3065_v8 = vld [vmem:[%s4400_s0 + $0x70] sm:$0xff]  }
 0x15d   :  { %933 = vmatmul.bf16.gmra.mxu1 %v3527_v36  ;;  %v971_v4 = vmul.f32 %v895_v60, %v3407_v50  ;;  %v225_v60 = vpack.c.bf16 %v188_v26, %v187_v37  ;;  %v3042_v18 = vunpack.c.0.s8 %v3065_v8  ;;  %v2942_v37 = vld [vmem:[#allocation2 + $0xb4] sm:$0xf] }
 0x15e   :  { %4527 = vst [vmem:[#allocation30_spill] sm:$0xff] %v3539_v47 }
 0x15f   :  { %257 = vst [vmem:[#allocation2 + $0xd0] sm:$0xff] %v225_v60 }
 0x161   :  { %v810_v62 = vpop.f32.mrf.mxu0 }
 0x162   :  { %v896_v1 = vpop.f32.mrf.mxu1 }
 0x163   :  { %v897_v3 = vadd.f32 %v896_v1, %v807_v29  ;;  %v190_v29 = vcvt.s32.f32 %v3039_v53  ;;  %v3043_v53 = vunpack.c.1.s8 %v3065_v8 }
 0x164   :  { %849 = vmatmul.bf16.gmra.mxu0 %v3530_v58  ;;  %v2943_v58 = vld [vmem:[#allocation2 + $0xb4] sm:$0xf0] }
 0x165   :  { %v972_v42 = vmul.f32 %v897_v3, %v3402_v43  ;;  %v226_v36 = vpack.c.bf16 %v190_v29, %v189_v2  ;;  %v2802_v3 = vld [vmem:[#allocation2 + $0xb0] sm:$0xf]  ;;  %v191_v2 = vcvt.s32.f32 %v3042_v18  ;;  %v192_v29 = vcvt.s32.f32 %v3043_v53 }
 0x167   :  { %v1002_v17 = vpack.c.bf16 %v972_v42, %v971_v4  ;;  %258 = vst [vmem:[#allocation2 + $0xd8] sm:$0xff] %v226_v36  ;;  %v3542_v4 = vor.u32 %v2943_v58, %v2802_v3  ;;  %v3045_v58 = vunpack.c.3.s8 %v3065_v8 }
 0x169   :  { %2841 = vmatmul.msk.bf16.gmra.mxu2 %vm1022_vm1, %v1002_v17  ;;  %v812_v46 = vpop.f32.mrf.mxu0  ;;  %4528 = vst [vmem:[#allocation31_spill] sm:$0xff] %v3542_v4  ;;  %v3044_v17 = vunpack.c.2.s8 %v3065_v8  ;;  %v194_v60 = vcvt.s32.f32 %v3045_v58 }
 0x16a   :  { %v899_v1 = vpop.f32.mrf.mxu1 }
 0x16b   :  { %v900_v27 = vadd.f32 %v899_v1, %v810_v62  ;;  %v2804_v62 = vld [vmem:[#allocation2 + $0xb8] sm:$0xf0] }
 0x16c   :  { %v3551_v3 = vor.u32 %v2942_v37, %v2804_v62  ;;  %v3066_v37 = vld [vmem:[%s4400_s0 + $0x78] sm:$0xff]  }
 0x16d   :  { %938 = vmatmul.bf16.gmra.mxu1 %v3539_v47  ;;  %v973_v6 = vmul.f32 %v900_v27, %v3341_v19  ;;  %v227_v27 = vpack.c.bf16 %v192_v29, %v191_v2  ;;  %v3048_v62 = vunpack.c.0.s8 %v3066_v37  ;;  %v3049_v58 = vunpack.c.1.s8 %v3066_v37  ;;  %v2944_v2 = vld [vmem:[#allocation2 + $0xc4] sm:$0xf] }
 0x16e   :  { %4529 = vst [vmem:[#allocation32_spill] sm:$0xff] %v3551_v3 }
 0x16f   :  { %259 = vst [vmem:[#allocation2 + $0xe0] sm:$0xff] %v227_v27 }
 0x171   :  { %v815_v42 = vpop.f32.mrf.mxu0 }
 0x172   :  { %v901_v12 = vpop.f32.mrf.mxu1 }
 0x173   :  { %v902_v5 = vadd.f32 %v901_v12, %v812_v46  ;;  %v193_v46 = vcvt.s32.f32 %v3044_v17 }
 0x174   :  { %854 = vmatmul.bf16.gmra.mxu0 %v3542_v4  ;;  %v2945_v4 = vld [vmem:[#allocation2 + $0xc4] sm:$0xf0] }
 0x175   :  { %v974_v36 = vmul.f32 %v902_v5, %v3382_v16  ;;  %v228_v47 = vpack.c.bf16 %v194_v60, %v193_v46  ;;  %v2810_v5 = vld [vmem:[#allocation2 + $0xc0] sm:$0xf]  ;;  %v195_v46 = vcvt.s32.f32 %v3048_v62  ;;  %v196_v60 = vcvt.s32.f32 %v3049_v58 }
 0x177   :  { %v1003_v26 = vpack.c.bf16 %v974_v36, %v973_v6  ;;  %260 = vst [vmem:[#allocation2 + $0xe8] sm:$0xff] %v228_v47  ;;  %v3554_v6 = vor.u32 %v2945_v4, %v2810_v5  ;;  %v3051_v4 = vunpack.c.3.s8 %v3066_v37 }
 0x179   :  { %2842 = vmatmul.msk.bf16.gmra.mxu2 %vm1022_vm1, %v1003_v26  ;;  %v817_v1 = vpop.f32.mrf.mxu0  ;;  %4530 = vst [vmem:[#allocation33_spill] sm:$0xff] %v3554_v6  ;;  %v3050_v26 = vunpack.c.2.s8 %v3066_v37  ;;  %v198_v27 = vcvt.s32.f32 %v3051_v4  ;;  %v2820_v4 = vld [vmem:[#allocation2 + $0xd8] sm:$0xf0] }
 0x17a   :  { %v904_v12 = vpop.f32.mrf.mxu1 }
 0x17b   :  { %v905_v8 = vadd.f32 %v904_v12, %v815_v42  ;;  %v2812_v42 = vld [vmem:[#allocation2 + $0xc8] sm:$0xf0] }
 0x17c   :  { %v3563_v5 = vor.u32 %v2944_v2, %v2812_v42  ;;  %v2946_v42 = vld [vmem:[#allocation2 + $0xd4] sm:$0xf] }
 0x17d   :  { %943 = vmatmul.bf16.gmra.mxu1 %v3551_v3  ;;  %v975_v17 = vmul.f32 %v905_v8, %v3343_v20  ;;  %v229_v8 = vpack.c.bf16 %v196_v60, %v195_v46  ;;  %v3572_v46 = vor.u32 %v2946_v42, %v2820_v4 }
 0x17e   :  { %4531 = vst [vmem:[#allocation34_spill] sm:$0xff] %v3563_v5  ;;  %v2949_v60 = vld [vmem:[#allocation2 + $0xe4] sm:$0xf0] }
 0x17f   :  { %261 = vst [vmem:[#allocation2 + $0xf0] sm:$0xff] %v229_v8 }
 0x180   :  { %4533 = vst [vmem:[#allocation36_spill] sm:$0xff] %v3572_v46 }
 0x181   :  { %v820_v36 = vpop.f32.mrf.mxu0 }
 0x182   :  { %v906_v18 = vpop.f32.mrf.mxu1 }
 0x183   :  { %v907_v53 = vadd.f32 %v906_v18, %v817_v1  ;;  %v197_v1 = vcvt.s32.f32 %v3050_v26 }
 0x184   :  { %859 = vmatmul.bf16.gmra.mxu0 %v3554_v6  ;;  %v2947_v6 = vld [vmem:[#allocation2 + $0xd4] sm:$0xf0] }
 0x185   :  { %v976_v47 = vmul.f32 %v907_v53, %v3318_v48  ;;  %v230_v3 = vpack.c.bf16 %v198_v27, %v197_v1  ;;  %v2818_v53 = vld [vmem:[#allocation2 + $0xd0] sm:$0xf] }
 0x186   :  { %v3566_v37 = vor.u32 %v2947_v6, %v2818_v53 }
 0x187   :  { %v1004_v29 = vpack.c.bf16 %v976_v47, %v975_v17  ;;  %262 = vst [vmem:[#allocation2 + $0xf8] sm:$0xff] %v230_v3 }
 0x188   :  { %4532 = vst [vmem:[#allocation35_spill] sm:$0xff] %v3566_v37 }
 0x189   :  { %2843 = vmatmul.msk.bf16.gmra.mxu2 %vm1022_vm1, %v1004_v29  ;;  %v822_v12 = vpop.f32.mrf.mxu0 }
 0x18a   :  { %v909_v18 = vpop.f32.mrf.mxu1 }
 0x18b   :  { %v910_v17 = vadd.f32 %v909_v18, %v820_v36  ;;  %v2826_v36 = vld [vmem:[#allocation2 + $0xe0] sm:$0xf] }
 0x18c   :  { %v3575_v1 = vor.u32 %v2949_v60, %v2826_v36 }
 0x18d   :  { %948 = vmatmul.bf16.gmra.mxu1 %v3563_v5  ;;  %v977_v26 = vmul.f32 %v910_v17, %v3331_v57 }
 0x18e   :  { %4534 = vst [vmem:[#allocation37_spill] sm:$0xff] %v3575_v1 }
 0x191   :  { %v825_v47 = vpop.f32.mrf.mxu0 }
 0x192   :  { %v911_v62 = vpop.f32.mrf.mxu1 }
 0x193   :  { %v912_v58 = vadd.f32 %v911_v62, %v822_v12  ;;  %v2948_v62 = vld [vmem:[#allocation2 + $0xe4] sm:$0xf] }
 0x194   :  { %864 = vmatmul.bf16.gmra.mxu0 %v3566_v37 }
 0x195   :  { %v978_v2 = vmul.f32 %v912_v58, %v3326_v52  ;;  %v2828_v58 = vld [vmem:[#allocation2 + $0xe8] sm:$0xf0] }
 0x196   :  { %v3581_v42 = vor.u32 %v2948_v62, %v2828_v58 }
 0x197   :  { %v1005_v29 = vpack.c.bf16 %v978_v2, %v977_v26 }
 0x198   :  { %4535 = vst [vmem:[#allocation38_spill] sm:$0xff] %v3581_v42 }
 0x199   :  { %2844 = vmatmul.msk.bf16.gmra.mxu2 %vm1022_vm1, %v1005_v29  ;;  %v827_v3 = vpop.f32.mrf.mxu0  ;;  %v2951_v29 = vld [vmem:[#allocation2 + $0xf4] sm:$0xf0] }
 0x19a   :  { %v914_v6 = vpop.f32.mrf.mxu1 }
 0x19b   :  { %v915_v27 = vadd.f32 %v914_v6, %v825_v47  ;;  %v2834_v47 = vld [vmem:[#allocation2 + $0xf0] sm:$0xf] }
 0x19d   :  { %953 = vmatmul.bf16.gmra.mxu1 %v3572_v46  ;;  %v979_v53 = vmul.f32 %v915_v27, %v3248_v39 }
 0x1a1   :  { %v830_v12 = vpop.f32.mrf.mxu0 }
 0x1a2   :  { %v916_v8 = vpop.f32.mrf.mxu1 }
 0x1a3   :  { %v917_v18 = vadd.f32 %v916_v8, %v827_v3  ;;  %v3584_v3 = vor.u32 %v2951_v29, %v2834_v47 }
 0x1a4   :  { %869 = vmatmul.bf16.gmra.mxu0 %v3575_v1 }
 0x1a5   :  { %v980_v17 = vmul.f32 %v917_v18, %v3306_v31  ;;  %4536 = vst [vmem:[#allocation39_spill] sm:$0xff] %v3584_v3 }
 0x1a7   :  { %v1006_v26 = vpack.c.bf16 %v980_v17, %v979_v53  ;;  %v2950_v53 = vld [vmem:[#allocation2 + $0xf4] sm:$0xf]  ;;  %v2836_v17 = vld [vmem:[#allocation2 + $0xf8] sm:$0xf0] }
 0x1a9   :  { %2845 = vmatmul.msk.bf16.gmra.mxu2 %vm1022_vm1, %v1006_v26  ;;  %v832_v2 = vpop.f32.mrf.mxu0  ;;  %v3590_v26 = vor.u32 %v2950_v53, %v2836_v17  ;;  %v2952_v53 = vld [vmem:[%s4403_s5] sm:$0xff] }
 0x1aa   :  { %v919_v4 = vpop.f32.mrf.mxu1 }
 0x1ab   :  { %v920_v6 = vadd.f32 %v919_v4, %v830_v12  ;;  %4537 = vst [vmem:[#allocation40_spill] sm:$0xff] %v3590_v26  ;;  %v2955_v12 = vld [vmem:[%s4403_s5 + $0x18] sm:$0xff] }
 0x1ac   :  { %1297 = vmatpush.bf16.msra.mxu3 %v2955_v12 }
 0x1ad   :  { %958 = vmatmul.bf16.gmra.mxu1 %v3581_v42  ;;  %v981_v8 = vmul.f32 %v920_v6, %v3232_v33 }
 0x1b1   :  { %v835_v36 = vpop.f32.mrf.mxu0 }
 0x1b2   :  { %v921_v60 = vpop.f32.mrf.mxu1 }
 0x1b3   :  { %v922_v27 = vadd.f32 %v921_v60, %v832_v2  ;;  %v2954_v2 = vld [vmem:[%s4403_s5 + $0x10] sm:$0xff]  ;;  %v2953_v60 = vld [vmem:[%s4403_s5 + $0x8] sm:$0xff] }
 0x1b4   :  { %874 = vmatmul.bf16.gmra.mxu0 %v3584_v3  ;;  %1298 = vmatpush.bf16.msra.mxu3 %v2954_v2 }
 0x1b5   :  { %v982_v18 = vmul.f32 %v922_v27, %v3234_v34 }
 0x1b7   :  { %v1007_v62 = vpack.c.bf16 %v982_v18, %v981_v8 }
 0x1b8   :  { %1299 = vmatpush.bf16.msra.mxu3 %v2953_v60 }
 0x1b9   :  { %2846 = vmatmul.msk.bf16.gmra.mxu2 %vm1022_vm1, %v1007_v62  ;;  %v837_v58 = vpop.f32.mrf.mxu0 }
 0x1ba   :  { %v924_v47 = vpop.f32.mrf.mxu1 }
 0x1bb   :  { %v925_v4 = vadd.f32 %v924_v47, %v835_v36 }
 0x1bc   :  { %1300 = vmatpush.bf16.msra.mxu3 %v2952_v53 }
 0x1bd   :  { %963 = vmatmul.bf16.gmra.mxu1 %v3590_v26  ;;  %v983_v8 = vmul.f32 %v925_v4, %v3252_v41 }
 0x1c1   :  { %v840_v29 = vpop.f32.mrf.mxu0 }
 0x1c2   :  { %v926_v6 = vpop.f32.mrf.mxu1 }
 0x1c3   :  { %v927_v27 = vadd.f32 %v926_v6, %v837_v58 }
 0x1c5   :  { %v984_v18 = vmul.f32 %v927_v27, %v3268_v59 }
 0x1c7   :  { %v1008_v17 = vpack.c.bf16 %v984_v18, %v983_v8  ;;  %v3614_v8 = vld [vmem:[%s4402_s4] ss:$0 sm:$0xff] }
 0x1c9   :  { %2847 = vmatmul.msk.bf16.gmra.mxu2 %vm1022_vm1, %v1008_v17  ;;  %v842_v36 = vpop.f32.mrf.mxu0 }
 0x1ca   :  { %v929_v62 = vpop.f32.mrf.mxu1 }
 0x1cb   :  { %v930_v47 = vadd.f32 %v929_v62, %v840_v29 }
 0x1cd   :  { %v985_v58 = vmul.f32 %v930_v47, %v3435_v54 }
 0x1d1   :  { %v845_v12 = vpop.f32.mrf.mxu0 }
 0x1d2   :  { %v931_v2 = vpop.f32.mrf.mxu1 }
 0x1d3   :  { %v932_v26 = vadd.f32 %v931_v2, %v842_v36 }
 0x1d5   :  { %v986_v4 = vmul.f32 %v932_v26, %v3429_v51 }
 0x1d7   :  { %v1009_v6 = vpack.c.bf16 %v986_v4, %v985_v58 }
 0x1d9   :  { %2848 = vmatmul.msk.bf16.gmra.mxu2 %vm1022_vm1, %v1009_v6  ;;  %v847_v60 = vpop.f32.mrf.mxu0 }
 0x1da   :  { %v934_v27 = vpop.f32.mrf.mxu1 }
 0x1db   :  { %v935_v18 = vadd.f32 %v934_v27, %v845_v12 }
 0x1dc   :  { %v1084_v42 = vpop.f32.mrf.mxu2 }
 0x1dd   :  { %v1085_v17 = vadd.f32 %v3614_v8, %v1084_v42  ;;  %v987_v26 = vmul.f32 %v935_v18, %v3388_v28 }
 0x1df   :  { %v1164_v58 = vmax.f32 %v1085_v17, 0.0 }
 0x1e1   :  { %v850_v29 = vpop.f32.mrf.mxu0 }
 0x1e2   :  { %v936_v53 = vpop.f32.mrf.mxu1 }
 0x1e3   :  { %v937_v36 = vadd.f32 %v936_v53, %v847_v60 }
 0x1e4   :  { %v1086_v62 = vpop.f32.mrf.mxu2 }
 0x1e5   :  { %v988_v47 = vmul.f32 %v937_v36, %v3421_v24  ;;  %v1087_v2 = vadd.f32 %v3614_v8, %v1086_v62 }
 0x1e7   :  { %v1165_v4 = vmax.f32 %v1087_v2, 0.0  ;;  %v1010_v6 = vpack.c.bf16 %v988_v47, %v987_v26 }
 0x1e9   :  { %2849 = vmatmul.msk.bf16.gmra.mxu2 %vm1022_vm1, %v1010_v6  ;;  %v852_v46 = vpop.f32.mrf.mxu0  ;;  %v1196_v12 = vpack.c.bf16 %v1165_v4, %v1164_v58 }
 0x1ea   :  { %v939_v27 = vpop.f32.mrf.mxu1 }
 0x1eb   :  { %2872 = vmatmul.msk.bf16.vlgmr.msra.gmra.mxu3 %vm1244_vm2, %v1196_v12  ;;  %v940_v60 = vadd.f32 %v939_v27, %v850_v29 }
 0x1ec   :  { %v1089_v42 = vpop.f32.mrf.mxu2 }
 0x1ed   :  { %v1090_v18 = vadd.f32 %v3614_v8, %v1089_v42  ;;  %v989_v17 = vmul.f32 %v940_v60, %v3380_v14 }
 0x1ef   :  { %v1166_v47 = vmax.f32 %v1090_v18, 0.0 }
 0x1f1   :  { %v855_v53 = vpop.f32.mrf.mxu0 }
 0x1f2   :  { %v941_v5 = vpop.f32.mrf.mxu1 }
 0x1f3   :  { %v942_v36 = vadd.f32 %v941_v5, %v852_v46 }
 0x1f4   :  { %v1091_v3 = vpop.f32.mrf.mxu2 }
 0x1f5   :  { %v990_v62 = vmul.f32 %v942_v36, %v3371_v55  ;;  %v1092_v26 = vadd.f32 %v3614_v8, %v1091_v3 }
 0x1f7   :  { %v1167_v2 = vmax.f32 %v1092_v26, 0.0  ;;  %v1011_v58 = vpack.c.bf16 %v990_v62, %v989_v17 }
 0x1f9   :  { %2850 = vmatmul.msk.bf16.gmra.mxu2 %vm1022_vm1, %v1011_v58  ;;  %v857_v4 = vpop.f32.mrf.mxu0  ;;  %v1197_v6 = vpack.c.bf16 %v1167_v2, %v1166_v47 }
 0x1fa   :  { %v944_v29 = vpop.f32.mrf.mxu1 }
 0x1fb   :  { %2873 = vmatmul.msk.bf16.gmra.mxu3 %vm1244_vm2, %v1197_v6  ;;  %v945_v27 = vadd.f32 %v944_v29, %v855_v53 }
 0x1fc   :  { %v1094_v12 = vpop.f32.mrf.mxu2 }
 0x1fd   :  { %v1095_v42 = vadd.f32 %v3614_v8, %v1094_v12  ;;  %v991_v3 = vmul.f32 %v945_v27, %v3368_v49 }
 0x1ff   :  { %v1168_v62 = vmax.f32 %v1095_v42, 0.0 }
 0x201   :  { %v860_v5 = vpop.f32.mrf.mxu0 }
 0x202   :  { %v946_v46 = vpop.f32.mrf.mxu1 }
 0x203   :  { %v947_v60 = vadd.f32 %v946_v46, %v857_v4 }
 0x204   :  { %v1096_v36 = vpop.f32.mrf.mxu2 }
 0x205   :  { %v992_v18 = vmul.f32 %v947_v60, %v3363_v44  ;;  %v1097_v17 = vadd.f32 %v3614_v8, %v1096_v36 }
 0x207   :  { %v1169_v26 = vmax.f32 %v1097_v17, 0.0  ;;  %v1012_v47 = vpack.c.bf16 %v992_v18, %v991_v3 }
 0x209   :  { %2851 = vmatmul.msk.bf16.gmra.mxu2 %vm1022_vm1, %v1012_v47  ;;  %v862_v2 = vpop.f32.mrf.mxu0  ;;  %v1198_v58 = vpack.c.bf16 %v1169_v26, %v1168_v62 }
 0x20a   :  { %v949_v53 = vpop.f32.mrf.mxu1 }
 0x20b   :  { %2874 = vmatmul.msk.bf16.gmra.mxu3 %vm1244_vm2, %v1198_v58  ;;  %v950_v29 = vadd.f32 %v949_v53, %v860_v5 }
 0x20c   :  { %v1099_v6 = vpop.f32.mrf.mxu2 }
 0x20d   :  { %v1100_v27 = vadd.f32 %v3614_v8, %v1099_v6  ;;  %v993_v36 = vmul.f32 %v950_v29, %v3296_v22 }
 0x20f   :  { %v1170_v18 = vmax.f32 %v1100_v27, 0.0 }
 0x211   :  { %v865_v4 = vpop.f32.mrf.mxu0 }
 0x212   :  { %v951_v12 = vpop.f32.mrf.mxu1 }
 0x213   :  { %v952_v46 = vadd.f32 %v951_v12, %v862_v2 }
 0x214   :  { %v1101_v60 = vpop.f32.mrf.mxu2 }
 0x215   :  { %v994_v42 = vmul.f32 %v952_v46, %v3345_v21  ;;  %v1102_v3 = vadd.f32 %v3614_v8, %v1101_v60 }
 0x217   :  { %v1013_v17 = vpack.c.bf16 %v994_v42, %v993_v36  ;;  %v1171_v62 = vmax.f32 %v1102_v3, 0.0 }
 0x219   :  { %2852 = vmatmul.msk.bf16.gmra.mxu2 %vm1022_vm1, %v1013_v17  ;;  %v1199_v26 = vpack.c.bf16 %v1171_v62, %v1170_v18  ;;  %v867_v47 = vpop.f32.mrf.mxu0 }
 0x21a   :  { %v954_v5 = vpop.f32.mrf.mxu1 }
 0x21b   :  { %2875 = vmatmul.msk.bf16.gmra.mxu3 %vm1244_vm2, %v1199_v26  ;;  %v955_v53 = vadd.f32 %v954_v5, %v865_v4 }
 0x21c   :  { %v1104_v58 = vpop.f32.mrf.mxu2 }
 0x21d   :  { %v1105_v6 = vadd.f32 %v3614_v8, %v1104_v58  ;;  %v995_v60 = vmul.f32 %v955_v53, %v3304_v30 }
 0x21f   :  { %v1172_v42 = vmax.f32 %v1105_v6, 0.0 }
 0x221   :  { %v870_v12 = vpop.f32.mrf.mxu0 }
 0x222   :  { %v956_v2 = vpop.f32.mrf.mxu1 }
 0x223   :  { %v957_v29 = vadd.f32 %v956_v2, %v867_v47 }
 0x224   :  { %v1106_v46 = vpop.f32.mrf.mxu2 }
 0x225   :  { %v996_v27 = vmul.f32 %v957_v29, %v3272_v63  ;;  %v1107_v36 = vadd.f32 %v3614_v8, %v1106_v46 }
 0x227   :  { %v1014_v3 = vpack.c.bf16 %v996_v27, %v995_v60  ;;  %v1173_v18 = vmax.f32 %v1107_v36, 0.0 }
 0x229   :  { %2853 = vmatmul.msk.bf16.gmra.mxu2 %vm1022_vm1, %v1014_v3  ;;  %v1200_v17 = vpack.c.bf16 %v1173_v18, %v1172_v42  ;;  %v872_v26 = vpop.f32.mrf.mxu0 }
 0x22a   :  { %v959_v62 = vpop.f32.mrf.mxu1 }
 0x22b   :  { %2876 = vmatmul.msk.bf16.gmra.mxu3 %vm1244_vm2, %v1200_v17  ;;  %v960_v47 = vadd.f32 %v959_v62, %v870_v12 }
 0x22c   :  { %v1109_v4 = vpop.f32.mrf.mxu2 }
 0x22d   :  { %v1110_v58 = vadd.f32 %v3614_v8, %v1109_v4  ;;  %v997_v29 = vmul.f32 %v960_v47, %v3292_v15 }
 0x22f   :  { %v1174_v60 = vmax.f32 %v1110_v58, 0.0 }
 0x231   :  { %v875_v42 = vpop.f32.mrf.mxu0 }
 0x232   :  { %v961_v5 = vpop.f32.mrf.mxu1 }
 0x233   :  { %v962_v53 = vadd.f32 %v961_v5, %v872_v26 }
 0x234   :  { %v1111_v2 = vpop.f32.mrf.mxu2 }
 0x235   :  { %v998_v6 = vmul.f32 %v962_v53, %v3290_v13  ;;  %v1112_v46 = vadd.f32 %v3614_v8, %v1111_v2 }
 0x237   :  { %v1015_v27 = vpack.c.bf16 %v998_v6, %v997_v29  ;;  %v1175_v36 = vmax.f32 %v1112_v46, 0.0 }
 0x239   :  { %2854 = vmatmul.msk.bf16.gmra.mxu2 %vm1022_vm1, %v1015_v27  ;;  %v1201_v3 = vpack.c.bf16 %v1175_v36, %v1174_v60  ;;  %v877_v62 = vpop.f32.mrf.mxu0 }
 0x23a   :  { %v964_v18 = vpop.f32.mrf.mxu1 }
 0x23b   :  { %2877 = vmatmul.msk.bf16.gmra.mxu3 %vm1244_vm2, %v1201_v3  ;;  %v965_v17 = vadd.f32 %v964_v18, %v875_v42 }
 0x23c   :  { %v1114_v12 = vpop.f32.mrf.mxu2 }
 0x23d   :  { %v1115_v26 = vadd.f32 %v3614_v8, %v1114_v12  ;;  %v999_v53 = vmul.f32 %v965_v17, %v3250_v40 }
 0x23f   :  { %v1176_v29 = vmax.f32 %v1115_v26, 0.0 }
 0x242   :  { %v966_v4 = vpop.f32.mrf.mxu1 }
 0x243   :  { %v967_v47 = vadd.f32 %v966_v4, %v877_v62 }
 0x244   :  { %v1116_v5 = vpop.f32.mrf.mxu2 }
 0x245   :  { %v1000_v58 = vmul.f32 %v967_v47, %v3266_v56  ;;  %v1117_v2 = vadd.f32 %v3614_v8, %v1116_v5 }
 0x247   :  { %v1016_v6 = vpack.c.bf16 %v1000_v58, %v999_v53  ;;  %v1177_v46 = vmax.f32 %v1117_v2, 0.0 }
 0x249   :  { %2855 = vmatmul.msk.bf16.gmra.mxu2 %vm1022_vm1, %v1016_v6  ;;  %v1202_v60 = vpack.c.bf16 %v1177_v46, %v1176_v29 }
 0x24b   :  { %2878 = vmatmul.msk.bf16.gmra.mxu3 %vm1244_vm2, %v1202_v60 }
 0x24c   :  { %v1119_v27 = vpop.f32.mrf.mxu2 }
 0x24d   :  { %v1120_v36 = vadd.f32 %v3614_v8, %v1119_v27 }
 0x24f   :  { %v1178_v18 = vmax.f32 %v1120_v36, 0.0 }
 0x254   :  { %v1121_v42 = vpop.f32.mrf.mxu2 }
 0x255   :  { %v1122_v3 = vadd.f32 %v3614_v8, %v1121_v42 }
 0x257   :  { %v1179_v12 = vmax.f32 %v1122_v3, 0.0 }
 0x259   :  { %v1203_v17 = vpack.c.bf16 %v1179_v12, %v1178_v18 }
 0x25b   :  { %2879 = vmatmul.msk.bf16.gmra.mxu3 %vm1244_vm2, %v1203_v17 }
 0x25c   :  { %v1124_v62 = vpop.f32.mrf.mxu2 }
 0x25d   :  { %v1125_v4 = vadd.f32 %v3614_v8, %v1124_v62 }
 0x25f   :  { %v1180_v5 = vmax.f32 %v1125_v4, 0.0 }
 0x264   :  { %v1126_v26 = vpop.f32.mrf.mxu2 }
 0x265   :  { %v1127_v47 = vadd.f32 %v3614_v8, %v1126_v26 }
 0x267   :  { %v1181_v53 = vmax.f32 %v1127_v47, 0.0 }
 0x269   :  { %v1204_v58 = vpack.c.bf16 %v1181_v53, %v1180_v5 }
 0x26b   :  { %2880 = vmatmul.msk.bf16.gmra.mxu3 %vm1244_vm2, %v1204_v58 }
 0x26c   :  { %v1129_v2 = vpop.f32.mrf.mxu2 }
 0x26d   :  { %v1130_v6 = vadd.f32 %v3614_v8, %v1129_v2 }
 0x26e   :  { %v1302_v29 = vpop.f32.mrf.mxu3 }
 0x26f   :  { %v1182_v36 = vmax.f32 %v1130_v6, 0.0  ;;  %v3667_v42 = vmul.f32 %v1302_v29, %v3419_v23 }
 0x274   :  { %v1131_v46 = vpop.f32.mrf.mxu2 }
 0x275   :  { %v1132_v60 = vadd.f32 %v3614_v8, %v1131_v46 }
 0x276   :  { %v1304_v27 = vpop.f32.mrf.mxu3 }
 0x277   :  { %v1183_v3 = vmax.f32 %v1132_v60, 0.0  ;;  %v3670_v18 = vmul.f32 %v1304_v27, %v3411_v9 }
 0x279   :  { %v1205_v12 = vpack.c.bf16 %v1183_v3, %v1182_v36 }
 0x27b   :  { %2881 = vmatmul.msk.bf16.gmra.mxu3 %vm1244_vm2, %v1205_v12 }
 0x27c   :  { %v1134_v62 = vpop.f32.mrf.mxu2 }
 0x27d   :  { %v1135_v26 = vadd.f32 %v3614_v8, %v1134_v62 }
 0x27e   :  { %v1307_v4 = vpop.f32.mrf.mxu3 }
 0x27f   :  { %v1184_v58 = vmax.f32 %v1135_v26, 0.0  ;;  %v3678_v2 = vmul.f32 %v1307_v4, %v3407_v50 }
 0x284   :  { %v1136_v47 = vpop.f32.mrf.mxu2 }
 0x285   :  { %v1137_v5 = vadd.f32 %v3614_v8, %v1136_v47 }
 0x286   :  { %v1309_v53 = vpop.f32.mrf.mxu3 }
 0x287   :  { %v1185_v29 = vmax.f32 %v1137_v5, 0.0  ;;  %v3681_v6 = vmul.f32 %v1309_v53, %v3402_v43 }
 0x289   :  { %v1206_v46 = vpack.c.bf16 %v1185_v29, %v1184_v58 }
 0x28b   :  { %2882 = vmatmul.msk.bf16.gmra.mxu3 %vm1244_vm2, %v1206_v46 }
 0x28c   :  { %v1139_v27 = vpop.f32.mrf.mxu2 }
 0x28d   :  { %v1140_v3 = vadd.f32 %v3614_v8, %v1139_v27 }
 0x28e   :  { %v1312_v36 = vpop.f32.mrf.mxu3 }
 0x28f   :  { %v1186_v4 = vmax.f32 %v1140_v3, 0.0  ;;  %v3689_v47 = vmul.f32 %v1312_v36, %v3341_v19 }
 0x294   :  { %v1141_v12 = vpop.f32.mrf.mxu2 }
 0x295   :  { %v1142_v62 = vadd.f32 %v3614_v8, %v1141_v12 }
 0x296   :  { %v1314_v26 = vpop.f32.mrf.mxu3 }
 0x297   :  { %v1187_v5 = vmax.f32 %v1142_v62, 0.0  ;;  %v3692_v53 = vmul.f32 %v1314_v26, %v3382_v16 }
 0x299   :  { %v1207_v58 = vpack.c.bf16 %v1187_v5, %v1186_v4 }
 0x29b   :  { %2883 = vmatmul.msk.bf16.gmra.mxu3 %vm1244_vm2, %v1207_v58 }
 0x29c   :  { %v1144_v46 = vpop.f32.mrf.mxu2 }
 0x29d   :  { %v1145_v17 = vadd.f32 %v3614_v8, %v1144_v46 }
 0x29e   :  { %v1317_v27 = vpop.f32.mrf.mxu3 }
 0x29f   :  { %v1188_v36 = vmax.f32 %v1145_v17, 0.0  ;;  %v1388_v62 = vmul.f32 %v1317_v27, %v3343_v20 }
 0x2a4   :  { %v1146_v12 = vpop.f32.mrf.mxu2 }
 0x2a5   :  { %v1147_v3 = vadd.f32 %v3614_v8, %v1146_v12 }
 0x2a6   :  { %v1319_v60 = vpop.f32.mrf.mxu3 }
 0x2a7   :  { %v1189_v19 = vmax.f32 %v1147_v3, 0.0  ;;  %v1389_v26 = vmul.f32 %v1319_v60, %v3318_v48 }
 0x2a9   :  { %v1208_v4 = vpack.c.bf16 %v1189_v19, %v1188_v36  ;;  %v1417_v5 = vpack.c.bf16 %v1389_v26, %v1388_v62 }
 0x2ab   :  { %2884 = vmatmul.msk.bf16.gmra.mxu3 %vm1244_vm2, %v1208_v4 }
 0x2ac   :  { %v1149_v29 = vpop.f32.mrf.mxu2 }
 0x2ad   :  { %v1150_v16 = vadd.f32 %v3614_v8, %v1149_v29 }
 0x2ae   :  { %v1322_v58 = vpop.f32.mrf.mxu3 }
 0x2af   :  { %v1190_v12 = vmax.f32 %v1150_v16, 0.0 }
 0x2b4   :  { %v1151_v43 = vpop.f32.mrf.mxu2 }
 0x2b5   :  { %v1152_v46 = vadd.f32 %v3614_v8, %v1151_v43 }
 0x2b6   :  { %v1324_v50 = vpop.f32.mrf.mxu3 }
 0x2b7   :  { %v1191_v9 = vmax.f32 %v1152_v46, 0.0 }
 0x2b9   :  { %v1209_v17 = vpack.c.bf16 %v1191_v9, %v1190_v12 }
 0x2bb   :  { %2885 = vmatmul.msk.bf16.gmra.mxu3 %vm1244_vm2, %v1209_v17 }
 0x2bc   :  { %v1154_v27 = vpop.f32.mrf.mxu2 }
 0x2bd   :  { %v1155_v19 = vadd.f32 %v3614_v8, %v1154_v27 }
 0x2be   :  { %v1327_v3 = vpop.f32.mrf.mxu3 }
 0x2bf   :  { %v1192_v26 = vmax.f32 %v1155_v19, 0.0 }
 0x2c4   :  { %v1156_v60 = vpop.f32.mrf.mxu2 }
 0x2c5   :  { %v1157_v36 = vadd.f32 %v3614_v8, %v1156_v60 }
 0x2c6   :  { %v1329_v62 = vpop.f32.mrf.mxu3 }
 0x2c7   :  { %v1193_v4 = vmax.f32 %v1157_v36, 0.0 }
 0x2c9   :  { %v1210_v29 = vpack.c.bf16 %v1193_v4, %v1192_v26 }
 0x2cb   :  { %2886 = vmatmul.msk.bf16.gmra.mxu3 %vm1244_vm2, %v1210_v29 }
 0x2cc   :  { %v1159_v43 = vpop.f32.mrf.mxu2 }
 0x2cd   :  { %v1160_v16 = vadd.f32 %v3614_v8, %v1159_v43 }
 0x2ce   :  { %v1332_v48 = vpop.f32.mrf.mxu3 }
 0x2cf   :  { %v1194_v17 = vmax.f32 %v1160_v16, 0.0  ;;  %v1394_v29 = vmul.f32 %v1332_v48, %v3232_v33 }
 0x2d4   :  { %v1161_v9 = vpop.f32.mrf.mxu2 }
 0x2d5   :  { %v1162_v46 = vadd.f32 %v3614_v8, %v1161_v9  ;;  %v1393_v8 = vmul.f32 %v1329_v62, %v3306_v31  ;;  %v1391_v9 = vmul.f32 %v1324_v50, %v3326_v52  ;;  %v4538_v62 = vpack.c.bf16 %v3692_v53, %v3689_v47 }
 0x2d6   :  { %v1334_v12 = vpop.f32.mrf.mxu3  ;;  %v4540_v50 = vpack.c.bf16 %v3670_v18, %v3667_v42 }
 0x2d7   :  { %v1195_v20 = vmax.f32 %v1162_v46, 0.0  ;;  %v1395_v26 = vmul.f32 %v1334_v12, %v3234_v34 }
 0x2d9   :  { %v1211_v27 = vpack.c.bf16 %v1195_v20, %v1194_v17  ;;  %v1420_v43 = vpack.c.bf16 %v1395_v26, %v1394_v29  ;;  %v1392_v20 = vmul.f32 %v1327_v3, %v3248_v39  ;;  %v1390_v17 = vmul.f32 %v1322_v58, %v3331_v57 }
 0x2db   :  { %2887 = vmatmul.msk.bf16.gmra.mxu3 %vm1244_vm2, %v1211_v27  ;;  %v1419_v46 = vpack.c.bf16 %v1393_v8, %v1392_v20  ;;  %v4539_v27 = vpack.c.bf16 %v3681_v6, %v3678_v2 }
 0x2de   :  { %v1337_v60 = vpop.f32.mrf.mxu3 }
 0x2df   :  { %v1396_v19 = vmul.f32 %v1337_v60, %v3252_v41 }
 0x2e6   :  { %v1339_v23 = vpop.f32.mrf.mxu3 }
 0x2e7   :  { %v1397_v36 = vmul.f32 %v1339_v23, %v3268_v59  ;;  %v1418_v23 = vpack.c.bf16 %v1391_v9, %v1390_v17 }
 0x2e9   :  { %v1421_v4 = vpack.c.bf16 %v1397_v36, %v1396_v19 }
 0x2eb   :  { %1430 = vmatpush.bf16.msrb.mxu2 %v1421_v4 }
 0x2ee   :  { %v3716_v16 = vpop.f32.mrf.mxu3 }
 0x2ef   :  { %1431 = vmatpush.bf16.msrb.mxu2 %v1420_v43 }
 0x2f3   :  { %1432 = vmatpush.bf16.msrb.mxu2 %v1419_v46 }
 0x2f6   :  { %v1344_v12 = vpop.f32.mrf.mxu3 }
 0x2f7   :  { %1433 = vmatpush.bf16.msrb.mxu2 %v1418_v23 }
 0x2fb   :  { %1434 = vmatpush.bf16.msrb.mxu2 %v1417_v5 }
 0x2fe   :  { %v1347_v48 = vpop.f32.mrf.mxu3 }
 0x2ff   :  { %1435 = vmatpush.bf16.msrb.mxu2 %v4538_v62 }
 0x303   :  { %1436 = vmatpush.bf16.msrb.mxu2 %v4539_v27 }
 0x306   :  { %v1349_v3 = vpop.f32.mrf.mxu3 }
 0x307   :  { %1437 = vmatpush.bf16.msrb.mxu2 %v4540_v50 }
 0x30a   :  { %1438 = vmatmul.bf16.vlgmr.msrb.gmra.mxu2 %v3427_v45 }
 0x30e   :  { %v1352_v58 = vpop.f32.mrf.mxu3 }
 0x316   :  { %v1354_v60 = vpop.f32.mrf.mxu3 }
 0x31a   :  { %1443 = vmatmul.bf16.gmra.mxu2 %v3442_v25 }
 0x31e   :  { %v1357_v5 = vpop.f32.mrf.mxu3 }
 0x326   :  { %v1359_v19 = vpop.f32.mrf.mxu3 }
 0x327   :  { %v1405_v50 = vmul.f32 %v1359_v19, %v3363_v44  ;;  %v1399_v19 = vmul.f32 %v1344_v12, %v3429_v51  ;;  %v4545_v12 = vld [vmem:[#allocation18_spill] sm:$0xff] }
 0x32a   :  { %1448 = vmatmul.bf16.gmra.mxu2 %v3451_v0 }
 0x32e   :  { %v1362_v47 = vpop.f32.mrf.mxu3 }
 0x32f   :  { %v1406_v27 = vmul.f32 %v1362_v47, %v3296_v22  ;;  %v1400_v47 = vmul.f32 %v1347_v48, %v3388_v28  ;;  %v4544_v48 = vld [vmem:[#allocation29_spill] sm:$0xff] }
 0x336   :  { %v1364_v53 = vpop.f32.mrf.mxu3 }
 0x337   :  { %v1407_v23 = vmul.f32 %v1364_v53, %v3345_v21  ;;  %v1401_v53 = vmul.f32 %v1349_v3, %v3421_v24  ;;  %v4542_v3 = vld [vmem:[#allocation27_spill] sm:$0xff] }
 0x33a   :  { %1453 = vmatmul.bf16.gmra.mxu2 %v3460_v35 }
 0x33e   :  { %v1367_v2 = vpop.f32.mrf.mxu3 }
 0x33f   :  { %v1408_v17 = vmul.f32 %v1367_v2, %v3304_v30  ;;  %v1402_v2 = vmul.f32 %v1352_v58, %v3380_v14  ;;  %v4541_v58 = vld [vmem:[#allocation16_spill] sm:$0xff] }
 0x346   :  { %v1369_v6 = vpop.f32.mrf.mxu3 }
 0x347   :  { %v1409_v9 = vmul.f32 %v1369_v6, %v3272_v63 }
 0x349   :  { %v1427_v62 = vpack.c.bf16 %v1409_v9, %v1408_v17  ;;  %v4549_v17 = vld [vmem:[#allocation22_spill] sm:$0xff] }
 0x34a   :  { %1458 = vmatmul.bf16.gmra.mxu2 %v3469_v7 }
 0x34e   :  { %v1372_v42 = vpop.f32.mrf.mxu3 }
 0x34f   :  { %v1410_v20 = vmul.f32 %v1372_v42, %v3292_v15  ;;  %v1403_v42 = vmul.f32 %v1354_v60, %v3371_v55 }
 0x351   :  { %v1424_v6 = vpack.c.bf16 %v1403_v42, %v1402_v2  ;;  %v4552_v42 = vld [vmem:[#allocation26_spill] sm:$0xff] }
 0x356   :  { %v1374_v18 = vpop.f32.mrf.mxu3 }
 0x357   :  { %v1411_v8 = vmul.f32 %v1374_v18, %v3290_v13  ;;  %v1426_v18 = vpack.c.bf16 %v1407_v23, %v1406_v27 }
 0x359   :  { %v1428_v46 = vpack.c.bf16 %v1411_v8, %v1410_v20  ;;  %v4546_v8 = vld [vmem:[#allocation31_spill] sm:$0xff] }
 0x35a   :  { %1463 = vmatmul.bf16.gmra.mxu2 %v3478_v61  ;;  %v1724_v20 = vld [vmem:[%s4405_s7] sm:$0xf] }
 0x35b   :  { %v1776_v9 = vsel %vm1774_vm3, %v1724_v20, 0 }
 0x35c   :  { %1785 = vmatpush.bf16.msrb.mxu0 %v1776_v9  ;;  %v4554_v9 = vld [vmem:[#allocation13_spill] sm:$0xff] }
 0x35e   :  { %v1377_v36 = vpop.f32.mrf.mxu3 }
 0x35f   :  { %v1412_v4 = vmul.f32 %v1377_v36, %v3250_v40  ;;  %v1404_v36 = vmul.f32 %v1357_v5, %v3368_v49  ;;  %v1398_v5 = vmul.f32 %v3716_v16, %v3435_v54  ;;  %v4547_v16 = vld [vmem:[#allocation19_spill] sm:$0xff] }
 0x361   :  { %v1422_v60 = vpack.c.bf16 %v1399_v19, %v1398_v5  ;;  %v3778_v19 = vld [vmem:[%s4404_s6] ss:$0 sm:$0xff] }
 0x366   :  { %v1379_v26 = vpop.f32.mrf.mxu3 }
 0x367   :  { %v1413_v29 = vmul.f32 %v1379_v26, %v3266_v56  ;;  %v1425_v26 = vpack.c.bf16 %v1405_v50, %v1404_v36  ;;  %v4551_v50 = vld [vmem:[#allocation24_spill] sm:$0xff] }
 0x369   :  { %v1429_v43 = vpack.c.bf16 %v1413_v29, %v1412_v4  ;;  %v1423_v4 = vpack.c.bf16 %v1401_v53, %v1400_v47  ;;  %v4543_v29 = vld [vmem:[#allocation17_spill] sm:$0xff] }
 0x36a   :  { %1468 = vmatmul.bf16.gmra.mxu2 %v3487_v38 }
 0x36b   :  { %1519 = vmatpush.bf16.msrb.mxu3 %v1429_v43  ;;  %v4548_v43 = vld [vmem:[#allocation20_spill] sm:$0xff] }
 0x36f   :  { %1520 = vmatpush.bf16.msrb.mxu3 %v1428_v46 }
 0x373   :  { %1521 = vmatpush.bf16.msrb.mxu3 %v1427_v62  ;;  %v4550_v62 = vld [vmem:[#allocation33_spill] sm:$0xff] }
 0x377   :  { %1522 = vmatpush.bf16.msrb.mxu3 %v1426_v18 }
 0x37a   :  { %1473 = vmatmul.bf16.gmra.mxu2 %v3496_v32 }
 0x37b   :  { %1523 = vmatpush.bf16.msrb.mxu3 %v1425_v26 }
 0x37f   :  { %1524 = vmatpush.bf16.msrb.mxu3 %v1424_v6  ;;  %v4553_v6 = vld [vmem:[#allocation14_spill] sm:$0xff] }
 0x383   :  { %1525 = vmatpush.bf16.msrb.mxu3 %v1423_v4 }
 0x387   :  { %1526 = vmatpush.bf16.msrb.mxu3 %v1422_v60 }
 0x38a   :  { %1527 = vmatmul.bf16.vlgmr.msrb.gmra.mxu3 %v3439_v10  ;;  %1478 = vmatmul.bf16.gmra.mxu2 %v3509_v11 }
 0x38d   :  { %v1439_v46 = vpop.f32.mrf.mxu2 }
 0x395   :  { %v1441_v23 = vpop.f32.mrf.mxu2 }
 0x39a   :  { %1532 = vmatmul.bf16.gmra.mxu3 %v4541_v58  ;;  %1483 = vmatmul.bf16.gmra.mxu2 %v4542_v3 }
 0x39d   :  { %v1444_v27 = vpop.f32.mrf.mxu2 }
 0x3a5   :  { %v1446_v18 = vpop.f32.mrf.mxu2 }
 0x3aa   :  { %1537 = vmatmul.bf16.gmra.mxu3 %v4543_v29  ;;  %1488 = vmatmul.bf16.gmra.mxu2 %v4544_v48 }
 0x3ad   :  { %v1449_v36 = vpop.f32.mrf.mxu2 }
 0x3b5   :  { %v1451_v2 = vpop.f32.mrf.mxu2 }
 0x3ba   :  { %1542 = vmatmul.bf16.gmra.mxu3 %v4545_v12  ;;  %1493 = vmatmul.bf16.gmra.mxu2 %v4546_v8  ;;  %v4558_v8 = vld [vmem:[#allocation11_spill] sm:$0xff] }
 0x3bd   :  { %v1454_v5 = vpop.f32.mrf.mxu2 }
 0x3ca   :  { %1547 = vmatmul.bf16.gmra.mxu3 %v4547_v16  ;;  %1498 = vmatmul.bf16.gmra.mxu2 %v4550_v62  ;;  %v4556_v62 = vld [vmem:[#allocation39_spill] sm:$0xff] }
 0x3da   :  { %1552 = vmatmul.bf16.gmra.mxu3 %v4548_v43  ;;  %1503 = vmatmul.bf16.gmra.mxu2 %v3566_v37 }
 0x3ea   :  { %1557 = vmatmul.bf16.gmra.mxu3 %v4549_v17  ;;  %1508 = vmatmul.bf16.gmra.mxu2 %v3575_v1 }
 0x3fa   :  { %1562 = vmatmul.bf16.gmra.mxu3 %v4551_v50  ;;  %v4555_v50 = vld [vmem:[#allocation28_spill] sm:$0xff] }
 0x40a   :  { %1567 = vmatmul.bf16.gmra.mxu3 %v4552_v42 }
 0x40d   :  { %v1528_v26 = vpop.f32.mrf.mxu3 }
 0x40e   :  { %v1529_v53 = vadd.f32 %v1528_v26, %v1439_v46 }
 0x410   :  { %v1608_v47 = vmul.f32 %v1529_v53, %v4553_v6  ;;  %v1456_v53 = vpop.f32.mrf.mxu2  ;;  %1513 = vmatmul.bf16.gmra.mxu2 %v4556_v62 }
 0x412   :  { %v1644_v20 = vadd.f32 %v3778_v19, %v1608_v47 }
 0x414   :  { %v1676_v1 = vmax.f32 %v1644_v20, 0.0  ;;  %v4559_v20 = vld [vmem:[#allocation30_spill] sm:$0xff] }
 0x415   :  { %v1530_v4 = vpop.f32.mrf.mxu3 }
 0x416   :  { %v1531_v60 = vadd.f32 %v1530_v4, %v1441_v23  ;;  %v4557_v23 = vld [vmem:[#allocation12_spill] sm:$0xff] }
 0x418   :  { %v1609_v37 = vmul.f32 %v1531_v60, %v4554_v9  ;;  %v1459_v16 = vpop.f32.mrf.mxu2 }
 0x41a   :  { %v1645_v42 = vadd.f32 %v3778_v19, %v1609_v37  ;;  %1572 = vmatmul.bf16.gmra.mxu3 %v4555_v50 }
 0x41c   :  { %v1677_v46 = vmax.f32 %v1645_v42, 0.0 }
 0x41d   :  { %v1533_v26 = vpop.f32.mrf.mxu3 }
 0x41e   :  { %v1708_v17 = vpack.c.bf16 %v1677_v46, %v1676_v1  ;;  %v1534_v43 = vadd.f32 %v1533_v26, %v1444_v27 }
 0x420   :  { %2888 = vmatmul.msk.bf16.vlgmr.msrb.gmra.mxu0 %vm1725_vm4, %v1708_v17  ;;  %v1610_v4 = vmul.f32 %v1534_v43, %v4557_v23  ;;  %v1461_v1 = vpop.f32.mrf.mxu2  ;;  %v4560_v43 = vld [vmem:[#allocation7_spill] sm:$0xff] }
 0x422   :  { %v1646_v37 = vadd.f32 %v3778_v19, %v1610_v4 }
 0x424   :  { %v1678_v12 = vmax.f32 %v1646_v37, 0.0 }
 0x425   :  { %v1535_v47 = vpop.f32.mrf.mxu3 }
 0x426   :  { %v1536_v60 = vadd.f32 %v1535_v47, %v1446_v18 }
 0x428   :  { %v1611_v50 = vmul.f32 %v1536_v60, %v4558_v8  ;;  %v1464_v18 = vpop.f32.mrf.mxu2  ;;  %v4561_v60 = vld [vmem:[#allocation10_spill] sm:$0xff] }
 0x42a   :  { %v1647_v42 = vadd.f32 %v3778_v19, %v1611_v50  ;;  %1577 = vmatmul.bf16.gmra.mxu3 %v4559_v20  ;;  %v4562_v20 = vld [vmem:[#allocation32_spill] sm:$0xff] }
 0x42c   :  { %v1679_v48 = vmax.f32 %v1647_v42, 0.0 }
 0x42d   :  { %v1538_v62 = vpop.f32.mrf.mxu3 }
 0x42e   :  { %v1709_v27 = vpack.c.bf16 %v1679_v48, %v1678_v12  ;;  %v1539_v46 = vadd.f32 %v1538_v62, %v1449_v36  ;;  %v4563_v36 = vld [vmem:[#allocation8_spill] sm:$0xff] }
 0x430   :  { %2889 = vmatmul.msk.bf16.gmra.mxu0 %vm1725_vm4, %v1709_v27  ;;  %v1612_v17 = vmul.f32 %v1539_v46, %v4560_v43  ;;  %v1466_v48 = vpop.f32.mrf.mxu2 }
 0x432   :  { %v1648_v4 = vadd.f32 %v3778_v19, %v1612_v17 }
 0x434   :  { %v1680_v37 = vmax.f32 %v1648_v4, 0.0 }
 0x435   :  { %v1540_v26 = vpop.f32.mrf.mxu3 }
 0x436   :  { %v1541_v47 = vadd.f32 %v1540_v26, %v1451_v2 }
 0x438   :  { %v1613_v29 = vmul.f32 %v1541_v47, %v4561_v60  ;;  %v1469_v26 = vpop.f32.mrf.mxu2  ;;  %v4564_v47 = vld [vmem:[#allocation6_spill] sm:$0xff] }
 0x43a   :  { %v1649_v50 = vadd.f32 %v3778_v19, %v1613_v29  ;;  %1582 = vmatmul.bf16.gmra.mxu3 %v4562_v20  ;;  %v4565_v20 = vld [vmem:[#allocation34_spill] sm:$0xff] }
 0x43c   :  { %v1681_v42 = vmax.f32 %v1649_v50, 0.0 }
 0x43d   :  { %v1543_v3 = vpop.f32.mrf.mxu3 }
 0x43e   :  { %v1710_v12 = vpack.c.bf16 %v1681_v42, %v1680_v37  ;;  %v1544_v62 = vadd.f32 %v1543_v3, %v1454_v5 }
 0x440   :  { %2890 = vmatmul.msk.bf16.gmra.mxu0 %vm1725_vm4, %v1710_v12  ;;  %v1614_v27 = vmul.f32 %v1544_v62, %v4563_v36  ;;  %v1471_v5 = vpop.f32.mrf.mxu2 }
 0x442   :  { %v1650_v17 = vadd.f32 %v3778_v19, %v1614_v27 }
 0x444   :  { %v1682_v4 = vmax.f32 %v1650_v17, 0.0 }
 0x445   :  { %v1545_v46 = vpop.f32.mrf.mxu3 }
 0x446   :  { %v1546_v2 = vadd.f32 %v1545_v46, %v1456_v53  ;;  %v4566_v46 = vld [vmem:[#allocation36_spill] sm:$0xff] }
 0x448   :  { %v1615_v58 = vmul.f32 %v1546_v2, %v4564_v47  ;;  %v1474_v2 = vpop.f32.mrf.mxu2 }
 0x44a   :  { %v1651_v29 = vadd.f32 %v3778_v19, %v1615_v58  ;;  %1587 = vmatmul.bf16.gmra.mxu3 %v4565_v20 }
 0x44c   :  { %v1683_v50 = vmax.f32 %v1651_v29, 0.0 }
 0x44d   :  { %v1548_v11 = vpop.f32.mrf.mxu3 }
 0x44e   :  { %v1711_v37 = vpack.c.bf16 %v1683_v50, %v1682_v4  ;;  %v1549_v3 = vadd.f32 %v1548_v11, %v1459_v16 }
 0x450   :  { %2891 = vmatmul.msk.bf16.gmra.mxu0 %vm1725_vm4, %v1711_v37  ;;  %v1616_v42 = vmul.f32 %v1549_v3, %v3331_v57  ;;  %v1476_v37 = vpop.f32.mrf.mxu2 }
 0x452   :  { %v1652_v62 = vadd.f32 %v3778_v19, %v1616_v42 }
 0x454   :  { %v1684_v17 = vmax.f32 %v1652_v62, 0.0 }
 0x455   :  { %v1550_v53 = vpop.f32.mrf.mxu3 }
 0x456   :  { %v1551_v12 = vadd.f32 %v1550_v53, %v1461_v1 }
 0x458   :  { %v1617_v27 = vmul.f32 %v1551_v12, %v3326_v52 }
 0x45a   :  { %v1653_v58 = vadd.f32 %v3778_v19, %v1617_v27  ;;  %1592 = vmatmul.bf16.gmra.mxu3 %v4566_v46  ;;  %v4567_v27 = vld [vmem:[#allocation38_spill] sm:$0xff] }
 0x45c   :  { %v1685_v29 = vmax.f32 %v1653_v58, 0.0 }
 0x45d   :  { %v1553_v4 = vpop.f32.mrf.mxu3 }
 0x45e   :  { %v1712_v11 = vpack.c.bf16 %v1685_v29, %v1684_v17  ;;  %v1554_v16 = vadd.f32 %v1553_v4, %v1464_v18  ;;  %v1479_v18 = vpop.f32.mrf.mxu2 }
 0x460   :  { %2892 = vmatmul.msk.bf16.gmra.mxu0 %vm1725_vm4, %v1712_v11  ;;  %v1618_v50 = vmul.f32 %v1554_v16, %v3248_v39 }
 0x462   :  { %v1654_v42 = vadd.f32 %v3778_v19, %v1618_v50 }
 0x464   :  { %v1686_v62 = vmax.f32 %v1654_v42, 0.0 }
 0x465   :  { %v1555_v1 = vpop.f32.mrf.mxu3 }
 0x466   :  { %v1556_v3 = vadd.f32 %v1555_v1, %v1466_v48  ;;  %v1481_v1 = vpop.f32.mrf.mxu2 }
 0x468   :  { %v1619_v53 = vmul.f32 %v1556_v3, %v3306_v31 }
 0x46a   :  { %v1655_v12 = vadd.f32 %v3778_v19, %v1619_v53  ;;  %1597 = vmatmul.bf16.gmra.mxu3 %v4567_v27  ;;  %v4568_v53 = vld [vmem:[#allocation40_spill] sm:$0xff] }
 0x46c   :  { %v1687_v58 = vmax.f32 %v1655_v12, 0.0 }
 0x46d   :  { %v1558_v46 = vpop.f32.mrf.mxu3 }
 0x46e   :  { %v1713_v17 = vpack.c.bf16 %v1687_v58, %v1686_v62  ;;  %v1559_v29 = vadd.f32 %v1558_v46, %v1469_v26  ;;  %v1484_v46 = vpop.f32.mrf.mxu2 }
 0x470   :  { %2893 = vmatmul.msk.bf16.gmra.mxu0 %vm1725_vm4, %v1713_v17  ;;  %v1620_v4 = vmul.f32 %v1559_v29, %v3232_v33 }
 0x472   :  { %v1656_v16 = vadd.f32 %v3778_v19, %v1620_v4 }
 0x474   :  { %v1688_v42 = vmax.f32 %v1656_v16, 0.0 }
 0x475   :  { %v1560_v11 = vpop.f32.mrf.mxu3 }
 0x476   :  { %v1561_v48 = vadd.f32 %v1560_v11, %v1471_v5  ;;  %v1486_v16 = vpop.f32.mrf.mxu2 }
 0x478   :  { %v1621_v50 = vmul.f32 %v1561_v48, %v3234_v34 }
 0x47a   :  { %v1657_v3 = vadd.f32 %v3778_v19, %v1621_v50  ;;  %1602 = vmatmul.bf16.gmra.mxu3 %v4568_v53 }
 0x47c   :  { %v1689_v12 = vmax.f32 %v1657_v3, 0.0 }
 0x47d   :  { %v1563_v62 = vpop.f32.mrf.mxu3 }
 0x47e   :  { %v1714_v58 = vpack.c.bf16 %v1689_v12, %v1688_v42  ;;  %v1564_v26 = vadd.f32 %v1563_v62, %v1474_v2 }
 0x480   :  { %2894 = vmatmul.msk.bf16.gmra.mxu0 %vm1725_vm4, %v1714_v58  ;;  %v1622_v17 = vmul.f32 %v1564_v26, %v3252_v41  ;;  %v1489_v58 = vpop.f32.mrf.mxu2 }
 0x482   :  { %v1658_v4 = vadd.f32 %v3778_v19, %v1622_v17 }
 0x484   :  { %v1690_v50 = vmax.f32 %v1658_v4, 0.0 }
 0x485   :  { %v1565_v5 = vpop.f32.mrf.mxu3 }
 0x486   :  { %v1566_v29 = vadd.f32 %v1565_v5, %v1476_v37 }
 0x488   :  { %v1623_v11 = vmul.f32 %v1566_v29, %v3268_v59 }
 0x48a   :  { %v1659_v48 = vadd.f32 %v3778_v19, %v1623_v11 }
 0x48c   :  { %v1691_v53 = vmax.f32 %v1659_v48, 0.0 }
 0x48d   :  { %v1568_v3 = vpop.f32.mrf.mxu3 }
 0x48e   :  { %v1715_v27 = vpack.c.bf16 %v1691_v53, %v1690_v50  ;;  %v1569_v42 = vadd.f32 %v1568_v3, %v1479_v18 }
 0x490   :  { %2895 = vmatmul.msk.bf16.gmra.mxu0 %vm1725_vm4, %v1715_v27  ;;  %v1624_v2 = vmul.f32 %v1569_v42, %v3435_v54  ;;  %v1491_v27 = vpop.f32.mrf.mxu2 }
 0x492   :  { %v1660_v37 = vadd.f32 %v3778_v19, %v1624_v2 }
 0x494   :  { %v1692_v5 = vmax.f32 %v1660_v37, 0.0 }
 0x495   :  { %v1570_v12 = vpop.f32.mrf.mxu3 }
 0x496   :  { %v1571_v62 = vadd.f32 %v1570_v12, %v1481_v1 }
 0x498   :  { %v1625_v26 = vmul.f32 %v1571_v62, %v3429_v51 }
 0x49a   :  { %v1661_v17 = vadd.f32 %v3778_v19, %v1625_v26  ;;  %v1494_v26 = vpop.f32.mrf.mxu2 }
 0x49c   :  { %v1693_v29 = vmax.f32 %v1661_v17, 0.0 }
 0x49d   :  { %v1573_v4 = vpop.f32.mrf.mxu3  ;;  %v1787_v11 = vpop.f32.mrf.mxu0 }
 0x49e   :  { %v1716_v48 = vpack.c.bf16 %v1693_v29, %v1692_v5  ;;  %v1574_v53 = vadd.f32 %v1573_v4, %v1484_v46  ;;  %v3834_v3 = vmul.f32 %v1787_v11, %v4553_v6 }
 0x4a0   :  { %2896 = vmatmul.msk.bf16.gmra.mxu0 %vm1725_vm4, %v1716_v48  ;;  %v1626_v18 = vmul.f32 %v1574_v53, %v3388_v28 }
 0x4a2   :  { %v1662_v12 = vadd.f32 %v3778_v19, %v1626_v18  ;;  %v1496_v53 = vpop.f32.mrf.mxu2 }
 0x4a4   :  { %v1694_v17 = vmax.f32 %v1662_v12, 0.0 }
 0x4a5   :  { %v1575_v50 = vpop.f32.mrf.mxu3  ;;  %v1789_v1 = vpop.f32.mrf.mxu0 }
 0x4a6   :  { %v1576_v42 = vadd.f32 %v1575_v50, %v1486_v16  ;;  %v3837_v2 = vmul.f32 %v1789_v1, %v4554_v9 }
 0x4a8   :  { %v1627_v62 = vmul.f32 %v1576_v42, %v3421_v24 }
 0x4aa   :  { %v1663_v37 = vadd.f32 %v3778_v19, %v1627_v62 }
 0x4ac   :  { %v1695_v5 = vmax.f32 %v1663_v37, 0.0 }
 0x4ad   :  { %v1578_v29 = vpop.f32.mrf.mxu3  ;;  %v1792_v4 = vpop.f32.mrf.mxu0 }
 0x4ae   :  { %v1717_v11 = vpack.c.bf16 %v1695_v5, %v1694_v17  ;;  %v1579_v48 = vadd.f32 %v1578_v29, %v1489_v58  ;;  %v3847_v1 = vmul.f32 %v1792_v4, %v4557_v23  ;;  %v1499_v4 = vpop.f32.mrf.mxu2 }
 0x4b0   :  { %2897 = vmatmul.msk.bf16.gmra.mxu0 %vm1725_vm4, %v1717_v11  ;;  %v1628_v16 = vmul.f32 %v1579_v48, %v3380_v14 }
 0x4b2   :  { %v1664_v12 = vadd.f32 %v3778_v19, %v1628_v16 }
 0x4b4   :  { %v1696_v5 = vmax.f32 %v1664_v12, 0.0 }
 0x4b5   :  { %v1580_v18 = vpop.f32.mrf.mxu3  ;;  %v1794_v50 = vpop.f32.mrf.mxu0 }
 0x4b6   :  { %v1581_v42 = vadd.f32 %v1580_v18, %v1491_v27  ;;  %v3850_v62 = vmul.f32 %v1794_v50, %v4558_v8 }
 0x4b8   :  { %v1629_v37 = vmul.f32 %v1581_v42, %v3371_v55 }
 0x4ba   :  { %v1665_v17 = vadd.f32 %v3778_v19, %v1629_v37 }
 0x4bc   :  { %v1697_v29 = vmax.f32 %v1665_v17, 0.0  ;;  %v1501_v17 = vpop.f32.mrf.mxu2 }
 0x4bd   :  { %v1583_v11 = vpop.f32.mrf.mxu3  ;;  %v1797_v48 = vpop.f32.mrf.mxu0 }
 0x4be   :  { %v1718_v46 = vpack.c.bf16 %v1697_v29, %v1696_v5  ;;  %v1584_v20 = vadd.f32 %v1583_v11, %v1494_v26  ;;  %v3860_v50 = vmul.f32 %v1797_v48, %v4560_v43 }
 0x4c0   :  { %2898 = vmatmul.msk.bf16.gmra.mxu0 %vm1725_vm4, %v1718_v46  ;;  %v1630_v27 = vmul.f32 %v1584_v20, %v3368_v49 }
 0x4c2   :  { %v1666_v12 = vadd.f32 %v3778_v19, %v1630_v27 }
 0x4c4   :  { %v1698_v20 = vmax.f32 %v1666_v12, 0.0 }
 0x4c5   :  { %v1585_v18 = vpop.f32.mrf.mxu3  ;;  %v1799_v16 = vpop.f32.mrf.mxu0 }
 0x4c6   :  { %v1586_v42 = vadd.f32 %v1585_v18, %v1496_v53  ;;  %v3863_v58 = vmul.f32 %v1799_v16, %v4561_v60  ;;  %v1504_v53 = vpop.f32.mrf.mxu2 }
 0x4c8   :  { %v1631_v37 = vmul.f32 %v1586_v42, %v3363_v44 }
 0x4ca   :  { %v1667_v46 = vadd.f32 %v3778_v19, %v1631_v37 }
 0x4cc   :  { %v1699_v5 = vmax.f32 %v1667_v46, 0.0 }
 0x4cd   :  { %v1588_v29 = vpop.f32.mrf.mxu3  ;;  %v1802_v11 = vpop.f32.mrf.mxu0 }
 0x4ce   :  { %v1719_v48 = vpack.c.bf16 %v1699_v5, %v1698_v20  ;;  %v1589_v43 = vadd.f32 %v1588_v29, %v1499_v4  ;;  %v3873_v42 = vmul.f32 %v1802_v11, %v4563_v36  ;;  %v1506_v5 = vpop.f32.mrf.mxu2 }
 0x4d0   :  { %2899 = vmatmul.msk.bf16.gmra.mxu0 %vm1725_vm4, %v1719_v48  ;;  %v1632_v18 = vmul.f32 %v1589_v43, %v3296_v22 }
 0x4d2   :  { %v1668_v12 = vadd.f32 %v3778_v19, %v1632_v18 }
 0x4d4   :  { %v1700_v20 = vmax.f32 %v1668_v12, 0.0 }
 0x4d5   :  { %v1590_v27 = vpop.f32.mrf.mxu3  ;;  %v1804_v16 = vpop.f32.mrf.mxu0 }
 0x4d6   :  { %v1591_v60 = vadd.f32 %v1590_v27, %v1501_v17  ;;  %v3876_v26 = vmul.f32 %v1804_v16, %v4564_v47  ;;  %v1509_v16 = vpop.f32.mrf.mxu2 }
 0x4d8   :  { %v1633_v37 = vmul.f32 %v1591_v60, %v3345_v21 }
 0x4da   :  { %v1669_v46 = vadd.f32 %v3778_v19, %v1633_v37 }
 0x4dc   :  { %v1701_v43 = vmax.f32 %v1669_v46, 0.0 }
 0x4dd   :  { %v1593_v29 = vpop.f32.mrf.mxu3  ;;  %v1807_v48 = vpop.f32.mrf.mxu0 }
 0x4de   :  { %v1720_v11 = vpack.c.bf16 %v1701_v43, %v1700_v20  ;;  %v1594_v36 = vadd.f32 %v1593_v29, %v1504_v53  ;;  %v1511_v53 = vpop.f32.mrf.mxu2 }
 0x4e0   :  { %2900 = vmatmul.msk.bf16.gmra.mxu0 %vm1725_vm4, %v1720_v11  ;;  %v1634_v17 = vmul.f32 %v1594_v36, %v3304_v30 }
 0x4e2   :  { %v1670_v47 = vadd.f32 %v3778_v19, %v1634_v17 }
 0x4e4   :  { %v1702_v37 = vmax.f32 %v1670_v47, 0.0 }
 0x4e5   :  { %v1595_v27 = vpop.f32.mrf.mxu3  ;;  %v1809_v18 = vpop.f32.mrf.mxu0 }
 0x4e6   :  { %v1596_v60 = vadd.f32 %v1595_v27, %v1506_v5 }
 0x4e8   :  { %v1635_v4 = vmul.f32 %v1596_v60, %v3272_v63  ;;  %v1514_v60 = vpop.f32.mrf.mxu2 }
 0x4ea   :  { %v1671_v12 = vadd.f32 %v3778_v19, %v1635_v4 }
 0x4ec   :  { %v1703_v46 = vmax.f32 %v1671_v12, 0.0 }
 0x4ed   :  { %v1598_v8 = vpop.f32.mrf.mxu3  ;;  %v1812_v23 = vpop.f32.mrf.mxu0 }
 0x4ee   :  { %v1721_v20 = vpack.c.bf16 %v1703_v46, %v1702_v37  ;;  %v1599_v43 = vadd.f32 %v1598_v8, %v1509_v16 }
 0x4f0   :  { %2901 = vmatmul.msk.bf16.gmra.mxu0 %vm1725_vm4, %v1721_v20  ;;  %v1636_v36 = vmul.f32 %v1599_v43, %v3292_v15  ;;  %v1516_v16 = vpop.f32.mrf.mxu2 }
 0x4f2   :  { %v1672_v17 = vadd.f32 %v3778_v19, %v1636_v36 }
 0x4f4   :  { %v1704_v4 = vmax.f32 %v1672_v17, 0.0 }
 0x4f5   :  { %v1600_v29 = vpop.f32.mrf.mxu3  ;;  %v1814_v11 = vpop.f32.mrf.mxu0 }
 0x4f6   :  { %v1601_v5 = vadd.f32 %v1600_v29, %v1511_v53 }
 0x4f8   :  { %v1637_v27 = vmul.f32 %v1601_v5, %v3290_v13 }
 0x4fa   :  { %v1673_v47 = vadd.f32 %v3778_v19, %v1637_v27 }
 0x4fc   :  { %v1705_v12 = vmax.f32 %v1673_v47, 0.0 }
 0x4fd   :  { %v1603_v9 = vpop.f32.mrf.mxu3  ;;  %v1817_v37 = vpop.f32.mrf.mxu0 }
 0x4fe   :  { %v1722_v46 = vpack.c.bf16 %v1705_v12, %v1704_v4  ;;  %v1604_v8 = vadd.f32 %v1603_v9, %v1514_v60 }
 0x500   :  { %2902 = vmatmul.msk.bf16.gmra.mxu0 %vm1725_vm4, %v1722_v46  ;;  %v1638_v20 = vmul.f32 %v1604_v8, %v3250_v40  ;;  %v1879_v8 = vmul.f32 %v1817_v37, %v3232_v33  ;;  %v4569_v37 = vpack.c.bf16 %v3876_v26, %v3873_v42  ;;  %v4572_v26 = vpack.c.bf16 %v3837_v2, %v3834_v3 }
 0x502   :  { %v1674_v36 = vadd.f32 %v3778_v19, %v1638_v20 }
 0x504   :  { %v1706_v17 = vmax.f32 %v1674_v36, 0.0 }
 0x505   :  { %v1605_v43 = vpop.f32.mrf.mxu3  ;;  %v1819_v53 = vpop.f32.mrf.mxu0 }
 0x506   :  { %v1606_v29 = vadd.f32 %v1605_v43, %v1516_v16  ;;  %v1880_v12 = vmul.f32 %v1819_v53, %v3234_v34  ;;  %v1878_v16 = vmul.f32 %v1814_v11, %v3306_v31  ;;  %v1877_v43 = vmul.f32 %v1812_v23, %v3248_v39  ;;  %v2531_v23 = vld [vmem:[%s4406_s9] sm:$0x3] }
 0x508   :  { %v1639_v5 = vmul.f32 %v1606_v29, %v3266_v56  ;;  %v1904_v29 = vpack.c.bf16 %v1878_v16, %v1877_v43 }
 0x50a   :  { %v1675_v27 = vadd.f32 %v3778_v19, %v1639_v5  ;;  %v1905_v19 = vpack.c.bf16 %v1880_v12, %v1879_v8  ;;  %v4570_v5 = vpack.c.bf16 %v3863_v58, %v3860_v50 }
 0x50c   :  { %v1707_v47 = vmax.f32 %v1675_v27, 0.0 }
 0x50d   :  { %v1822_v6 = vpop.f32.mrf.mxu0 }
 0x50e   :  { %v1723_v10 = vpack.c.bf16 %v1707_v47, %v1706_v17  ;;  %v1881_v60 = vmul.f32 %v1822_v6, %v3252_v41  ;;  %v1875_v6 = vmul.f32 %v1807_v48, %v3331_v57  ;;  %v4571_v48 = vpack.c.bf16 %v3850_v62, %v3847_v1 }
 0x510   :  { %2903 = vmatmul.msk.bf16.gmra.mxu0 %vm1725_vm4, %v1723_v10  ;;  %v1876_v10 = vmul.f32 %v1809_v18, %v3326_v52  ;;  %v2585_v18 = vsel %vm1071_vm0, %v2531_v23, 0 }
 0x512   :  { %v1903_v36 = vpack.c.bf16 %v1876_v10, %v1875_v6 }
 0x515   :  { %v1824_v9 = vpop.f32.mrf.mxu0 }
 0x516   :  { %v1882_v4 = vmul.f32 %v1824_v9, %v3268_v59 }
 0x518   :  { %v1906_v46 = vpack.c.bf16 %v1882_v4, %v1881_v60 }
 0x51a   :  { %1915 = vmatpush.bf16.msrb.mxu1 %v1906_v46 }
 0x51d   :  { %v3904_v20 = vpop.f32.mrf.mxu0 }
 0x51e   :  { %1916 = vmatpush.bf16.msrb.mxu1 %v1905_v19 }
 0x522   :  { %1917 = vmatpush.bf16.msrb.mxu1 %v1904_v29 }
 0x525   :  { %v1829_v53 = vpop.f32.mrf.mxu0 }
 0x526   :  { %1918 = vmatpush.bf16.msrb.mxu1 %v1903_v36 }
 0x52a   :  { %1919 = vmatpush.bf16.msrb.mxu1 %v4569_v37 }
 0x52d   :  { %v1832_v11 = vpop.f32.mrf.mxu0 }
 0x52e   :  { %1920 = vmatpush.bf16.msrb.mxu1 %v4570_v5 }
 0x532   :  { %1921 = vmatpush.bf16.msrb.mxu1 %v4571_v48 }
 0x535   :  { %v1834_v27 = vpop.f32.mrf.mxu0 }
 0x536   :  { %1922 = vmatpush.bf16.msrb.mxu1 %v4572_v26 }
 0x539   :  { %1923 = vmatmul.bf16.vlgmr.msrb.gmra.mxu1 %v3427_v45 }
 0x53a   :  { %2594 = vmatpush.bf16.msra.mxu1 %v2585_v18 }
 0x53d   :  { %v1837_v58 = vpop.f32.mrf.mxu0 }
 0x545   :  { %v1839_v50 = vpop.f32.mrf.mxu0 }
 0x546   :  { %v1888_v18 = vmul.f32 %v1839_v50, %v3371_v55 }
 0x549   :  { %1928 = vmatmul.bf16.gmra.mxu1 %v3442_v25 }
 0x54d   :  { %v1842_v42 = vpop.f32.mrf.mxu0 }
 0x54e   :  { %v1889_v48 = vmul.f32 %v1842_v42, %v3368_v49  ;;  %v1883_v42 = vmul.f32 %v3904_v20, %v3435_v54  ;;  %v4581_v20 = vld [vmem:[#allocation19_spill] sm:$0xff] }
 0x555   :  { %v1844_v17 = vpop.f32.mrf.mxu0 }
 0x556   :  { %v1890_v5 = vmul.f32 %v1844_v17, %v3363_v44  ;;  %v1884_v17 = vmul.f32 %v1829_v53, %v3429_v51  ;;  %v4579_v53 = vld [vmem:[#allocation18_spill] sm:$0xff] }
 0x558   :  { %v1910_v26 = vpack.c.bf16 %v1890_v5, %v1889_v48  ;;  %v1907_v50 = vpack.c.bf16 %v1884_v17, %v1883_v42  ;;  %v4587_v5 = vld [vmem:[#allocation26_spill] sm:$0xff] }
 0x559   :  { %1933 = vmatmul.bf16.gmra.mxu1 %v3451_v0 }
 0x55d   :  { %v1847_v1 = vpop.f32.mrf.mxu0 }
 0x55e   :  { %v1891_v37 = vmul.f32 %v1847_v1, %v3296_v22  ;;  %v1885_v1 = vmul.f32 %v1832_v11, %v3388_v28  ;;  %v4578_v11 = vld [vmem:[#allocation29_spill] sm:$0xff] }
 0x565   :  { %v1849_v62 = vpop.f32.mrf.mxu0 }
 0x566   :  { %v1892_v6 = vmul.f32 %v1849_v62, %v3345_v21  ;;  %v1886_v62 = vmul.f32 %v1834_v27, %v3421_v24  ;;  %v4576_v27 = vld [vmem:[#allocation27_spill] sm:$0xff] }
 0x568   :  { %v1911_v23 = vpack.c.bf16 %v1892_v6, %v1891_v37 }
 0x569   :  { %1938 = vmatmul.bf16.gmra.mxu1 %v3460_v35 }
 0x56d   :  { %v1852_v47 = vpop.f32.mrf.mxu0 }
 0x56e   :  { %v1893_v29 = vmul.f32 %v1852_v47, %v3304_v30  ;;  %v1887_v47 = vmul.f32 %v1837_v58, %v3380_v14  ;;  %v4575_v58 = vld [vmem:[#allocation16_spill] sm:$0xff] }
 0x575   :  { %v1854_v9 = vpop.f32.mrf.mxu0 }
 0x576   :  { %v1894_v43 = vmul.f32 %v1854_v9, %v3272_v63  ;;  %v1909_v9 = vpack.c.bf16 %v1888_v18, %v1887_v47  ;;  %v4588_v18 = vld [vmem:[#allocation37_spill] sm:$0xff]  ;;  %v3969_v47 = vld [vmem:[%s4407_s8] ss:$0 sm:$0xff] }
 0x578   :  { %v1912_v36 = vpack.c.bf16 %v1894_v43, %v1893_v29  ;;  %v4584_v43 = vld [vmem:[#allocation33_spill] sm:$0xff]  ;;  %v4585_v29 = vld [vmem:[#allocation24_spill] sm:$0xff] }
 0x579   :  { %1943 = vmatmul.bf16.gmra.mxu1 %v3469_v7 }
 0x57d   :  { %v1857_v3 = vpop.f32.mrf.mxu0 }
 0x57e   :  { %v1895_v19 = vmul.f32 %v1857_v3, %v3292_v15  ;;  %v1908_v3 = vpack.c.bf16 %v1886_v62, %v1885_v1  ;;  %v4589_v62 = vld [vmem:[#allocation14_spill] sm:$0xff] }
 0x585   :  { %v1859_v2 = vpop.f32.mrf.mxu0 }
 0x586   :  { %v1896_v8 = vmul.f32 %v1859_v2, %v3290_v13  ;;  %v4573_v2 = vld [vmem:[#allocation15_spill] sm:$0xff] }
 0x588   :  { %v1913_v10 = vpack.c.bf16 %v1896_v8, %v1895_v19 }
 0x589   :  { %1948 = vmatmul.bf16.gmra.mxu1 %v3478_v61 }
 0x58d   :  { %v1862_v60 = vpop.f32.mrf.mxu0 }
 0x58e   :  { %v1897_v12 = vmul.f32 %v1862_v60, %v3250_v40  ;;  %v4574_v60 = vld [vmem:[#allocation25_spill] sm:$0xff] }
 0x595   :  { %v1864_v4 = vpop.f32.mrf.mxu0 }
 0x596   :  { %v1898_v46 = vmul.f32 %v1864_v4, %v3266_v56  ;;  %v4577_v4 = vld [vmem:[#allocation17_spill] sm:$0xff] }
 0x598   :  { %v1914_v16 = vpack.c.bf16 %v1898_v46, %v1897_v12  ;;  %v4580_v12 = vld [vmem:[#allocation31_spill] sm:$0xff]  ;;  %v4582_v46 = vld [vmem:[#allocation20_spill] sm:$0xff] }
 0x599   :  { %1953 = vmatmul.bf16.gmra.mxu1 %v3487_v38 }
 0x59a   :  { %2004 = vmatpush.bf16.msra.mxu2 %v1914_v16  ;;  %v4583_v16 = vld [vmem:[#allocation22_spill] sm:$0xff] }
 0x59e   :  { %2005 = vmatpush.bf16.msra.mxu2 %v1913_v10 }
 0x5a2   :  { %2006 = vmatpush.bf16.msra.mxu2 %v1912_v36  ;;  %v4586_v36 = vld [vmem:[#allocation35_spill] sm:$0xff] }
 0x5a6   :  { %2007 = vmatpush.bf16.msra.mxu2 %v1911_v23 }
 0x5a9   :  { %1958 = vmatmul.bf16.gmra.mxu1 %v3496_v32 }
 0x5aa   :  { %2008 = vmatpush.bf16.msra.mxu2 %v1910_v26 }
 0x5ae   :  { %2009 = vmatpush.bf16.msra.mxu2 %v1909_v9 }
 0x5b2   :  { %2010 = vmatpush.bf16.msra.mxu2 %v1908_v3 }
 0x5b6   :  { %2011 = vmatpush.bf16.msra.mxu2 %v1907_v50  ;;  %v1924_v8 = vpop.f32.mrf.mxu1 }
 0x5b9   :  { %2012 = vmatmul.bf16.vlgmr.msra.gmra.mxu2 %v4573_v2  ;;  %1963 = vmatmul.bf16.gmra.mxu1 %v4574_v60 }
 0x5be   :  { %v1926_v19 = vpop.f32.mrf.mxu1 }
 0x5c6   :  { %v1929_v10 = vpop.f32.mrf.mxu1 }
 0x5c9   :  { %2017 = vmatmul.bf16.gmra.mxu2 %v4575_v58  ;;  %1968 = vmatmul.bf16.gmra.mxu1 %v4576_v27  ;;  %v4599_v58 = vld [vmem:[#allocation8_spill] sm:$0xff] }
 0x5ce   :  { %v1931_v6 = vpop.f32.mrf.mxu1 }
 0x5d6   :  { %v1934_v37 = vpop.f32.mrf.mxu1 }
 0x5d9   :  { %2022 = vmatmul.bf16.gmra.mxu2 %v4577_v4  ;;  %1973 = vmatmul.bf16.gmra.mxu1 %v4578_v11 }
 0x5de   :  { %v1936_v48 = vpop.f32.mrf.mxu1 }
 0x5e6   :  { %v1939_v3 = vpop.f32.mrf.mxu1 }
 0x5e9   :  { %2027 = vmatmul.bf16.gmra.mxu2 %v4579_v53  ;;  %1978 = vmatmul.bf16.gmra.mxu1 %v4580_v12  ;;  %v4593_v53 = vld [vmem:[#allocation12_spill] sm:$0xff] }
 0x5f9   :  { %2032 = vmatmul.bf16.gmra.mxu2 %v4581_v20  ;;  %1983 = vmatmul.bf16.gmra.mxu1 %v4584_v43  ;;  %v1941_v43 = vpop.f32.mrf.mxu1 }
 0x609   :  { %2037 = vmatmul.bf16.gmra.mxu2 %v4582_v46  ;;  %1988 = vmatmul.bf16.gmra.mxu1 %v4586_v36  ;;  %v4592_v46 = vld [vmem:[#allocation39_spill] sm:$0xff] }
 0x619   :  { %2042 = vmatmul.bf16.gmra.mxu2 %v4583_v16  ;;  %1993 = vmatmul.bf16.gmra.mxu1 %v4588_v18  ;;  %v4591_v18 = vld [vmem:[#allocation28_spill] sm:$0xff] }
 0x629   :  { %2047 = vmatmul.bf16.gmra.mxu2 %v4585_v29  ;;  %v4590_v29 = vld [vmem:[#allocation13_spill] sm:$0xff]  ;;  %1998 = vmatmul.bf16.gmra.mxu1 %v4592_v46 }
 0x639   :  { %2052 = vmatmul.bf16.gmra.mxu2 %v4587_v5 }
 0x63c   :  { %v2013_v23 = vpop.f32.mrf.mxu2 }
 0x63d   :  { %v2014_v26 = vadd.f32 %v2013_v23, %v1924_v8 }
 0x63f   :  { %v2093_v9 = vmul.f32 %v2014_v26, %v4589_v62 }
 0x641   :  { %v2129_v1 = vadd.f32 %v3969_v47, %v2093_v9 }
 0x643   :  { %v2161_v42 = vmax.f32 %v2129_v1, 0.0 }
 0x644   :  { %v2015_v17 = vpop.f32.mrf.mxu2 }
 0x645   :  { %v2016_v50 = vadd.f32 %v2015_v17, %v1926_v19  ;;  %v2193_v36 = vpack.c.bf16 %v2161_v42, %v2161_v42  ;;  %v1944_v42 = vpop.f32.mrf.mxu1 }
 0x647   :  { %v2094_v5 = vmul.f32 %v2016_v50, %v4590_v29  ;;  %v2225_v20 = vunpack.c.l.bf16 %v2193_v36 }
 0x649   :  { %v2130_v16 = vadd.f32 %v3969_v47, %v2094_v5  ;;  %2057 = vmatmul.bf16.gmra.mxu2 %v4591_v18  ;;  %v3980_v1 = vmul.f32 %v2225_v20, %v4589_v62 }
 0x64b   :  { %v2162_v8 = vmax.f32 %v2130_v16, 0.0  ;;  %v4596_v16 = vld [vmem:[#allocation7_spill] sm:$0xff] }
 0x64c   :  { %v2018_v23 = vpop.f32.mrf.mxu2 }
 0x64d   :  { %v2194_v26 = vpack.c.bf16 %v2162_v8, %v2162_v8  ;;  %v2019_v12 = vadd.f32 %v2018_v23, %v1929_v10  ;;  %v4594_v8 = vld [vmem:[#allocation11_spill] sm:$0xff]  ;;  %v3990_v18 = vpop.f32.mrf.mxu1 }
 0x64f   :  { %v2226_v9 = vunpack.c.l.bf16 %v2194_v26  ;;  %v2095_v11 = vmul.f32 %v2019_v12, %v4593_v53  ;;  %v4595_v26 = vld [vmem:[#allocation30_spill] sm:$0xff] }
 0x651   :  { %v2131_v19 = vadd.f32 %v3969_v47, %v2095_v11  ;;  %v3983_v5 = vmul.f32 %v2226_v9, %v4590_v29 }
 0x653   :  { %v2163_v50 = vmax.f32 %v2131_v19, 0.0 }
 0x654   :  { %v2020_v17 = vpop.f32.mrf.mxu2 }
 0x655   :  { %v2021_v36 = vadd.f32 %v2020_v17, %v1931_v6  ;;  %v2195_v23 = vpack.c.bf16 %v2163_v50, %v2163_v50 }
 0x657   :  { %v2096_v10 = vmul.f32 %v2021_v36, %v4594_v8  ;;  %v2227_v9 = vunpack.c.l.bf16 %v2195_v23 }
 0x659   :  { %v2132_v12 = vadd.f32 %v3969_v47, %v2096_v10  ;;  %2062 = vmatmul.bf16.gmra.mxu2 %v4595_v26  ;;  %v3995_v6 = vmul.f32 %v2227_v9, %v4593_v53  ;;  %v1949_v10 = vpop.f32.mrf.mxu1 }
 0x65b   :  { %v2164_v11 = vmax.f32 %v2132_v12, 0.0 }
 0x65c   :  { %v2023_v20 = vpop.f32.mrf.mxu2 }
 0x65d   :  { %v2196_v46 = vpack.c.bf16 %v2164_v11, %v2164_v11  ;;  %v2024_v29 = vadd.f32 %v2023_v20, %v1934_v37  ;;  %v4597_v11 = vld [vmem:[#allocation10_spill] sm:$0xff]  ;;  %v4598_v20 = vld [vmem:[#allocation32_spill] sm:$0xff] }
 0x65f   :  { %v2228_v62 = vunpack.c.l.bf16 %v2196_v46  ;;  %v2097_v4 = vmul.f32 %v2024_v29, %v4596_v16 }
 0x661   :  { %v2133_v19 = vadd.f32 %v3969_v47, %v2097_v4  ;;  %v3998_v17 = vmul.f32 %v2228_v62, %v4594_v8  ;;  %v1951_v26 = vpop.f32.mrf.mxu1 }
 0x663   :  { %v2165_v12 = vmax.f32 %v2133_v19, 0.0 }
 0x664   :  { %v2025_v36 = vpop.f32.mrf.mxu2 }
 0x665   :  { %v2026_v23 = vadd.f32 %v2025_v36, %v1936_v48  ;;  %v2197_v46 = vpack.c.bf16 %v2165_v12, %v2165_v12 }
 0x667   :  { %v2098_v37 = vmul.f32 %v2026_v23, %v4597_v11  ;;  %v2229_v53 = vunpack.c.l.bf16 %v2197_v46 }
 0x669   :  { %v2134_v29 = vadd.f32 %v3969_v47, %v2098_v37  ;;  %2067 = vmatmul.bf16.gmra.mxu2 %v4598_v20  ;;  %v4008_v48 = vmul.f32 %v2229_v53, %v4596_v16  ;;  %v1954_v46 = vpop.f32.mrf.mxu1 }
 0x66b   :  { %v2166_v4 = vmax.f32 %v2134_v29, 0.0  ;;  %v4600_v29 = vld [vmem:[#allocation6_spill] sm:$0xff] }
 0x66c   :  { %v2028_v9 = vpop.f32.mrf.mxu2 }
 0x66d   :  { %v2198_v62 = vpack.c.bf16 %v2166_v4, %v2166_v4  ;;  %v2029_v8 = vadd.f32 %v2028_v9, %v1939_v3  ;;  %v4601_v9 = vld [vmem:[#allocation34_spill] sm:$0xff] }
 0x66f   :  { %v2230_v27 = vunpack.c.l.bf16 %v2198_v62  ;;  %v2099_v50 = vmul.f32 %v2029_v8, %v4599_v58 }
 0x671   :  { %v2135_v60 = vadd.f32 %v3969_v47, %v2099_v50  ;;  %v4011_v19 = vmul.f32 %v2230_v27, %v4597_v11  ;;  %v1956_v16 = vpop.f32.mrf.mxu1 }
 0x673   :  { %v2167_v23 = vmax.f32 %v2135_v60, 0.0 }
 0x674   :  { %v2030_v12 = vpop.f32.mrf.mxu2 }
 0x675   :  { %v2031_v37 = vadd.f32 %v2030_v12, %v1941_v43  ;;  %v2199_v4 = vpack.c.bf16 %v2167_v23, %v2167_v23  ;;  %v4602_v23 = vld [vmem:[#allocation36_spill] sm:$0xff] }
 0x677   :  { %v2100_v3 = vmul.f32 %v2031_v37, %v4600_v29  ;;  %v2231_v62 = vunpack.c.l.bf16 %v2199_v4 }
 0x679   :  { %v2136_v8 = vadd.f32 %v3969_v47, %v2100_v3  ;;  %2072 = vmatmul.bf16.gmra.mxu2 %v4601_v9  ;;  %v4019_v36 = vmul.f32 %v2231_v62, %v4599_v58  ;;  %v1959_v37 = vpop.f32.mrf.mxu1  ;;  %v4604_v9 = vld [vmem:[#allocation40_spill] sm:$0xff] }
 0x67b   :  { %v2168_v50 = vmax.f32 %v2136_v8, 0.0 }
 0x67c   :  { %v2033_v53 = vpop.f32.mrf.mxu2 }
 0x67d   :  { %v2200_v20 = vpack.c.bf16 %v2168_v50, %v2168_v50  ;;  %v2034_v27 = vadd.f32 %v2033_v53, %v1944_v42  ;;  %v4603_v50 = vld [vmem:[#allocation38_spill] sm:$0xff] }
 0x67f   :  { %v2232_v11 = vunpack.c.l.bf16 %v2200_v20 }
 0x681   :  { %v4022_v60 = vmul.f32 %v2232_v11, %v4600_v29  ;;  %v1961_v4 = vpop.f32.mrf.mxu1 }
 0x684   :  { %v2035_v12 = vpop.f32.mrf.mxu2 }
 0x685   :  { %v2036_v56 = vadd.f32 %v2035_v12, %v3990_v18  ;;  %v2101_v12 = vmul.f32 %v2034_v27, %v3331_v57 }
 0x689   :  { %2077 = vmatmul.bf16.gmra.mxu2 %v4602_v23  ;;  %v1964_v20 = vpop.f32.mrf.mxu1 }
 0x68c   :  { %v2038_v3 = vpop.f32.mrf.mxu2 }
 0x68d   :  { %v2039_v38 = vadd.f32 %v2038_v3, %v1949_v10  ;;  %v2102_v10 = vmul.f32 %v2036_v56, %v3326_v52  ;;  %v2137_v56 = vadd.f32 %v3969_v47, %v2101_v12 }
 0x68f   :  { %v2169_v30 = vmax.f32 %v2137_v56, 0.0 }
 0x691   :  { %v1966_v62 = vpop.f32.mrf.mxu1 }
 0x694   :  { %v2040_v8 = vpop.f32.mrf.mxu2 }
 0x695   :  { %v2041_v43 = vadd.f32 %v2040_v8, %v1951_v26  ;;  %v2138_v8 = vadd.f32 %v3969_v47, %v2102_v10 }
 0x699   :  { %2082 = vmatmul.bf16.gmra.mxu2 %v4603_v50  ;;  %v4034_v21 = vpop.f32.mrf.mxu1 }
 0x69c   :  { %v2043_v42 = vpop.f32.mrf.mxu2 }
 0x69d   :  { %v2044_v58 = vadd.f32 %v2043_v42, %v1954_v46  ;;  %v2103_v46 = vmul.f32 %v2039_v38, %v3248_v39 }
 0x69f   :  { %v2105_v22 = vmul.f32 %v2044_v58, %v3232_v33 }
 0x6a4   :  { %v2045_v53 = vpop.f32.mrf.mxu2 }
 0x6a5   :  { %v2046_v11 = vadd.f32 %v2045_v53, %v1956_v16  ;;  %v1971_v53 = vpop.f32.mrf.mxu1 }
 0x6a7   :  { %v2106_v32 = vmul.f32 %v2046_v11, %v3234_v34 }
 0x6a9   :  { %2087 = vmatmul.bf16.gmra.mxu2 %v4604_v9  ;;  %v2104_v9 = vmul.f32 %v2041_v43, %v3306_v31  ;;  %v2142_v16 = vadd.f32 %v3969_v47, %v2106_v32  ;;  %v2139_v43 = vadd.f32 %v3969_v47, %v2103_v46 }
 0x6ab   :  { %v2140_v58 = vadd.f32 %v3969_v47, %v2104_v9  ;;  %v2171_v42 = vmax.f32 %v2139_v43, 0.0 }
 0x6ac   :  { %v2048_v29 = vpop.f32.mrf.mxu2 }
 0x6ad   :  { %v2049_v2 = vadd.f32 %v2048_v29, %v1959_v37  ;;  %v2141_v29 = vadd.f32 %v3969_v47, %v2105_v22  ;;  %v2172_v22 = vmax.f32 %v2140_v58, 0.0  ;;  %v2203_v10 = vpack.c.bf16 %v2171_v42, %v2171_v42  ;;  %v1974_v42 = vpop.f32.mrf.mxu1 }
 0x6af   :  { %v2107_v23 = vmul.f32 %v2049_v2, %v3252_v41  ;;  %v2173_v3 = vmax.f32 %v2141_v29, 0.0  ;;  %v2204_v46 = vpack.c.bf16 %v2172_v22, %v2172_v22 }
 0x6b1   :  { %v2143_v50 = vadd.f32 %v3969_v47, %v2107_v23  ;;  %v2174_v23 = vmax.f32 %v2142_v16, 0.0  ;;  %v2205_v11 = vpack.c.bf16 %v2173_v3, %v2173_v3  ;;  %v2236_v3 = vunpack.c.l.bf16 %v2204_v46 }
 0x6b3   :  { %v2175_v37 = vmax.f32 %v2143_v50, 0.0  ;;  %v2206_v50 = vpack.c.bf16 %v2174_v23, %v2174_v23  ;;  %v2237_v58 = vunpack.c.l.bf16 %v2205_v11 }
 0x6b4   :  { %v2050_v26 = vpop.f32.mrf.mxu2 }
 0x6b5   :  { %v2051_v2 = vadd.f32 %v2050_v26, %v1961_v4  ;;  %v2207_v32 = vpack.c.bf16 %v2175_v37, %v2175_v37  ;;  %v2238_v29 = vunpack.c.l.bf16 %v2206_v50  ;;  %v2235_v50 = vunpack.c.l.bf16 %v2203_v10 }
 0x6b6   :  { %v2269_v56 = vmul.f32 %v2237_v58, %v3232_v33 }
 0x6b7   :  { %v2108_v18 = vmul.f32 %v2051_v2, %v3268_v59  ;;  %v2239_v16 = vunpack.c.l.bf16 %v2207_v32  ;;  %v2170_v2 = vmax.f32 %v2138_v8, 0.0  ;;  %v2201_v8 = vpack.c.bf16 %v2169_v30, %v2169_v30 }
 0x6b8   :  { %v2267_v30 = vmul.f32 %v2235_v50, %v3248_v39 }
 0x6b9   :  { %v2144_v38 = vadd.f32 %v3969_v47, %v2108_v18  ;;  %v2271_v23 = vmul.f32 %v2239_v16, %v3252_v41 }
 0x6bb   :  { %v2176_v4 = vmax.f32 %v2144_v38, 0.0  ;;  %v2202_v38 = vpack.c.bf16 %v2170_v2, %v2170_v2  ;;  %v2233_v2 = vunpack.c.l.bf16 %v2201_v8 }
 0x6bc   :  { %v2053_v9 = vpop.f32.mrf.mxu2 }
 0x6bd   :  { %v2208_v26 = vpack.c.bf16 %v2176_v4, %v2176_v4  ;;  %v2054_v27 = vadd.f32 %v2053_v9, %v1964_v20  ;;  %v2270_v20 = vmul.f32 %v2238_v29, %v3234_v34  ;;  %v2234_v11 = vunpack.c.l.bf16 %v2202_v38 }
 0x6bf   :  { %v2240_v37 = vunpack.c.l.bf16 %v2208_v26  ;;  %v2109_v18 = vmul.f32 %v2054_v27, %v3435_v54  ;;  %v2295_v26 = vpack.c.bf16 %v2270_v20, %v2269_v56  ;;  %v2268_v27 = vmul.f32 %v2236_v3, %v3306_v31  ;;  %v1976_v20 = vpop.f32.mrf.mxu1 }
 0x6c1   :  { %v2272_v12 = vmul.f32 %v2240_v37, %v3268_v59  ;;  %v2145_v43 = vadd.f32 %v3969_v47, %v2109_v18  ;;  %v2294_v18 = vpack.c.bf16 %v2268_v27, %v2267_v30 }
 0x6c3   :  { %v2296_v32 = vpack.c.bf16 %v2272_v12, %v2271_v23  ;;  %v2177_v4 = vmax.f32 %v2145_v43, 0.0  ;;  %v2265_v43 = vmul.f32 %v2233_v2, %v3331_v57  ;;  %v4606_v2 = vpack.c.bf16 %v4011_v19, %v4008_v48 }
 0x6c4   :  { %v2055_v22 = vpop.f32.mrf.mxu2 }
 0x6c5   :  { %v2056_v9 = vadd.f32 %v2055_v22, %v1966_v62  ;;  %2305 = vmatpush.bf16.msra.mxu3 %v2296_v32  ;;  %v2209_v46 = vpack.c.bf16 %v2177_v4, %v2177_v4  ;;  %v2266_v62 = vmul.f32 %v2234_v11, %v3326_v52  ;;  %v4605_v11 = vpack.c.bf16 %v4022_v60, %v4019_v36 }
 0x6c7   :  { %v2110_v16 = vmul.f32 %v2056_v9, %v3429_v51  ;;  %v2241_v58 = vunpack.c.l.bf16 %v2209_v46  ;;  %v2293_v32 = vpack.c.bf16 %v2266_v62, %v2265_v43  ;;  %v1979_v46 = vpop.f32.mrf.mxu1 }
 0x6c9   :  { %v2146_v37 = vadd.f32 %v3969_v47, %v2110_v16  ;;  %2306 = vmatpush.bf16.msra.mxu3 %v2295_v26  ;;  %v4064_v22 = vmul.f32 %v2241_v58, %v3435_v54  ;;  %v4608_v58 = vpack.c.bf16 %v3983_v5, %v3980_v1 }
 0x6cb   :  { %v2178_v29 = vmax.f32 %v2146_v37, 0.0 }
 0x6cc   :  { %v2058_v10 = vpop.f32.mrf.mxu2 }
 0x6cd   :  { %v2210_v23 = vpack.c.bf16 %v2178_v29, %v2178_v29  ;;  %v2059_v12 = vadd.f32 %v2058_v10, %v4034_v21  ;;  %2307 = vmatpush.bf16.msra.mxu3 %v2294_v18 }
 0x6cf   :  { %v2242_v38 = vunpack.c.l.bf16 %v2210_v23  ;;  %v2111_v3 = vmul.f32 %v2059_v12, %v3388_v28 }
 0x6d1   :  { %v2147_v8 = vadd.f32 %v3969_v47, %v2111_v3  ;;  %2308 = vmatpush.bf16.msra.mxu3 %v2293_v32  ;;  %v4067_v50 = vmul.f32 %v2242_v38, %v3429_v51 }
 0x6d3   :  { %v2297_v21 = vpack.c.bf16 %v4067_v50, %v4064_v22  ;;  %v2179_v9 = vmax.f32 %v2147_v8, 0.0  ;;  %v4624_v22 = vld [vmem:[#allocation20_spill] sm:$0xff] }
 0x6d4   :  { %v2060_v4 = vpop.f32.mrf.mxu2 }
 0x6d5   :  { %v2061_v56 = vadd.f32 %v2060_v4, %v1971_v53  ;;  %2309 = vmatpush.bf16.msra.mxu3 %v4605_v11  ;;  %v2211_v26 = vpack.c.bf16 %v2179_v9, %v2179_v9  ;;  %v4607_v53 = vpack.c.bf16 %v3998_v17, %v3995_v6  ;;  %v1981_v17 = vpop.f32.mrf.mxu1 }
 0x6d7   :  { %v2112_v16 = vmul.f32 %v2061_v56, %v3421_v24  ;;  %v2243_v29 = vunpack.c.l.bf16 %v2211_v26 }
 0x6d9   :  { %v2148_v27 = vadd.f32 %v3969_v47, %v2112_v16  ;;  %2310 = vmatpush.bf16.msra.mxu3 %v4606_v2  ;;  %v4088_v48 = vmul.f32 %v2243_v29, %v3388_v28 }
 0x6db   :  { %v2180_v37 = vmax.f32 %v2148_v27, 0.0 }
 0x6dc   :  { %v2063_v30 = vpop.f32.mrf.mxu2 }
 0x6dd   :  { %v2212_v18 = vpack.c.bf16 %v2180_v37, %v2180_v37  ;;  %v2064_v62 = vadd.f32 %v2063_v30, %v1974_v42  ;;  %2311 = vmatpush.bf16.msra.mxu3 %v4607_v53  ;;  %v1984_v9 = vpop.f32.mrf.mxu1 }
 0x6df   :  { %v2244_v36 = vunpack.c.l.bf16 %v2212_v18  ;;  %v2113_v60 = vmul.f32 %v2064_v62, %v3380_v14 }
 0x6e1   :  { %v2149_v10 = vadd.f32 %v3969_v47, %v2113_v60  ;;  %2312 = vmatpush.bf16.msra.mxu3 %v4608_v58  ;;  %v4091_v19 = vmul.f32 %v2244_v36, %v3421_v24 }
 0x6e3   :  { %v2298_v42 = vpack.c.bf16 %v4091_v19, %v4088_v48  ;;  %v2181_v23 = vmax.f32 %v2149_v10, 0.0  ;;  %v4622_v48 = vld [vmem:[#allocation31_spill] sm:$0xff] }
 0x6e4   :  { %v2065_v6 = vpop.f32.mrf.mxu2  ;;  %2313 = vmatmul.bf16.vlgmr.msra.gmra.mxu3 %v3427_v45  ;;  %v4623_v19 = vld [vmem:[#allocation19_spill] sm:$0xff] }
 0x6e5   :  { %v2066_v12 = vadd.f32 %v2065_v6, %v1976_v20  ;;  %v2213_v38 = vpack.c.bf16 %v2181_v23, %v2181_v23  ;;  %v1986_v30 = vpop.f32.mrf.mxu1 }
 0x6e7   :  { %v2114_v43 = vmul.f32 %v2066_v12, %v3371_v55  ;;  %v2245_v32 = vunpack.c.l.bf16 %v2213_v38 }
 0x6e9   :  { %v2150_v1 = vadd.f32 %v3969_v47, %v2114_v43  ;;  %v4101_v45 = vmul.f32 %v2245_v32, %v3380_v14 }
 0x6eb   :  { %v2182_v5 = vmax.f32 %v2150_v1, 0.0 }
 0x6ec   :  { %v2068_v3 = vpop.f32.mrf.mxu2 }
 0x6ed   :  { %v2214_v8 = vpack.c.bf16 %v2182_v5, %v2182_v5  ;;  %v2069_v4 = vadd.f32 %v2068_v3, %v1979_v46 }
 0x6ef   :  { %v2246_v56 = vunpack.c.l.bf16 %v2214_v8  ;;  %v2115_v11 = vmul.f32 %v2069_v4, %v3368_v49 }
 0x6f1   :  { %v2151_v16 = vadd.f32 %v3969_v47, %v2115_v11  ;;  %v4104_v20 = vmul.f32 %v2246_v56, %v3371_v55 }
 0x6f3   :  { %v2299_v26 = vpack.c.bf16 %v4104_v20, %v4101_v45  ;;  %v2183_v2 = vmax.f32 %v2151_v16, 0.0  ;;  %v4620_v45 = vld [vmem:[#allocation29_spill] sm:$0xff]  ;;  %v4621_v20 = vld [vmem:[#allocation18_spill] sm:$0xff] }
 0x6f4   :  { %v2070_v27 = vpop.f32.mrf.mxu2  ;;  %2318 = vmatmul.bf16.gmra.mxu3 %v3442_v25  ;;  %v1989_v25 = vpop.f32.mrf.mxu1 }
 0x6f5   :  { %v2071_v46 = vadd.f32 %v2070_v27, %v1981_v17  ;;  %v2215_v29 = vpack.c.bf16 %v2183_v2, %v2183_v2 }
 0x6f7   :  { %v2116_v37 = vmul.f32 %v2071_v46, %v3363_v44  ;;  %v2247_v36 = vunpack.c.l.bf16 %v2215_v29 }
 0x6f9   :  { %v2152_v18 = vadd.f32 %v3969_v47, %v2116_v37  ;;  %v4112_v6 = vmul.f32 %v2247_v36, %v3368_v49  ;;  %v4609_v36 = vld [vmem:[#allocation5_spill] sm:$0xff] }
 0x6fb   :  { %v2184_v62 = vmax.f32 %v2152_v18, 0.0 }
 0x6fc   :  { %v2073_v53 = vpop.f32.mrf.mxu2  ;;  %v1991_v43 = vpop.f32.mrf.mxu1 }
 0x6fd   :  { %v2216_v60 = vpack.c.bf16 %v2184_v62, %v2184_v62  ;;  %v2074_v10 = vadd.f32 %v2073_v53, %v1984_v9 }
 0x6ff   :  { %v2248_v58 = vunpack.c.l.bf16 %v2216_v60 }
 0x701   :  { %v4115_v23 = vmul.f32 %v2248_v58, %v3363_v44 }
 0x703   :  { %v2300_v17 = vpack.c.bf16 %v4115_v23, %v4112_v6  ;;  %v4618_v6 = vld [vmem:[#allocation27_spill] sm:$0xff]  ;;  %v4619_v23 = vld [vmem:[#allocation17_spill] sm:$0xff] }
 0x704   :  { %v2075_v12 = vpop.f32.mrf.mxu2  ;;  %2323 = vmatmul.bf16.gmra.mxu3 %v3451_v0  ;;  %v1994_v5 = vpop.f32.mrf.mxu1 }
 0x705   :  { %v2076_v29 = vadd.f32 %v2075_v12, %v1986_v30  ;;  %v4611_v30 = vld [vmem:[#allocation3_spill] sm:$0xff] }
 0x70c   :  { %v2078_v38 = vpop.f32.mrf.mxu2  ;;  %v1996_v32 = vpop.f32.mrf.mxu1 }
 0x70d   :  { %v2079_v46 = vadd.f32 %v2078_v38, %v1989_v25  ;;  %v4610_v25 = vld [vmem:[#allocation9_spill] sm:$0xff] }
 0x70e   :  { %v2118_v38 = vmul.f32 %v2076_v29, %v4610_v25 }
 0x70f   :  { %v2119_v60 = vmul.f32 %v2079_v46, %v4609_v36 }
 0x714   :  { %v2080_v1 = vpop.f32.mrf.mxu2  ;;  %2328 = vmatmul.bf16.gmra.mxu3 %v3460_v35  ;;  %v1999_v4 = vpop.f32.mrf.mxu1 }
 0x715   :  { %v2081_v27 = vadd.f32 %v2080_v1, %v1991_v43 }
 0x717   :  { %v2120_v18 = vmul.f32 %v2081_v27, %v3272_v63 }
 0x71c   :  { %v2083_v3 = vpop.f32.mrf.mxu2  ;;  %v2001_v62 = vpop.f32.mrf.mxu1 }
 0x71d   :  { %v2084_v11 = vadd.f32 %v2083_v3, %v1994_v5  ;;  %v2156_v5 = vadd.f32 %v3969_v47, %v2120_v18 }
 0x71f   :  { %v2121_v37 = vmul.f32 %v2084_v11, %v3292_v15  ;;  %v2154_v11 = vadd.f32 %v3969_v47, %v2118_v38 }
 0x721   :  { %v2157_v58 = vadd.f32 %v3969_v47, %v2121_v37  ;;  %v2186_v18 = vmax.f32 %v2154_v11, 0.0 }
 0x723   :  { %v2218_v38 = vpack.c.bf16 %v2186_v18, %v2186_v18  ;;  %v4616_v18 = vld [vmem:[#allocation25_spill] sm:$0xff] }
 0x724   :  { %v2085_v8 = vpop.f32.mrf.mxu2  ;;  %2333 = vmatmul.bf16.gmra.mxu3 %v3469_v7 }
 0x725   :  { %v2086_v9 = vadd.f32 %v2085_v8, %v1996_v32  ;;  %v4612_v32 = vld [vmem:[#allocation4_spill] sm:$0xff] }
 0x726   :  { %v2117_v8 = vmul.f32 %v2074_v10, %v4612_v32 }
 0x727   :  { %v2122_v2 = vmul.f32 %v2086_v9, %v3290_v13  ;;  %v2189_v9 = vmax.f32 %v2157_v58, 0.0 }
 0x729   :  { %v2158_v7 = vadd.f32 %v3969_v47, %v2122_v2  ;;  %v2221_v37 = vpack.c.bf16 %v2189_v9, %v2189_v9 }
 0x72b   :  { %v2190_v3 = vmax.f32 %v2158_v7, 0.0  ;;  %v2253_v58 = vunpack.c.l.bf16 %v2221_v37 }
 0x72c   :  { %v2088_v56 = vpop.f32.mrf.mxu2 }
 0x72d   :  { %v2089_v16 = vadd.f32 %v2088_v56, %v1999_v4  ;;  %v2155_v4 = vadd.f32 %v3969_v47, %v2119_v60  ;;  %v2222_v27 = vpack.c.bf16 %v2190_v3, %v2190_v3  ;;  %v2285_v9 = vmul.f32 %v2253_v58, %v3292_v15 }
 0x72f   :  { %v2123_v0 = vmul.f32 %v2089_v16, %v3250_v40  ;;  %v2188_v16 = vmax.f32 %v2156_v5, 0.0  ;;  %v2187_v46 = vmax.f32 %v2155_v4, 0.0  ;;  %v2254_v10 = vunpack.c.l.bf16 %v2222_v27 }
 0x731   :  { %v2159_v35 = vadd.f32 %v3969_v47, %v2123_v0  ;;  %v2153_v0 = vadd.f32 %v3969_v47, %v2117_v8  ;;  %v2220_v7 = vpack.c.bf16 %v2188_v16, %v2188_v16  ;;  %v2219_v60 = vpack.c.bf16 %v2187_v46, %v2187_v46 }
 0x733   :  { %v2191_v43 = vmax.f32 %v2159_v35, 0.0  ;;  %v2252_v5 = vunpack.c.l.bf16 %v2220_v7  ;;  %v2251_v4 = vunpack.c.l.bf16 %v2219_v60  ;;  %v4617_v7 = vld [vmem:[#allocation16_spill] sm:$0xff] }
 0x734   :  { %v2090_v53 = vpop.f32.mrf.mxu2  ;;  %2338 = vmatmul.bf16.gmra.mxu3 %v3478_v61 }
 0x735   :  { %v2091_v1 = vadd.f32 %v2090_v53, %v2001_v62  ;;  %v2223_v56 = vpack.c.bf16 %v2191_v43, %v2191_v43  ;;  %v2185_v53 = vmax.f32 %v2153_v0, 0.0  ;;  %v2284_v11 = vmul.f32 %v2252_v5, %v3272_v63 }
 0x736   :  { %v2283_v27 = vmul.f32 %v2251_v4, %v4609_v36 }
 0x737   :  { %v2124_v12 = vmul.f32 %v2091_v1, %v4611_v30  ;;  %v2255_v35 = vunpack.c.l.bf16 %v2223_v56  ;;  %v2217_v8 = vpack.c.bf16 %v2185_v53, %v2185_v53  ;;  %v2250_v56 = vunpack.c.l.bf16 %v2218_v38  ;;  %v4628_v53 = vld [vmem:[#allocation24_spill] sm:$0xff]  ;;  %v4630_v38 = vld [vmem:[#allocation26_spill] sm:$0xff] }
 0x739   :  { %v2160_v61 = vadd.f32 %v3969_v47, %v2124_v12  ;;  %v2287_v43 = vmul.f32 %v2255_v35, %v3250_v40  ;;  %v2286_v47 = vmul.f32 %v2254_v10, %v3290_v13  ;;  %v4613_v12 = vld [vmem:[#allocation21_spill] sm:$0xff]  ;;  %v2249_v16 = vunpack.c.l.bf16 %v2217_v8  ;;  %v4614_v35 = vld [vmem:[#allocation23_spill] sm:$0xff]  ;;  %v4631_v8 = vld [vmem:[#allocation14_spill] sm:$0xff] }
 0x73a   :  { %v2282_v0 = vmul.f32 %v2250_v56, %v4610_v25 }
 0x73b   :  { %v2192_v2 = vmax.f32 %v2160_v61, 0.0  ;;  %v2303_v61 = vpack.c.bf16 %v2286_v47, %v2285_v9  ;;  %v2281_v46 = vmul.f32 %v2249_v16, %v4612_v32  ;;  %v4632_v9 = vld [vmem:[#allocation13_spill] sm:$0xff] }
 0x73d   :  { %v2224_v29 = vpack.c.bf16 %v2192_v2, %v2192_v2  ;;  %v2302_v2 = vpack.c.bf16 %v2284_v11, %v2283_v27  ;;  %v2301_v37 = vpack.c.bf16 %v2282_v0, %v2281_v46  ;;  %v4633_v27 = vld [vmem:[#allocation39_spill] sm:$0xff] }
 0x73f   :  { %v2256_v62 = vunpack.c.l.bf16 %v2224_v29  ;;  %v4615_v29 = vld [vmem:[#allocation15_spill] sm:$0xff] }
 0x741   :  { %v2288_v1 = vmul.f32 %v2256_v62, %v4611_v30  ;;  %v4627_v62 = vld [vmem:[#allocation35_spill] sm:$0xff] }
 0x743   :  { %v2304_v3 = vpack.c.bf16 %v2288_v1, %v2287_v43  ;;  %v4629_v1 = vld [vmem:[#allocation37_spill] sm:$0xff] }
 0x744   :  { %2343 = vmatmul.bf16.gmra.mxu3 %v4613_v12 }
 0x745   :  { %2394 = vmatpush.bf16.msra.mxu0 %v2304_v3 }
 0x749   :  { %2395 = vmatpush.bf16.msra.mxu0 %v2303_v61 }
 0x74d   :  { %2396 = vmatpush.bf16.msra.mxu0 %v2302_v2  ;;  %v4634_v2 = vld [vmem:[#allocation28_spill] sm:$0xff] }
 0x751   :  { %2397 = vmatpush.bf16.msra.mxu0 %v2301_v37 }
 0x754   :  { %2348 = vmatmul.bf16.gmra.mxu3 %v4614_v35 }
 0x755   :  { %2398 = vmatpush.bf16.msra.mxu0 %v2300_v17 }
 0x759   :  { %2399 = vmatpush.bf16.msra.mxu0 %v2299_v26  ;;  %v4626_v26 = vld [vmem:[#allocation22_spill] sm:$0xff] }
 0x75d   :  { %2400 = vmatpush.bf16.msra.mxu0 %v2298_v42  ;;  %v4625_v42 = vld [vmem:[#allocation33_spill] sm:$0xff] }
 0x761   :  { %2401 = vmatpush.bf16.msra.mxu0 %v2297_v21 }
 0x764   :  { %2402 = vmatmul.bf16.vlgmr.msra.gmra.mxu0 %v4615_v29  ;;  %2353 = vmatmul.bf16.gmra.mxu3 %v4616_v18  ;;  %v4635_v29 = vld [vmem:[#allocation12_spill] sm:$0xff] }
 0x767   :  { %v2314_v50 = vpop.f32.mrf.mxu3 }
 0x76f   :  { %v2316_v21 = vpop.f32.mrf.mxu3 }
 0x774   :  { %2407 = vmatmul.bf16.gmra.mxu0 %v4617_v7  ;;  %2358 = vmatmul.bf16.gmra.mxu3 %v4618_v6  ;;  %v4636_v7 = vld [vmem:[#allocation11_spill] sm:$0xff] }
 0x777   :  { %v2319_v17 = vpop.f32.mrf.mxu3 }
 0x77f   :  { %v2321_v10 = vpop.f32.mrf.mxu3 }
 0x784   :  { %2412 = vmatmul.bf16.gmra.mxu0 %v4619_v23  ;;  %2363 = vmatmul.bf16.gmra.mxu3 %v4620_v45 }
 0x787   :  { %v2324_v60 = vpop.f32.mrf.mxu3 }
 0x78f   :  { %v2326_v43 = vpop.f32.mrf.mxu3 }
 0x794   :  { %2417 = vmatmul.bf16.gmra.mxu0 %v4621_v20  ;;  %2368 = vmatmul.bf16.gmra.mxu3 %v4622_v48  ;;  %v4637_v48 = vld [vmem:[#allocation30_spill] sm:$0xff] }
 0x797   :  { %v2329_v47 = vpop.f32.mrf.mxu3 }
 0x79f   :  { %v2331_v16 = vpop.f32.mrf.mxu3 }
 0x7a4   :  { %2422 = vmatmul.bf16.gmra.mxu0 %v4623_v19  ;;  %2373 = vmatmul.bf16.gmra.mxu3 %v4625_v42  ;;  %v4638_v42 = vld [vmem:[#allocation7_spill] sm:$0xff] }
 0x7a7   :  { %v2334_v37 = vpop.f32.mrf.mxu3 }
 0x7af   :  { %v2336_v20 = vpop.f32.mrf.mxu3 }
 0x7b4   :  { %2427 = vmatmul.bf16.gmra.mxu0 %v4624_v22  ;;  %2378 = vmatmul.bf16.gmra.mxu3 %v4627_v62 }
 0x7c4   :  { %2432 = vmatmul.bf16.gmra.mxu0 %v4626_v26  ;;  %2383 = vmatmul.bf16.gmra.mxu3 %v4629_v1  ;;  %v4640_v1 = vld [vmem:[#allocation32_spill] sm:$0xff] }
 0x7d4   :  { %2437 = vmatmul.bf16.gmra.mxu0 %v4628_v53  ;;  %2388 = vmatmul.bf16.gmra.mxu3 %v4633_v27 }
 0x7e1   :  { %v2403_v58 = vpop.f32.mrf.mxu0 }
 0x7e2   :  { %v2404_v5 = vadd.f32 %v2403_v58, %v2314_v50  ;;  %v2339_v50 = vpop.f32.mrf.mxu3 }
 0x7e4   :  { %2442 = vmatmul.bf16.gmra.mxu0 %v4630_v38  ;;  %v2483_v4 = vmul.f32 %v2404_v5, %v4631_v8  ;;  %v4641_v8 = vld [vmem:[#allocation8_spill] sm:$0xff] }
 0x7e9   :  { %v2405_v3 = vpop.f32.mrf.mxu0 }
 0x7ea   :  { %v2406_v12 = vadd.f32 %v2405_v3, %v2316_v21  ;;  %v2341_v58 = vpop.f32.mrf.mxu3 }
 0x7ec   :  { %v2484_v56 = vmul.f32 %v2406_v12, %v4632_v9 }
 0x7ee   :  { %v2515_v61 = vpack.c.bf16 %v2484_v56, %v2483_v4  ;;  %v4642_v4 = vld [vmem:[#allocation6_spill] sm:$0xff] }
 0x7f0   :  { %2904 = vmatmul.msk.bf16.vlgmr.msra.gmra.mxu1 %vm1022_vm1, %v2515_v61  ;;  %v4643_v61 = vld [vmem:[#allocation34_spill] sm:$0xff] }
 0x7f1   :  { %v2408_v11 = vpop.f32.mrf.mxu0 }
 0x7f2   :  { %v2409_v0 = vadd.f32 %v2408_v11, %v2319_v17  ;;  %v4639_v17 = vld [vmem:[#allocation10_spill] sm:$0xff]  ;;  %v2344_v12 = vpop.f32.mrf.mxu3 }
 0x7f4   :  { %2447 = vmatmul.bf16.gmra.mxu0 %v4634_v2  ;;  %v2485_v18 = vmul.f32 %v2409_v0, %v4635_v29 }
 0x7f9   :  { %v2410_v46 = vpop.f32.mrf.mxu0 }
 0x7fa   :  { %v2411_v35 = vadd.f32 %v2410_v46, %v2321_v10  ;;  %v2346_v11 = vpop.f32.mrf.mxu3 }
 0x7fc   :  { %v2486_v6 = vmul.f32 %v2411_v35, %v4636_v7 }
 0x7fe   :  { %v2516_v23 = vpack.c.bf16 %v2486_v6, %v2485_v18  ;;  %v4644_v18 = vld [vmem:[#allocation36_spill] sm:$0xff] }
 0x800   :  { %2905 = vmatmul.msk.bf16.gmra.mxu1 %vm1022_vm1, %v2516_v23 }
 0x801   :  { %v2413_v45 = vpop.f32.mrf.mxu0 }
 0x802   :  { %v2414_v19 = vadd.f32 %v2413_v45, %v2324_v60  ;;  %v2349_v35 = vpop.f32.mrf.mxu3 }
 0x804   :  { %2452 = vmatmul.bf16.gmra.mxu0 %v4637_v48  ;;  %v2487_v26 = vmul.f32 %v2414_v19, %v4638_v42  ;;  %v4645_v19 = vld [vmem:[#allocation38_spill] sm:$0xff] }
 0x809   :  { %v2415_v22 = vpop.f32.mrf.mxu0 }
 0x80a   :  { %v2416_v21 = vadd.f32 %v2415_v22, %v2326_v43  ;;  %v2351_v23 = vpop.f32.mrf.mxu3 }
 0x80c   :  { %v2488_v62 = vmul.f32 %v2416_v21, %v4639_v17 }
 0x80e   :  { %v2517_v10 = vpack.c.bf16 %v2488_v62, %v2487_v26 }
 0x810   :  { %2906 = vmatmul.msk.bf16.gmra.mxu1 %vm1022_vm1, %v2517_v10 }
 0x811   :  { %v2418_v53 = vpop.f32.mrf.mxu0 }
 0x812   :  { %v2419_v38 = vadd.f32 %v2418_v53, %v2329_v47 }
 0x814   :  { %2457 = vmatmul.bf16.gmra.mxu0 %v4640_v1  ;;  %v2489_v60 = vmul.f32 %v2419_v38, %v4641_v8 }
 0x819   :  { %v2420_v5 = vpop.f32.mrf.mxu0 }
 0x81a   :  { %v2421_v3 = vadd.f32 %v2420_v5, %v2331_v16 }
 0x81c   :  { %v2490_v9 = vmul.f32 %v2421_v3, %v4642_v4  ;;  %v4212_v4 = vld [vmem:[%s4408_s10] ss:$0 sm:$0xff] }
 0x81e   :  { %v2518_v43 = vpack.c.bf16 %v2490_v9, %v2489_v60 }
 0x820   :  { %2907 = vmatmul.msk.bf16.gmra.mxu1 %vm1022_vm1, %v2518_v43 }
 0x821   :  { %v2423_v56 = vpop.f32.mrf.mxu0 }
 0x822   :  { %v2424_v27 = vadd.f32 %v2423_v56, %v2334_v37 }
 0x824   :  { %2462 = vmatmul.bf16.gmra.mxu0 %v4643_v61  ;;  %v2491_v46 = vmul.f32 %v2424_v27, %v3331_v57 }
 0x829   :  { %v2425_v2 = vpop.f32.mrf.mxu0 }
 0x82a   :  { %v2426_v0 = vadd.f32 %v2425_v2, %v2336_v20 }
 0x82c   :  { %v2492_v47 = vmul.f32 %v2426_v0, %v3326_v52  ;;  %v2354_v52 = vpop.f32.mrf.mxu3 }
 0x82e   :  { %v2519_v16 = vpack.c.bf16 %v2492_v47, %v2491_v46 }
 0x830   :  { %2908 = vmatmul.msk.bf16.gmra.mxu1 %vm1022_vm1, %v2519_v16 }
 0x831   :  { %v2428_v29 = vpop.f32.mrf.mxu0 }
 0x832   :  { %v2429_v7 = vadd.f32 %v2428_v29, %v2339_v50 }
 0x834   :  { %2467 = vmatmul.bf16.gmra.mxu0 %v4644_v18  ;;  %v2493_v48 = vmul.f32 %v2429_v7, %v3248_v39  ;;  %v2356_v17 = vpop.f32.mrf.mxu3 }
 0x839   :  { %v2430_v6 = vpop.f32.mrf.mxu0 }
 0x83a   :  { %v2431_v45 = vadd.f32 %v2430_v6, %v2341_v58 }
 0x83c   :  { %v2494_v37 = vmul.f32 %v2431_v45, %v3306_v31  ;;  %v4646_v31 = vld [vmem:[#allocation40_spill] sm:$0xff]  ;;  %v2359_v10 = vpop.f32.mrf.mxu3 }
 0x83e   :  { %v2520_v20 = vpack.c.bf16 %v2494_v37, %v2493_v48 }
 0x840   :  { %2909 = vmatmul.msk.bf16.gmra.mxu1 %vm1022_vm1, %v2520_v20 }
 0x841   :  { %v2433_v57 = vpop.f32.mrf.mxu0 }
 0x842   :  { %v2434_v22 = vadd.f32 %v2433_v57, %v2344_v12 }
 0x844   :  { %2472 = vmatmul.bf16.gmra.mxu0 %v4645_v19  ;;  %v2495_v26 = vmul.f32 %v2434_v22, %v3232_v33 }
 0x849   :  { %v2435_v21 = vpop.f32.mrf.mxu0 }
 0x84a   :  { %v2436_v42 = vadd.f32 %v2435_v21, %v2346_v11 }
 0x84c   :  { %v2496_v50 = vmul.f32 %v2436_v42, %v3234_v34  ;;  %v2361_v34 = vpop.f32.mrf.mxu3 }
 0x84e   :  { %v2521_v62 = vpack.c.bf16 %v2496_v50, %v2495_v26 }
 0x850   :  { %2910 = vmatmul.msk.bf16.gmra.mxu1 %vm1022_vm1, %v2521_v62 }
 0x851   :  { %v2438_v39 = vpop.f32.mrf.mxu0 }
 0x852   :  { %v2439_v53 = vadd.f32 %v2438_v39, %v2349_v35 }
 0x854   :  { %2477 = vmatmul.bf16.gmra.mxu0 %v4646_v31  ;;  %v2497_v38 = vmul.f32 %v2439_v53, %v3252_v41  ;;  %v2364_v9 = vpop.f32.mrf.mxu3 }
 0x859   :  { %v2440_v58 = vpop.f32.mrf.mxu0 }
 0x85a   :  { %v2441_v1 = vadd.f32 %v2440_v58, %v2351_v23 }
 0x85c   :  { %v2498_v5 = vmul.f32 %v2441_v1, %v3268_v59  ;;  %v2366_v2 = vpop.f32.mrf.mxu3 }
 0x85e   :  { %v2522_v3 = vpack.c.bf16 %v2498_v5, %v2497_v38 }
 0x860   :  { %2911 = vmatmul.msk.bf16.gmra.mxu1 %vm1022_vm1, %v2522_v3 }
 0x861   :  { %v2443_v33 = vpop.f32.mrf.mxu0 }
 0x862   :  { %v2444_v12 = vadd.f32 %v2443_v33, %v2354_v52 }
 0x864   :  { %v2499_v43 = vmul.f32 %v2444_v12, %v3435_v54  ;;  %v2369_v7 = vpop.f32.mrf.mxu3 }
 0x869   :  { %v2445_v8 = vpop.f32.mrf.mxu0 }
 0x86a   :  { %v2446_v60 = vadd.f32 %v2445_v8, %v2356_v17 }
 0x86c   :  { %v2500_v41 = vmul.f32 %v2446_v60, %v3429_v51 }
 0x86d   :  { %v2596_v56 = vpop.f32.mrf.mxu1 }
 0x86e   :  { %v2523_v59 = vpack.c.bf16 %v2500_v41, %v2499_v43  ;;  %v2597_v61 = vadd.f32 %v4212_v4, %v2596_v56 }
 0x870   :  { %2676 = vst.msk [vmem:[%s4409_s11] sm:$0xff] %vm1022_vm1, %v2597_v61  ;;  %2912 = vmatmul.msk.bf16.gmra.mxu1 %vm1022_vm1, %v2523_v59 }
 0x871   :  { %v2448_v11 = vpop.f32.mrf.mxu0 }
 0x872   :  { %v2449_v46 = vadd.f32 %v2448_v11, %v2359_v10 }
 0x874   :  { %v2501_v47 = vmul.f32 %v2449_v46, %v3388_v28 }
 0x875   :  { %v2598_v27 = vpop.f32.mrf.mxu1 }
 0x876   :  { %v2599_v0 = vadd.f32 %v4212_v4, %v2598_v27 }
 0x878   :  { %2677 = vst.msk [vmem:[%s4409_s11 + $0x8] sm:$0xff] %vm1022_vm1, %v2599_v0 }
 0x879   :  { %v2450_v51 = vpop.f32.mrf.mxu0 }
 0x87a   :  { %v2451_v54 = vadd.f32 %v2450_v51, %v2361_v34 }
 0x87c   :  { %v2502_v16 = vmul.f32 %v2451_v54, %v3421_v24  ;;  %v2371_v24 = vpop.f32.mrf.mxu3 }
 0x87d   :  { %v2601_v35 = vpop.f32.mrf.mxu1 }
 0x87e   :  { %v2524_v29 = vpack.c.bf16 %v2502_v16, %v2501_v47  ;;  %v2602_v18 = vadd.f32 %v4212_v4, %v2601_v35 }
 0x880   :  { %2678 = vst.msk [vmem:[%s4409_s11 + $0x10] sm:$0xff] %vm1022_vm1, %v2602_v18  ;;  %2913 = vmatmul.msk.bf16.gmra.mxu1 %vm1022_vm1, %v2524_v29 }
 0x881   :  { %v2453_v6 = vpop.f32.mrf.mxu0 }
 0x882   :  { %v2454_v48 = vadd.f32 %v2453_v6, %v2364_v9 }
 0x884   :  { %v2503_v20 = vmul.f32 %v2454_v48, %v3380_v14  ;;  %v2374_v42 = vpop.f32.mrf.mxu3 }
 0x885   :  { %v2603_v23 = vpop.f32.mrf.mxu1 }
 0x886   :  { %v2604_v45 = vadd.f32 %v4212_v4, %v2603_v23 }
 0x888   :  { %2679 = vst.msk [vmem:[%s4409_s11 + $0x18] sm:$0xff] %vm1022_vm1, %v2604_v45 }
 0x889   :  { %v2455_v28 = vpop.f32.mrf.mxu0 }
 0x88a   :  { %v2456_v37 = vadd.f32 %v2455_v28, %v2366_v2 }
 0x88c   :  { %v2504_v57 = vmul.f32 %v2456_v37, %v3371_v55  ;;  %v2376_v10 = vpop.f32.mrf.mxu3 }
 0x88d   :  { %v2606_v52 = vpop.f32.mrf.mxu1 }
 0x88e   :  { %v2525_v19 = vpack.c.bf16 %v2504_v57, %v2503_v20  ;;  %v2607_v22 = vadd.f32 %v4212_v4, %v2606_v52 }
 0x890   :  { %2680 = vst.msk [vmem:[%s4409_s11 + $0x20] sm:$0xff] %vm1022_vm1, %v2607_v22  ;;  %2914 = vmatmul.msk.bf16.gmra.mxu1 %vm1022_vm1, %v2525_v19 }
 0x891   :  { %v2458_v21 = vpop.f32.mrf.mxu0 }
 0x892   :  { %v2459_v17 = vadd.f32 %v2458_v21, %v2369_v7 }
 0x894   :  { %v2505_v62 = vmul.f32 %v2459_v17, %v3368_v49  ;;  %v2379_v3 = vpop.f32.mrf.mxu3 }
 0x895   :  { %v2608_v26 = vpop.f32.mrf.mxu1 }
 0x896   :  { %v2609_v50 = vadd.f32 %v4212_v4, %v2608_v26 }
 0x898   :  { %2681 = vst.msk [vmem:[%s4409_s11 + $0x28] sm:$0xff] %vm1022_vm1, %v2609_v50 }
 0x899   :  { %v2460_v55 = vpop.f32.mrf.mxu0 }
 0x89a   :  { %v2461_v14 = vadd.f32 %v2460_v55, %v2371_v24 }
 0x89c   :  { %v2506_v39 = vmul.f32 %v2461_v14, %v3363_v44  ;;  %v2381_v41 = vpop.f32.mrf.mxu3 }
 0x89d   :  { %v2611_v31 = vpop.f32.mrf.mxu1 }
 0x89e   :  { %v2526_v53 = vpack.c.bf16 %v2506_v39, %v2505_v62  ;;  %v2612_v58 = vadd.f32 %v4212_v4, %v2611_v31 }
 0x8a0   :  { %2682 = vst.msk [vmem:[%s4409_s11 + $0x30] sm:$0xff] %vm1022_vm1, %v2612_v58  ;;  %2915 = vmatmul.msk.bf16.gmra.mxu1 %vm1022_vm1, %v2526_v53 }
 0x8a1   :  { %v2463_v1 = vpop.f32.mrf.mxu0 }
 0x8a2   :  { %v2464_v49 = vadd.f32 %v2463_v1, %v2374_v42 }
 0x8a4   :  { %v2507_v34 = vmul.f32 %v2464_v49, %v4612_v32  ;;  %v2384_v11 = vpop.f32.mrf.mxu3 }
 0x8a5   :  { %v2613_v38 = vpop.f32.mrf.mxu1 }
 0x8a6   :  { %v2614_v5 = vadd.f32 %v4212_v4, %v2613_v38 }
 0x8a8   :  { %2683 = vst.msk [vmem:[%s4409_s11 + $0x38] sm:$0xff] %vm1022_vm1, %v2614_v5 }
 0x8a9   :  { %v2465_v44 = vpop.f32.mrf.mxu0 }
 0x8aa   :  { %v2466_v33 = vadd.f32 %v2465_v44, %v2376_v10 }
 0x8ac   :  { %v2508_v12 = vmul.f32 %v2466_v33, %v4610_v25  ;;  %v2386_v16 = vpop.f32.mrf.mxu3 }
 0x8ad   :  { %v2616_v8 = vpop.f32.mrf.mxu1 }
 0x8ae   :  { %v2527_v60 = vpack.c.bf16 %v2508_v12, %v2507_v34  ;;  %v2617_v9 = vadd.f32 %v4212_v4, %v2616_v8 }
 0x8b0   :  { %2684 = vst.msk [vmem:[%s4409_s11 + $0x40] sm:$0xff] %vm1022_vm1, %v2617_v9  ;;  %2916 = vmatmul.msk.bf16.gmra.mxu1 %vm1022_vm1, %v2527_v60 }
 0x8b1   :  { %v2468_v43 = vpop.f32.mrf.mxu0 }
 0x8b2   :  { %v2469_v61 = vadd.f32 %v2468_v43, %v2379_v3 }
 0x8b4   :  { %v2509_v27 = vmul.f32 %v2469_v61, %v4609_v36  ;;  %v2389_v48 = vpop.f32.mrf.mxu3 }
 0x8b5   :  { %v2618_v56 = vpop.f32.mrf.mxu1 }
 0x8b6   :  { %v2619_v59 = vadd.f32 %v4212_v4, %v2618_v56 }
 0x8b8   :  { %2685 = vst.msk [vmem:[%s4409_s11 + $0x48] sm:$0xff] %vm1022_vm1, %v2619_v59 }
 0x8b9   :  { %v2470_v25 = vpop.f32.mrf.mxu0 }
 0x8ba   :  { %v2471_v32 = vadd.f32 %v2470_v25, %v2381_v41 }
 0x8bc   :  { %v2510_v2 = vmul.f32 %v2471_v32, %v3272_v63 }
 0x8bd   :  { %v2621_v0 = vpop.f32.mrf.mxu1 }
 0x8be   :  { %v2528_v46 = vpack.c.bf16 %v2510_v2, %v2509_v27  ;;  %v2622_v51 = vadd.f32 %v4212_v4, %v2621_v0 }
 0x8c0   :  { %2686 = vst.msk [vmem:[%s4409_s11 + $0x50] sm:$0xff] %vm1022_vm1, %v2622_v51  ;;  %2917 = vmatmul.msk.bf16.gmra.mxu1 %vm1022_vm1, %v2528_v46 }
 0x8c1   :  { %v2473_v54 = vpop.f32.mrf.mxu0 }
 0x8c2   :  { %v2474_v29 = vadd.f32 %v2473_v54, %v2384_v11 }
 0x8c4   :  { %v2511_v18 = vmul.f32 %v2474_v29, %v3292_v15 }
 0x8c5   :  { %v2623_v47 = vpop.f32.mrf.mxu1 }
 0x8c6   :  { %v2624_v35 = vadd.f32 %v4212_v4, %v2623_v47 }
 0x8c8   :  { %2687 = vst.msk [vmem:[%s4409_s11 + $0x58] sm:$0xff] %vm1022_vm1, %v2624_v35 }
 0x8c9   :  { %v2475_v63 = vpop.f32.mrf.mxu0 }
 0x8ca   :  { %v2476_v36 = vadd.f32 %v2475_v63, %v2386_v16 }
 0x8cc   :  { %v2512_v7 = vmul.f32 %v2476_v36, %v3290_v13  ;;  %v2391_v13 = vpop.f32.mrf.mxu3 }
 0x8cd   :  { %v2626_v6 = vpop.f32.mrf.mxu1 }
 0x8ce   :  { %v2529_v23 = vpack.c.bf16 %v2512_v7, %v2511_v18  ;;  %v2627_v45 = vadd.f32 %v4212_v4, %v2626_v6 }
 0x8d0   :  { %2688 = vst.msk [vmem:[%s4409_s11 + $0x60] sm:$0xff] %vm1022_vm1, %v2627_v45  ;;  %2918 = vmatmul.msk.bf16.gmra.mxu1 %vm1022_vm1, %v2529_v23 }
 0x8d1   :  { %v2478_v28 = vpop.f32.mrf.mxu0 }
 0x8d2   :  { %v2479_v20 = vadd.f32 %v2478_v28, %v2389_v48 }
 0x8d4   :  { %v2513_v52 = vmul.f32 %v2479_v20, %v3250_v40 }
 0x8d5   :  { %v2628_v24 = vpop.f32.mrf.mxu1 }
 0x8d6   :  { %v2629_v37 = vadd.f32 %v4212_v4, %v2628_v24 }
 0x8d8   :  { %2689 = vst.msk [vmem:[%s4409_s11 + $0x68] sm:$0xff] %vm1022_vm1, %v2629_v37 }
 0x8d9   :  { %v2480_v15 = vpop.f32.mrf.mxu0 }
 0x8da   :  { %v2481_v57 = vadd.f32 %v2480_v15, %v2391_v13 }
 0x8dc   :  { %v2514_v19 = vmul.f32 %v2481_v57, %v4611_v30 }
 0x8dd   :  { %v2631_v22 = vpop.f32.mrf.mxu1 }
 0x8de   :  { %v2530_v21 = vpack.c.bf16 %v2514_v19, %v2513_v52  ;;  %v2632_v42 = vadd.f32 %v4212_v4, %v2631_v22 }
 0x8e0   :  { %2690 = vst.msk [vmem:[%s4409_s11 + $0x70] sm:$0xff] %vm1022_vm1, %v2632_v42  ;;  %2919 = vmatmul.msk.bf16.gmra.mxu1 %vm1022_vm1, %v2530_v21 }
 0x8e5   :  { %v2633_v26 = vpop.f32.mrf.mxu1 }
 0x8e6   :  { %v2634_v50 = vadd.f32 %v4212_v4, %v2633_v26 }
 0x8e8   :  { %2691 = vst.msk [vmem:[%s4409_s11 + $0x78] sm:$0xff] %vm1022_vm1, %v2634_v50 }
 0x8ed   :  { %v2636_v40 = vpop.f32.mrf.mxu1 }
 0x8ee   :  { %v2637_v30 = vadd.f32 %v4212_v4, %v2636_v40 }
 0x8f0   :  { %2692 = vst.msk [vmem:[%s4409_s11 + $0x80] sm:$0xff] %vm1022_vm1, %v2637_v30 }
 0x8f5   :  { %v2638_v17 = vpop.f32.mrf.mxu1 }
 0x8f6   :  { %v2639_v55 = vadd.f32 %v4212_v4, %v2638_v17 }
 0x8f8   :  { %2693 = vst.msk [vmem:[%s4409_s11 + $0x88] sm:$0xff] %vm1022_vm1, %v2639_v55 }
 0x8fd   :  { %v2641_v14 = vpop.f32.mrf.mxu1 }
 0x8fe   :  { %v2642_v62 = vadd.f32 %v4212_v4, %v2641_v14 }
 0x900   :  { %2694 = vst.msk [vmem:[%s4409_s11 + $0x90] sm:$0xff] %vm1022_vm1, %v2642_v62 }
 0x905   :  { %v2643_v39 = vpop.f32.mrf.mxu1 }
 0x906   :  { %v2644_v31 = vadd.f32 %v4212_v4, %v2643_v39 }
 0x908   :  { %2695 = vst.msk [vmem:[%s4409_s11 + $0x98] sm:$0xff] %vm1022_vm1, %v2644_v31 }
 0x90d   :  { %v2646_v10 = vpop.f32.mrf.mxu1 }
 0x90e   :  { %v2647_v53 = vadd.f32 %v4212_v4, %v2646_v10 }
 0x910   :  { %2696 = vst.msk [vmem:[%s4409_s11 + $0xa0] sm:$0xff] %vm1022_vm1, %v2647_v53 }
 0x915   :  { %v2648_v58 = vpop.f32.mrf.mxu1 }
 0x916   :  { %v2649_v1 = vadd.f32 %v4212_v4, %v2648_v58 }
 0x918   :  { %2697 = vst.msk [vmem:[%s4409_s11 + $0xa8] sm:$0xff] %vm1022_vm1, %v2649_v1 }
 0x91d   :  { %v2651_v38 = vpop.f32.mrf.mxu1 }
 0x91e   :  { %v2652_v5 = vadd.f32 %v4212_v4, %v2651_v38 }
 0x920   :  { %2698 = vst.msk [vmem:[%s4409_s11 + $0xb0] sm:$0xff] %vm1022_vm1, %v2652_v5 }
 0x925   :  { %v2653_v3 = vpop.f32.mrf.mxu1 }
 0x926   :  { %v2654_v49 = vadd.f32 %v4212_v4, %v2653_v3 }
 0x928   :  { %2699 = vst.msk [vmem:[%s4409_s11 + $0xb8] sm:$0xff] %vm1022_vm1, %v2654_v49 }
 0x92d   :  { %v2656_v44 = vpop.f32.mrf.mxu1 }
 0x92e   :  { %v2657_v33 = vadd.f32 %v4212_v4, %v2656_v44 }
 0x930   :  { %2700 = vst.msk [vmem:[%s4409_s11 + $0xc0] sm:$0xff] %vm1022_vm1, %v2657_v33 }
 0x935   :  { %v2658_v34 = vpop.f32.mrf.mxu1 }
 0x936   :  { %v2659_v12 = vadd.f32 %v4212_v4, %v2658_v34 }
 0x938   :  { %2701 = vst.msk [vmem:[%s4409_s11 + $0xc8] sm:$0xff] %vm1022_vm1, %v2659_v12 }
 0x93d   :  { %v2661_v8 = vpop.f32.mrf.mxu1 }
 0x93e   :  { %v2662_v60 = vadd.f32 %v4212_v4, %v2661_v8 }
 0x940   :  { %2702 = vst.msk [vmem:[%s4409_s11 + $0xd0] sm:$0xff] %vm1022_vm1, %v2662_v60 }
 0x945   :  { %v2663_v9 = vpop.f32.mrf.mxu1 }
 0x946   :  { %v2664_v43 = vadd.f32 %v4212_v4, %v2663_v9 }
 0x948   :  { %2703 = vst.msk [vmem:[%s4409_s11 + $0xd8] sm:$0xff] %vm1022_vm1, %v2664_v43 }
 0x94d   :  { %v2666_v41 = vpop.f32.mrf.mxu1 }
 0x94e   :  { %v2667_v56 = vadd.f32 %v4212_v4, %v2666_v41 }
 0x950   :  { %2704 = vst.msk [vmem:[%s4409_s11 + $0xe0] sm:$0xff] %vm1022_vm1, %v2667_v56 }
 0x955   :  { %v2668_v59 = vpop.f32.mrf.mxu1 }
 0x956   :  { %v2669_v61 = vadd.f32 %v4212_v4, %v2668_v59 }
 0x958   :  { %2705 = vst.msk [vmem:[%s4409_s11 + $0xe8] sm:$0xff] %vm1022_vm1, %v2669_v61 }
 0x95d   :  { %v2671_v25 = vpop.f32.mrf.mxu1 }
 0x95e   :  { %v2672_v32 = vadd.f32 %v4212_v4, %v2671_v25 }
 0x960   :  { %2706 = vst.msk [vmem:[%s4409_s11 + $0xf0] sm:$0xff] %vm1022_vm1, %v2672_v32 }
 0x965   :  { %v2673_v11 = vpop.f32.mrf.mxu1 }
 0x966   :  { %v2674_v27 = vadd.f32 %v4212_v4, %v2673_v11 }
 0x968   :  { %2707 = vst.msk [vmem:[%s4409_s11 + $0xf8] sm:$0xff] %vm1022_vm1, %v2674_v27 }

</bundles_post_ra>
